<compile_context>
chip_gen: v7x
topology: tpu7x:2x2x1
jax: 0.10.0
libtpu: 0.0.40
codegen_flags: <defaults>
</compile_context>

<pallas_src>
import functools

import numpy as np
import jax
import jax.numpy as jnp
from jax.experimental import pallas as pl
from jax.experimental.pallas import tpu as pltpu


# ----------------------------------------------------------------------------
# Fused kernel.  Per grid step it processes a batch tile of `tb` samples.
#
# In-kernel activation layouts (all 2-D, MXU/vreg friendly, h-major rows):
#   conv1 out : (24*tb, 256)  rows = ho*tb + b, lanes = w*6  + c   (144 valid)
#   conv2 out : (8*tb, 128)   rows = h2*tb + b, lanes = wo*12 + co (96 valid)
#   fc / out  : (tb, N)
# ----------------------------------------------------------------------------
def _lenet_fused_kernel(x_ref, a1_ref, b1_ref, a2_ref, b2_ref,
                        f1_ref, bf1_ref, wf2_ref, bf2_ref,
                        wo_ref, bo_ref, o_ref):
    f32, bf16 = jnp.float32, jnp.bfloat16
    tb = o_ref.shape[0]

    # ---- conv1 + ReLU + pool1(W): one wide MXU dot ---------------------------
    # x_ref rows = ho*tb + b, lanes = i*28 + w (H-only im2row from the wrapper).
    # a1 holds the two pool-W-shifted weight copies in 128-aligned lane halves.
    y1 = jnp.dot(x_ref[...], a1_ref[...], preferred_element_type=f32)   # (24*tb, 512)
    m1 = jnp.maximum(jnp.maximum(y1[:, :256], y1[:, 256:]) + b1_ref[...], 0.0)

    # ---- pool1(H): pairwise max of adjacent h-slabs (aligned sublane slices) --
    p1 = jnp.concatenate(
        [jnp.maximum(m1[(2 * hp) * tb:(2 * hp + 1) * tb, :],
                     m1[(2 * hp + 1) * tb:(2 * hp + 2) * tb, :])
         for hp in range(12)], axis=0).astype(bf16)                     # (12*tb, 256)

    # ---- conv2 + ReLU + pool2(W): 5 row-offset dots, single f32 accumulator --
    acc2 = jnp.zeros((8 * tb, 256), f32)
    for i in range(5):
        acc2 = acc2 + jnp.dot(p1[i * tb:(i + 8) * tb, :], a2_ref[i],
                              preferred_element_type=f32)
    m2 = jnp.maximum(jnp.maximum(acc2[:, :128], acc2[:, 128:]) + b2_ref[...], 0.0)

    # ---- pool2(H) + NCHW flatten (folded into f1) + fc1 + ReLU ----------------
    acc = jnp.zeros((tb, 120), f32)
    for hq in range(4):
        rh = jnp.maximum(m2[(2 * hq) * tb:(2 * hq + 1) * tb, :],
                         m2[(2 * hq + 1) * tb:(2 * hq + 2) * tb, :])    # (tb, 128)
        acc = acc + jnp.dot(rh.astype(bf16), f1_ref[hq],
                            preferred_element_type=f32)
    h1 = jnp.maximum(acc + bf1_ref[...], 0.0).astype(bf16)              # (tb, 120)

    # ---- fc2 + ReLU -----------------------------------------------------------
    h2 = jnp.dot(h1, wf2_ref[...], preferred_element_type=f32)
    h2 = jnp.maximum(h2 + bf2_ref[...], 0.0).astype(bf16)               # (tb, 60)

    # ---- out (padded to 128 lanes -> unmasked, lane-dense store) --------------
    out = jnp.dot(h2, wo_ref[...], preferred_element_type=f32) + bo_ref[...]
    o_ref[...] = out.astype(o_ref.dtype)                                # (tb, 128)


# ----------------------------------------------------------------------------
# One-time weight packing (outside jit, tb-independent).
# ----------------------------------------------------------------------------
def pack_params(p):
    w1 = np.asarray(p["w_conv1"], np.float32)   # (6, 1, 5, 5)
    b1 = np.asarray(p["b_conv1"], np.float32)   # (6,)
    w2 = np.asarray(p["w_conv2"], np.float32)   # (12, 6, 5, 5)
    b2 = np.asarray(p["b_conv2"], np.float32)   # (12,)
    wf1 = np.asarray(p["w_fc1"], np.float32)    # (120, 192)
    bf1 = np.asarray(p["b_fc1"], np.float32)    # (120,)
    wf2 = np.asarray(p["w_fc2"], np.float32)    # (60, 120)
    bf2 = np.asarray(p["b_fc2"], np.float32)    # (60,)
    wo = np.asarray(p["w_out"], np.float32)     # (10, 60)
    bo = np.asarray(p["b_out"], np.float32)     # (10,)

    # conv1: rows k = i*28 + wc (kernel row offset i, input column wc),
    # cols = d*256 + w*6 + c  (d = pool1-W shift, 128-aligned halves).
    a1 = np.zeros((140, 512), np.float32)
    for d in range(2):
        for i in range(5):
            for w in range(24):
                for j in range(5):
                    wc = w + d + j
                    if wc >= 28:
                        continue
                    a1[i * 28 + wc, d * 256 + 6 * w:d * 256 + 6 * w + 6] = w1[:, 0, i, j]
    b1row = np.zeros((1, 256), np.float32)
    b1row[0, :144] = np.tile(b1, 24)

    # conv2: one (256, 256) slab per kernel row offset i; rows = pool1 lane
    # 12*wp + ci (rest zero), cols = d*128 + wo*12 + co (d = pool2-W shift).
    a2 = np.zeros((5, 256, 256), np.float32)
    for d in range(2):
        for i in range(5):
            for wo_ in range(8):
                for j in range(5):
                    wp = wo_ + d + j
                    if wp >= 12:
                        continue
                    for ci in range(6):
                        a2[i, 12 * wp + ci,
                           d * 128 + 12 * wo_:d * 128 + 12 * wo_ + 12] = w2[:, ci, i, j]
    b2row = np.zeros((1, 128), np.float32)
    b2row[0, :96] = np.tile(b2, 8)

    # fc1 weights permuted to the kernel's lane order (24*wq + co), with
    # PyTorch's NCHW flatten (k = co*16 + hq*4 + wq) baked in; junk lanes -> 0.
    f1 = np.zeros((4, 128, 120), np.float32)
    for hq in range(4):
        for wq in range(4):
            for co in range(12):
                f1[hq, 24 * wq + co, :] = wf1[:, co * 16 + hq * 4 + wq]

    wo_pad = np.zeros((60, 128), np.float32)
    wo_pad[:, :10] = wo.T
    bo_pad = np.zeros((1, 128), np.float32)
    bo_pad[0, :10] = bo

    bf16, f32 = jnp.bfloat16, jnp.float32
    return dict(
        a1=jnp.asarray(a1, bf16), b1=jnp.asarray(b1row, f32),
        a2=jnp.asarray(a2, bf16), b2=jnp.asarray(b2row, f32),
        f1=jnp.asarray(f1, bf16), bf1=jnp.asarray(bf1[None, :], f32),
        wf2=jnp.asarray(wf2.T, bf16), bf2=jnp.asarray(bf2[None, :], f32),
        wo=jnp.asarray(wo_pad, bf16), bo=jnp.asarray(bo_pad, f32),
    )


def _full_spec(arr):
    nd = arr.ndim
    return pl.BlockSpec(arr.shape, lambda i, _nd=nd: (0,) * _nd)


@functools.partial(jax.jit, static_argnames=("tb",))
def lenet_forward(packed, x, *, tb=32):
    """x: (B, 1, 28, 28) f32 -> (B, 10) f32.  tb must divide B and be a
    multiple of 16 (bf16 sublane-slab alignment); keep B/tb >= 2 so the
    "parallel" grid can shard across v7x's two TensorCores."""
    b = x.shape[0]
    assert x.shape[1:] == (1, 28, 28)
    assert b % tb == 0 and tb % 16 == 0
    g = b // tb

    # H-only im2row (lanes k = i*28 + w) + h-major, batch-tiled row layout
    # (row = tile*24*tb + ho*tb + b), shipped as bf16.  Pure layout plumbing
    # done once in XLA so every in-kernel gather is an aligned sublane slice.
    x3 = x.reshape(b, 28, 28)
    xcat = jnp.concatenate([x3[:, i:i + 24, :] for i in range(5)], axis=-1)   # (B,24,140)
    x2d = (xcat.reshape(g, tb, 24, 140).transpose(0, 2, 1, 3)
           .reshape(g * 24 * tb, 140).astype(jnp.bfloat16))

    in_specs = [
        pl.BlockSpec((24 * tb, 140), lambda i: (i, 0)),   # input pixels (tiled)
        _full_spec(packed["a1"]), _full_spec(packed["b1"]),
        _full_spec(packed["a2"]), _full_spec(packed["b2"]),
        _full_spec(packed["f1"]), _full_spec(packed["bf1"]),
        _full_spec(packed["wf2"]), _full_spec(packed["bf2"]),
        _full_spec(packed["wo"]), _full_spec(packed["bo"]),
    ]
    out = pl.pallas_call(
        _lenet_fused_kernel,
        out_shape=jax.ShapeDtypeStruct((b, 128), jnp.float32),
        grid=(g,),
        in_specs=in_specs,
        out_specs=pl.BlockSpec((tb, 128), lambda i: (i, 0)),
        compiler_params=pltpu.CompilerParams(
            dimension_semantics=("parallel",),
            vmem_limit_bytes=32 * 1024 * 1024),
    )(x2d, packed["a1"], packed["b1"], packed["a2"], packed["b2"],
      packed["f1"], packed["bf1"], packed["wf2"], packed["bf2"],
      packed["wo"], packed["bo"])
    return out[:, :10]


# ----------------------------------------------------------------------------
# Parameter init (PyTorch layout) and a pure-JAX f32 reference for checking.
# ----------------------------------------------------------------------------
def init_params(key):
    ks = jax.random.split(key, 10)
    p = {}
    p["w_conv1"] = 0.1 * jax.random.normal(ks[0], (6, 1, 5, 5), jnp.float32)
    p["b_conv1"] = 0.1 * jax.random.normal(ks[1], (6,), jnp.float32)
    p["w_conv2"] = 0.1 * jax.random.normal(ks[2], (12, 6, 5, 5), jnp.float32)
    p["b_conv2"] = 0.1 * jax.random.normal(ks[3], (12,), jnp.float32)
    p["w_fc1"] = 0.1 * jax.random.normal(ks[4], (120, 192), jnp.float32)
    p["b_fc1"] = 0.1 * jax.random.normal(ks[5], (120,), jnp.float32)
    p["w_fc2"] = 0.1 * jax.random.normal(ks[6], (60, 120), jnp.float32)
    p["b_fc2"] = 0.1 * jax.random.normal(ks[7], (60,), jnp.float32)
    p["w_out"] = 0.1 * jax.random.normal(ks[8], (10, 60), jnp.float32)
    p["b_out"] = 0.1 * jax.random.normal(ks[9], (10,), jnp.float32)
    return p


def _ref_conv_relu(x, w, bias):
    cout, cin, k, _ = w.shape
    b, c, h, wd = x.shape
    ho, wo = h - k + 1, wd - k + 1
    cols = []
    for ci in range(c):
        for i in range(k):
            for j in range(k):
                cols.append(x[:, ci, i:i + ho, j:j + wo])
    p = jnp.stack(cols, axis=-1).reshape(b * ho * wo, c * k * k)
    y = jnp.maximum(p @ w.reshape(cout, cin * k * k).T + bias, 0.0)
    return jnp.transpose(y.reshape(b, ho, wo, cout), (0, 3, 1, 2))


def _ref_pool(x):
    b, c, h, w = x.shape
    return x.reshape(b, c, h // 2, 2, w // 2, 2).max(axis=(3, 5))


def reference_forward(p, x):
    t = _ref_pool(_ref_conv_relu(x, p["w_conv1"], p["b_conv1"]))
    t = _ref_pool(_ref_conv_relu(t, p["w_conv2"], p["b_conv2"]))
    t = t.reshape(-1, 12 * 4 * 4)
    t = jnp.maximum(t @ p["w_fc1"].T + p["b_fc1"], 0.0)
    t = jnp.maximum(t @ p["w_fc2"].T + p["b_fc2"], 0.0)
    return t @ p["w_out"].T + p["b_out"]


if __name__ == "__main__":
    key = jax.random.PRNGKey(0)
    k_param, k_x = jax.random.split(key)
    params = init_params(k_param)
    x = jax.random.normal(k_x, (32, 1, 28, 28), jnp.float32)  # NCHW, MNIST-sized

    packed = pack_params(params)                 # one-time, tb-independent packing
    out = lenet_forward(packed, x, tb=16)        # grid of 2 -> one step per v7x core
    out = jax.block_until_ready(out)
    assert out.shape == (32, 10) and out.dtype == jnp.float32

    # Numerical check against a pure-JAX f32 reference of the PyTorch module
    # (tolerance accounts for bf16 MXU operands / activation casts in the kernel).
    ref = reference_forward(params, x)
    err = float(jnp.max(jnp.abs(out - ref)))
    tol = 1e-1 + 3e-2 * float(jnp.max(jnp.abs(ref)))
    assert err < tol, f"max abs error {err} vs tol {tol}"
    print("KERNEL_OK")
</pallas_src>

<mosaic_0001>
module attributes {stable_mosaic.version = 11 : i64} {
  func.func @_lenet_fused_kernel(%arg0: i32, %arg1: memref<384x140xbf16, #tpu.memory_space<vmem>>, %arg2: memref<140x512xbf16, #tpu.memory_space<vmem>>, %arg3: memref<1x256xf32, #tpu.memory_space<vmem>>, %arg4: memref<5x256x256xbf16, #tpu.memory_space<vmem>>, %arg5: memref<1x128xf32, #tpu.memory_space<vmem>>, %arg6: memref<4x128x120xbf16, #tpu.memory_space<vmem>>, %arg7: memref<1x120xf32, #tpu.memory_space<vmem>>, %arg8: memref<120x60xbf16, #tpu.memory_space<vmem>>, %arg9: memref<1x60xf32, #tpu.memory_space<vmem>>, %arg10: memref<60x128xbf16, #tpu.memory_space<vmem>>, %arg11: memref<1x128xf32, #tpu.memory_space<vmem>>, %arg12: memref<16x128xf32, #tpu.memory_space<vmem>>) attributes {dimension_semantics = [#tpu.dimension_semantics<parallel>], iteration_bounds = array<i64: 2>, scalar_prefetch = 0 : i64, scratch_operands = 0 : i64, tpu.core_type = #tpu.core_type<tc>, window_params = [{transform_indices = @transform_0, window_bounds = array<i64: 384, 140>}, {pipeline_mode = #tpu.pipeline_mode<synchronous>, transform_indices = @transform_1, window_bounds = array<i64: 140, 512>}, {pipeline_mode = #tpu.pipeline_mode<synchronous>, transform_indices = @transform_2, window_bounds = array<i64: 1, 256>}, {pipeline_mode = #tpu.pipeline_mode<synchronous>, transform_indices = @transform_3, window_bounds = array<i64: 5, 256, 256>}, {pipeline_mode = #tpu.pipeline_mode<synchronous>, transform_indices = @transform_4, window_bounds = array<i64: 1, 128>}, {pipeline_mode = #tpu.pipeline_mode<synchronous>, transform_indices = @transform_5, window_bounds = array<i64: 4, 128, 120>}, {pipeline_mode = #tpu.pipeline_mode<synchronous>, transform_indices = @transform_6, window_bounds = array<i64: 1, 120>}, {pipeline_mode = #tpu.pipeline_mode<synchronous>, transform_indices = @transform_7, window_bounds = array<i64: 120, 60>}, {pipeline_mode = #tpu.pipeline_mode<synchronous>, transform_indices = @transform_8, window_bounds = array<i64: 1, 60>}, {pipeline_mode = #tpu.pipeline_mode<synchronous>, transform_indices = @transform_9, window_bounds = array<i64: 60, 128>}, {pipeline_mode = #tpu.pipeline_mode<synchronous>, transform_indices = @transform_10, window_bounds = array<i64: 1, 128>}, {transform_indices = @transform_11, window_bounds = array<i64: 16, 128>}]} {
    %c0 = arith.constant 0 : index
    %c0_0 = arith.constant 0 : index
    %0 = vector.load %arg1[%c0, %c0_0] : memref<384x140xbf16, #tpu.memory_space<vmem>>, vector<384x140xbf16>
    %c0_1 = arith.constant 0 : index
    %c0_2 = arith.constant 0 : index
    %1 = vector.load %arg2[%c0_1, %c0_2] : memref<140x512xbf16, #tpu.memory_space<vmem>>, vector<140x512xbf16>
    %cst = arith.constant dense<0.000000e+00> : vector<384x512xf32>
    %2 = tpu.matmul %0, %1, %cst {dimension_numbers = #tpu.dot_dimension_numbers<[1], [0], [0], [1], [0, 0, 1, 1], [], []>} : vector<384x140xbf16>, vector<140x512xbf16>, vector<384x512xf32> -> vector<384x512xf32>
    %3 = vector.extract_strided_slice %2 {offsets = [0, 0], sizes = [384, 256], strides = [1, 1]} : vector<384x512xf32> to vector<384x256xf32>
    %4 = vector.extract_strided_slice %2 {offsets = [0, 256], sizes = [384, 256], strides = [1, 1]} : vector<384x512xf32> to vector<384x256xf32>
    %5 = arith.maximumf %3, %4 : vector<384x256xf32>
    %c0_3 = arith.constant 0 : index
    %c0_4 = arith.constant 0 : index
    %6 = vector.load %arg3[%c0_3, %c0_4] : memref<1x256xf32, #tpu.memory_space<vmem>>, vector<1x256xf32>
    %7 = vector.broadcast %6 : vector<1x256xf32> to vector<384x256xf32>
    %8 = arith.addf %5, %7 : vector<384x256xf32>
    %cst_5 = arith.constant 0.000000e+00 : f32
    %9 = vector.broadcast %cst_5 : f32 to vector<384x256xf32>
    %10 = arith.maximumf %8, %9 : vector<384x256xf32>
    %11 = vector.extract_strided_slice %10 {offsets = [0, 0], sizes = [16, 256], strides = [1, 1]} : vector<384x256xf32> to vector<16x256xf32>
    %12 = vector.extract_strided_slice %10 {offsets = [16, 0], sizes = [16, 256], strides = [1, 1]} : vector<384x256xf32> to vector<16x256xf32>
    %13 = arith.maximumf %11, %12 : vector<16x256xf32>
    %14 = vector.extract_strided_slice %10 {offsets = [32, 0], sizes = [16, 256], strides = [1, 1]} : vector<384x256xf32> to vector<16x256xf32>
    %15 = vector.extract_strided_slice %10 {offsets = [48, 0], sizes = [16, 256], strides = [1, 1]} : vector<384x256xf32> to vector<16x256xf32>
    %16 = arith.maximumf %14, %15 : vector<16x256xf32>
    %17 = vector.extract_strided_slice %10 {offsets = [64, 0], sizes = [16, 256], strides = [1, 1]} : vector<384x256xf32> to vector<16x256xf32>
    %18 = vector.extract_strided_slice %10 {offsets = [80, 0], sizes = [16, 256], strides = [1, 1]} : vector<384x256xf32> to vector<16x256xf32>
    %19 = arith.maximumf %17, %18 : vector<16x256xf32>
    %20 = vector.extract_strided_slice %10 {offsets = [96, 0], sizes = [16, 256], strides = [1, 1]} : vector<384x256xf32> to vector<16x256xf32>
    %21 = vector.extract_strided_slice %10 {offsets = [112, 0], sizes = [16, 256], strides = [1, 1]} : vector<384x256xf32> to vector<16x256xf32>
    %22 = arith.maximumf %20, %21 : vector<16x256xf32>
    %23 = vector.extract_strided_slice %10 {offsets = [128, 0], sizes = [16, 256], strides = [1, 1]} : vector<384x256xf32> to vector<16x256xf32>
    %24 = vector.extract_strided_slice %10 {offsets = [144, 0], sizes = [16, 256], strides = [1, 1]} : vector<384x256xf32> to vector<16x256xf32>
    %25 = arith.maximumf %23, %24 : vector<16x256xf32>
    %26 = vector.extract_strided_slice %10 {offsets = [160, 0], sizes = [16, 256], strides = [1, 1]} : vector<384x256xf32> to vector<16x256xf32>
    %27 = vector.extract_strided_slice %10 {offsets = [176, 0], sizes = [16, 256], strides = [1, 1]} : vector<384x256xf32> to vector<16x256xf32>
    %28 = arith.maximumf %26, %27 : vector<16x256xf32>
    %29 = vector.extract_strided_slice %10 {offsets = [192, 0], sizes = [16, 256], strides = [1, 1]} : vector<384x256xf32> to vector<16x256xf32>
    %30 = vector.extract_strided_slice %10 {offsets = [208, 0], sizes = [16, 256], strides = [1, 1]} : vector<384x256xf32> to vector<16x256xf32>
    %31 = arith.maximumf %29, %30 : vector<16x256xf32>
    %32 = vector.extract_strided_slice %10 {offsets = [224, 0], sizes = [16, 256], strides = [1, 1]} : vector<384x256xf32> to vector<16x256xf32>
    %33 = vector.extract_strided_slice %10 {offsets = [240, 0], sizes = [16, 256], strides = [1, 1]} : vector<384x256xf32> to vector<16x256xf32>
    %34 = arith.maximumf %32, %33 : vector<16x256xf32>
    %35 = vector.extract_strided_slice %10 {offsets = [256, 0], sizes = [16, 256], strides = [1, 1]} : vector<384x256xf32> to vector<16x256xf32>
    %36 = vector.extract_strided_slice %10 {offsets = [272, 0], sizes = [16, 256], strides = [1, 1]} : vector<384x256xf32> to vector<16x256xf32>
    %37 = arith.maximumf %35, %36 : vector<16x256xf32>
    %38 = vector.extract_strided_slice %10 {offsets = [288, 0], sizes = [16, 256], strides = [1, 1]} : vector<384x256xf32> to vector<16x256xf32>
    %39 = vector.extract_strided_slice %10 {offsets = [304, 0], sizes = [16, 256], strides = [1, 1]} : vector<384x256xf32> to vector<16x256xf32>
    %40 = arith.maximumf %38, %39 : vector<16x256xf32>
    %41 = vector.extract_strided_slice %10 {offsets = [320, 0], sizes = [16, 256], strides = [1, 1]} : vector<384x256xf32> to vector<16x256xf32>
    %42 = vector.extract_strided_slice %10 {offsets = [336, 0], sizes = [16, 256], strides = [1, 1]} : vector<384x256xf32> to vector<16x256xf32>
    %43 = arith.maximumf %41, %42 : vector<16x256xf32>
    %44 = vector.extract_strided_slice %10 {offsets = [352, 0], sizes = [16, 256], strides = [1, 1]} : vector<384x256xf32> to vector<16x256xf32>
    %45 = vector.extract_strided_slice %10 {offsets = [368, 0], sizes = [16, 256], strides = [1, 1]} : vector<384x256xf32> to vector<16x256xf32>
    %46 = arith.maximumf %44, %45 : vector<16x256xf32>
    %47 = tpu.concatenate %13, %16, %19, %22, %25, %28, %31, %34, %37, %40, %43, %46 in 0 : vector<16x256xf32>, vector<16x256xf32>, vector<16x256xf32>, vector<16x256xf32>, vector<16x256xf32>, vector<16x256xf32>, vector<16x256xf32>, vector<16x256xf32>, vector<16x256xf32>, vector<16x256xf32>, vector<16x256xf32>, vector<16x256xf32> -> vector<192x256xf32>
    %48 = arith.truncf %47 : vector<192x256xf32> to vector<192x256xbf16>
    %cst_6 = arith.constant 0.000000e+00 : f32
    %49 = vector.broadcast %cst_6 : f32 to vector<128x256xf32>
    %50 = vector.extract_strided_slice %48 {offsets = [0, 0], sizes = [128, 256], strides = [1, 1]} : vector<192x256xbf16> to vector<128x256xbf16>
    %c0_7 = arith.constant 0 : index
    %c0_8 = arith.constant 0 : index
    %c0_9 = arith.constant 0 : index
    %51 = vector.load %arg4[%c0_7, %c0_8, %c0_9] : memref<5x256x256xbf16, #tpu.memory_space<vmem>>, vector<1x256x256xbf16>
    %52 = vector.shape_cast %51 : vector<1x256x256xbf16> to vector<256x256xbf16>
    %cst_10 = arith.constant dense<0.000000e+00> : vector<128x256xf32>
    %53 = tpu.matmul %50, %52, %cst_10 {dimension_numbers = #tpu.dot_dimension_numbers<[1], [0], [0], [1], [0, 0, 1, 1], [], []>} : vector<128x256xbf16>, vector<256x256xbf16>, vector<128x256xf32> -> vector<128x256xf32>
    %54 = arith.addf %49, %53 : vector<128x256xf32>
    %55 = vector.extract_strided_slice %48 {offsets = [16, 0], sizes = [128, 256], strides = [1, 1]} : vector<192x256xbf16> to vector<128x256xbf16>
    %c1 = arith.constant 1 : index
    %c0_11 = arith.constant 0 : index
    %c0_12 = arith.constant 0 : index
    %56 = vector.load %arg4[%c1, %c0_11, %c0_12] : memref<5x256x256xbf16, #tpu.memory_space<vmem>>, vector<1x256x256xbf16>
    %57 = vector.shape_cast %56 : vector<1x256x256xbf16> to vector<256x256xbf16>
    %cst_13 = arith.constant dense<0.000000e+00> : vector<128x256xf32>
    %58 = tpu.matmul %55, %57, %cst_13 {dimension_numbers = #tpu.dot_dimension_numbers<[1], [0], [0], [1], [0, 0, 1, 1], [], []>} : vector<128x256xbf16>, vector<256x256xbf16>, vector<128x256xf32> -> vector<128x256xf32>
    %59 = arith.addf %54, %58 : vector<128x256xf32>
    %60 = vector.extract_strided_slice %48 {offsets = [32, 0], sizes = [128, 256], strides = [1, 1]} : vector<192x256xbf16> to vector<128x256xbf16>
    %c2 = arith.constant 2 : index
    %c0_14 = arith.constant 0 : index
    %c0_15 = arith.constant 0 : index
    %61 = vector.load %arg4[%c2, %c0_14, %c0_15] : memref<5x256x256xbf16, #tpu.memory_space<vmem>>, vector<1x256x256xbf16>
    %62 = vector.shape_cast %61 : vector<1x256x256xbf16> to vector<256x256xbf16>
    %cst_16 = arith.constant dense<0.000000e+00> : vector<128x256xf32>
    %63 = tpu.matmul %60, %62, %cst_16 {dimension_numbers = #tpu.dot_dimension_numbers<[1], [0], [0], [1], [0, 0, 1, 1], [], []>} : vector<128x256xbf16>, vector<256x256xbf16>, vector<128x256xf32> -> vector<128x256xf32>
    %64 = arith.addf %59, %63 : vector<128x256xf32>
    %65 = vector.extract_strided_slice %48 {offsets = [48, 0], sizes = [128, 256], strides = [1, 1]} : vector<192x256xbf16> to vector<128x256xbf16>
    %c3 = arith.constant 3 : index
    %c0_17 = arith.constant 0 : index
    %c0_18 = arith.constant 0 : index
    %66 = vector.load %arg4[%c3, %c0_17, %c0_18] : memref<5x256x256xbf16, #tpu.memory_space<vmem>>, vector<1x256x256xbf16>
    %67 = vector.shape_cast %66 : vector<1x256x256xbf16> to vector<256x256xbf16>
    %cst_19 = arith.constant dense<0.000000e+00> : vector<128x256xf32>
    %68 = tpu.matmul %65, %67, %cst_19 {dimension_numbers = #tpu.dot_dimension_numbers<[1], [0], [0], [1], [0, 0, 1, 1], [], []>} : vector<128x256xbf16>, vector<256x256xbf16>, vector<128x256xf32> -> vector<128x256xf32>
    %69 = arith.addf %64, %68 : vector<128x256xf32>
    %70 = vector.extract_strided_slice %48 {offsets = [64, 0], sizes = [128, 256], strides = [1, 1]} : vector<192x256xbf16> to vector<128x256xbf16>
    %c4 = arith.constant 4 : index
    %c0_20 = arith.constant 0 : index
    %c0_21 = arith.constant 0 : index
    %71 = vector.load %arg4[%c4, %c0_20, %c0_21] : memref<5x256x256xbf16, #tpu.memory_space<vmem>>, vector<1x256x256xbf16>
    %72 = vector.shape_cast %71 : vector<1x256x256xbf16> to vector<256x256xbf16>
    %cst_22 = arith.constant dense<0.000000e+00> : vector<128x256xf32>
    %73 = tpu.matmul %70, %72, %cst_22 {dimension_numbers = #tpu.dot_dimension_numbers<[1], [0], [0], [1], [0, 0, 1, 1], [], []>} : vector<128x256xbf16>, vector<256x256xbf16>, vector<128x256xf32> -> vector<128x256xf32>
    %74 = arith.addf %69, %73 : vector<128x256xf32>
    %75 = vector.extract_strided_slice %74 {offsets = [0, 0], sizes = [128, 128], strides = [1, 1]} : vector<128x256xf32> to vector<128x128xf32>
    %76 = vector.extract_strided_slice %74 {offsets = [0, 128], sizes = [128, 128], strides = [1, 1]} : vector<128x256xf32> to vector<128x128xf32>
    %77 = arith.maximumf %75, %76 : vector<128x128xf32>
    %c0_23 = arith.constant 0 : index
    %c0_24 = arith.constant 0 : index
    %78 = vector.load %arg5[%c0_23, %c0_24] : memref<1x128xf32, #tpu.memory_space<vmem>>, vector<1x128xf32>
    %79 = vector.broadcast %78 : vector<1x128xf32> to vector<128x128xf32>
    %80 = arith.addf %77, %79 : vector<128x128xf32>
    %cst_25 = arith.constant 0.000000e+00 : f32
    %81 = vector.broadcast %cst_25 : f32 to vector<128x128xf32>
    %82 = arith.maximumf %80, %81 : vector<128x128xf32>
    %cst_26 = arith.constant 0.000000e+00 : f32
    %83 = vector.broadcast %cst_26 : f32 to vector<16x120xf32>
    %84 = vector.extract_strided_slice %82 {offsets = [0, 0], sizes = [16, 128], strides = [1, 1]} : vector<128x128xf32> to vector<16x128xf32>
    %85 = vector.extract_strided_slice %82 {offsets = [16, 0], sizes = [16, 128], strides = [1, 1]} : vector<128x128xf32> to vector<16x128xf32>
    %86 = arith.maximumf %84, %85 : vector<16x128xf32>
    %87 = arith.truncf %86 : vector<16x128xf32> to vector<16x128xbf16>
    %c0_27 = arith.constant 0 : index
    %c0_28 = arith.constant 0 : index
    %c0_29 = arith.constant 0 : index
    %88 = vector.load %arg6[%c0_27, %c0_28, %c0_29] : memref<4x128x120xbf16, #tpu.memory_space<vmem>>, vector<1x128x120xbf16>
    %89 = vector.shape_cast %88 : vector<1x128x120xbf16> to vector<128x120xbf16>
    %cst_30 = arith.constant dense<0.000000e+00> : vector<16x120xf32>
    %90 = tpu.matmul %87, %89, %cst_30 {dimension_numbers = #tpu.dot_dimension_numbers<[1], [0], [0], [1], [0, 0, 1, 1], [], []>} : vector<16x128xbf16>, vector<128x120xbf16>, vector<16x120xf32> -> vector<16x120xf32>
    %91 = arith.addf %83, %90 : vector<16x120xf32>
    %92 = vector.extract_strided_slice %82 {offsets = [32, 0], sizes = [16, 128], strides = [1, 1]} : vector<128x128xf32> to vector<16x128xf32>
    %93 = vector.extract_strided_slice %82 {offsets = [48, 0], sizes = [16, 128], strides = [1, 1]} : vector<128x128xf32> to vector<16x128xf32>
    %94 = arith.maximumf %92, %93 : vector<16x128xf32>
    %95 = arith.truncf %94 : vector<16x128xf32> to vector<16x128xbf16>
    %c1_31 = arith.constant 1 : index
    %c0_32 = arith.constant 0 : index
    %c0_33 = arith.constant 0 : index
    %96 = vector.load %arg6[%c1_31, %c0_32, %c0_33] : memref<4x128x120xbf16, #tpu.memory_space<vmem>>, vector<1x128x120xbf16>
    %97 = vector.shape_cast %96 : vector<1x128x120xbf16> to vector<128x120xbf16>
    %cst_34 = arith.constant dense<0.000000e+00> : vector<16x120xf32>
    %98 = tpu.matmul %95, %97, %cst_34 {dimension_numbers = #tpu.dot_dimension_numbers<[1], [0], [0], [1], [0, 0, 1, 1], [], []>} : vector<16x128xbf16>, vector<128x120xbf16>, vector<16x120xf32> -> vector<16x120xf32>
    %99 = arith.addf %91, %98 : vector<16x120xf32>
    %100 = vector.extract_strided_slice %82 {offsets = [64, 0], sizes = [16, 128], strides = [1, 1]} : vector<128x128xf32> to vector<16x128xf32>
    %101 = vector.extract_strided_slice %82 {offsets = [80, 0], sizes = [16, 128], strides = [1, 1]} : vector<128x128xf32> to vector<16x128xf32>
    %102 = arith.maximumf %100, %101 : vector<16x128xf32>
    %103 = arith.truncf %102 : vector<16x128xf32> to vector<16x128xbf16>
    %c2_35 = arith.constant 2 : index
    %c0_36 = arith.constant 0 : index
    %c0_37 = arith.constant 0 : index
    %104 = vector.load %arg6[%c2_35, %c0_36, %c0_37] : memref<4x128x120xbf16, #tpu.memory_space<vmem>>, vector<1x128x120xbf16>
    %105 = vector.shape_cast %104 : vector<1x128x120xbf16> to vector<128x120xbf16>
    %cst_38 = arith.constant dense<0.000000e+00> : vector<16x120xf32>
    %106 = tpu.matmul %103, %105, %cst_38 {dimension_numbers = #tpu.dot_dimension_numbers<[1], [0], [0], [1], [0, 0, 1, 1], [], []>} : vector<16x128xbf16>, vector<128x120xbf16>, vector<16x120xf32> -> vector<16x120xf32>
    %107 = arith.addf %99, %106 : vector<16x120xf32>
    %108 = vector.extract_strided_slice %82 {offsets = [96, 0], sizes = [16, 128], strides = [1, 1]} : vector<128x128xf32> to vector<16x128xf32>
    %109 = vector.extract_strided_slice %82 {offsets = [112, 0], sizes = [16, 128], strides = [1, 1]} : vector<128x128xf32> to vector<16x128xf32>
    %110 = arith.maximumf %108, %109 : vector<16x128xf32>
    %111 = arith.truncf %110 : vector<16x128xf32> to vector<16x128xbf16>
    %c3_39 = arith.constant 3 : index
    %c0_40 = arith.constant 0 : index
    %c0_41 = arith.constant 0 : index
    %112 = vector.load %arg6[%c3_39, %c0_40, %c0_41] : memref<4x128x120xbf16, #tpu.memory_space<vmem>>, vector<1x128x120xbf16>
    %113 = vector.shape_cast %112 : vector<1x128x120xbf16> to vector<128x120xbf16>
    %cst_42 = arith.constant dense<0.000000e+00> : vector<16x120xf32>
    %114 = tpu.matmul %111, %113, %cst_42 {dimension_numbers = #tpu.dot_dimension_numbers<[1], [0], [0], [1], [0, 0, 1, 1], [], []>} : vector<16x128xbf16>, vector<128x120xbf16>, vector<16x120xf32> -> vector<16x120xf32>
    %115 = arith.addf %107, %114 : vector<16x120xf32>
    %c0_43 = arith.constant 0 : index
    %c0_44 = arith.constant 0 : index
    %116 = vector.load %arg7[%c0_43, %c0_44] : memref<1x120xf32, #tpu.memory_space<vmem>>, vector<1x120xf32>
    %117 = vector.broadcast %116 : vector<1x120xf32> to vector<16x120xf32>
    %118 = arith.addf %115, %117 : vector<16x120xf32>
    %cst_45 = arith.constant 0.000000e+00 : f32
    %119 = vector.broadcast %cst_45 : f32 to vector<16x120xf32>
    %120 = arith.maximumf %118, %119 : vector<16x120xf32>
    %121 = arith.truncf %120 : vector<16x120xf32> to vector<16x120xbf16>
    %c0_46 = arith.constant 0 : index
    %c0_47 = arith.constant 0 : index
    %122 = vector.load %arg8[%c0_46, %c0_47] : memref<120x60xbf16, #tpu.memory_space<vmem>>, vector<120x60xbf16>
    %cst_48 = arith.constant dense<0.000000e+00> : vector<16x60xf32>
    %123 = tpu.matmul %121, %122, %cst_48 {dimension_numbers = #tpu.dot_dimension_numbers<[1], [0], [0], [1], [0, 0, 1, 1], [], []>} : vector<16x120xbf16>, vector<120x60xbf16>, vector<16x60xf32> -> vector<16x60xf32>
    %c0_49 = arith.constant 0 : index
    %c0_50 = arith.constant 0 : index
    %124 = vector.load %arg9[%c0_49, %c0_50] : memref<1x60xf32, #tpu.memory_space<vmem>>, vector<1x60xf32>
    %125 = vector.broadcast %124 : vector<1x60xf32> to vector<16x60xf32>
    %126 = arith.addf %123, %125 : vector<16x60xf32>
    %cst_51 = arith.constant 0.000000e+00 : f32
    %127 = vector.broadcast %cst_51 : f32 to vector<16x60xf32>
    %128 = arith.maximumf %126, %127 : vector<16x60xf32>
    %129 = arith.truncf %128 : vector<16x60xf32> to vector<16x60xbf16>
    %c0_52 = arith.constant 0 : index
    %c0_53 = arith.constant 0 : index
    %130 = vector.load %arg10[%c0_52, %c0_53] : memref<60x128xbf16, #tpu.memory_space<vmem>>, vector<60x128xbf16>
    %cst_54 = arith.constant dense<0.000000e+00> : vector<16x128xf32>
    %131 = tpu.matmul %129, %130, %cst_54 {dimension_numbers = #tpu.dot_dimension_numbers<[1], [0], [0], [1], [0, 0, 1, 1], [], []>} : vector<16x60xbf16>, vector<60x128xbf16>, vector<16x128xf32> -> vector<16x128xf32>
    %c0_55 = arith.constant 0 : index
    %c0_56 = arith.constant 0 : index
    %132 = vector.load %arg11[%c0_55, %c0_56] : memref<1x128xf32, #tpu.memory_space<vmem>>, vector<1x128xf32>
    %133 = vector.broadcast %132 : vector<1x128xf32> to vector<16x128xf32>
    %134 = arith.addf %131, %133 : vector<16x128xf32>
    %c0_57 = arith.constant 0 : index
    %c0_58 = arith.constant 0 : index
    %135 = vector.load %arg12[%c0_57, %c0_58] : memref<16x128xf32, #tpu.memory_space<vmem>>, vector<16x128xf32>
    tpu.vector_store %arg12[%c0_57, %c0_58], %134 {strides = array<i32>} : memref<16x128xf32, #tpu.memory_space<vmem>>, vector<16x128xf32>,
    return
  }
  func.func @transform_0(%arg0: i32) -> (i32, i32) {
    %c0_i32 = arith.constant 0 : i32
    %c0_i32_0 = arith.constant 0 : i32
    return %arg0, %c0_i32 : i32, i32
  }
  func.func @transform_1(%arg0: i32) -> (i32, i32) {
    %c0_i32 = arith.constant 0 : i32
    %c0_i32_0 = arith.constant 0 : i32
    %c0_i32_1 = arith.constant 0 : i32
    return %c0_i32, %c0_i32_0 : i32, i32
  }
  func.func @transform_2(%arg0: i32) -> (i32, i32) {
    %c0_i32 = arith.constant 0 : i32
    %c0_i32_0 = arith.constant 0 : i32
    %c0_i32_1 = arith.constant 0 : i32
    return %c0_i32, %c0_i32_0 : i32, i32
  }
  func.func @transform_3(%arg0: i32) -> (i32, i32, i32) {
    %c0_i32 = arith.constant 0 : i32
    %c0_i32_0 = arith.constant 0 : i32
    %c0_i32_1 = arith.constant 0 : i32
    %c0_i32_2 = arith.constant 0 : i32
    return %c0_i32, %c0_i32_0, %c0_i32_1 : i32, i32, i32
  }
  func.func @transform_4(%arg0: i32) -> (i32, i32) {
    %c0_i32 = arith.constant 0 : i32
    %c0_i32_0 = arith.constant 0 : i32
    %c0_i32_1 = arith.constant 0 : i32
    return %c0_i32, %c0_i32_0 : i32, i32
  }
  func.func @transform_5(%arg0: i32) -> (i32, i32, i32) {
    %c0_i32 = arith.constant 0 : i32
    %c0_i32_0 = arith.constant 0 : i32
    %c0_i32_1 = arith.constant 0 : i32
    %c0_i32_2 = arith.constant 0 : i32
    return %c0_i32, %c0_i32_0, %c0_i32_1 : i32, i32, i32
  }
  func.func @transform_6(%arg0: i32) -> (i32, i32) {
    %c0_i32 = arith.constant 0 : i32
    %c0_i32_0 = arith.constant 0 : i32
    %c0_i32_1 = arith.constant 0 : i32
    return %c0_i32, %c0_i32_0 : i32, i32
  }
  func.func @transform_7(%arg0: i32) -> (i32, i32) {
    %c0_i32 = arith.constant 0 : i32
    %c0_i32_0 = arith.constant 0 : i32
    %c0_i32_1 = arith.constant 0 : i32
    return %c0_i32, %c0_i32_0 : i32, i32
  }
  func.func @transform_8(%arg0: i32) -> (i32, i32) {
    %c0_i32 = arith.constant 0 : i32
    %c0_i32_0 = arith.constant 0 : i32
    %c0_i32_1 = arith.constant 0 : i32
    return %c0_i32, %c0_i32_0 : i32, i32
  }
  func.func @transform_9(%arg0: i32) -> (i32, i32) {
    %c0_i32 = arith.constant 0 : i32
    %c0_i32_0 = arith.constant 0 : i32
    %c0_i32_1 = arith.constant 0 : i32
    return %c0_i32, %c0_i32_0 : i32, i32
  }
  func.func @transform_10(%arg0: i32) -> (i32, i32) {
    %c0_i32 = arith.constant 0 : i32
    %c0_i32_0 = arith.constant 0 : i32
    %c0_i32_1 = arith.constant 0 : i32
    return %c0_i32, %c0_i32_0 : i32, i32
  }
  func.func @transform_11(%arg0: i32) -> (i32, i32) {
    %c0_i32 = arith.constant 0 : i32
    %c0_i32_0 = arith.constant 0 : i32
    return %arg0, %c0_i32 : i32, i32
  }
}

</mosaic_0001>

<bundles_post_ra>
// kernel: lenet_forward.1
= control target key start
LH: loop header
LB: loop body
LE: loop exit
PB: predicated region body
PF: predicated region fallthrough
CT: control target
= control target key end

     0   :  { %s5599_s17 = smov 0   ;;  %s7225_s0 = inlined_call_operand.vmem [shape: bf16[768,140], index: 0, kind: input, shape index: {}]   ;;  %s7226_s1 = inlined_call_operand.vmem [shape: bf16[140,512], index: 1, kind: input, shape index: {}]   ;;  %s7227_s2 = inlined_call_operand.vmem [shape: f32[1,256], index: 2, kind: input, shape index: {}]   ;;  %s7228_s3 = inlined_call_operand.vmem [shape: bf16[5,256,256], index: 3, kind: input, shape index: {}]   ;;  %s7229_s4 = inlined_call_operand.vmem [shape: f32[1,128], index: 4, kind: input, shape index: {}]   ;;  %s7230_s5 = inlined_call_operand.vmem [shape: bf16[4,128,120], index: 5, kind: input, shape index: {}]   ;;  %s7231_s6 = inlined_call_operand.vmem [shape: f32[1,120], index: 6, kind: input, shape index: {}]   ;;  %s7232_s7 = inlined_call_operand.vmem [shape: bf16[120,60], index: 7, kind: input, shape index: {}]   ;;  %s7233_s8 = inlined_call_operand.vmem [shape: f32[1,60], index: 8, kind: input, shape index: {}]   ;;  %s7234_s9 = inlined_call_operand.vmem [shape: bf16[60,128], index: 9, kind: input, shape index: {}]   ;;  %s7235_s10 = inlined_call_operand.vmem [shape: f32[1,128], index: 10, kind: input, shape index: {}]   ;;  %s7236_s11 = inlined_call_operand.vmem [shape: f32[32,128], index: 11, kind: output, shape index: {}]  }
   0x1 LB: > { %s4268_s18 = sadd.s32 4294967295, %s5535_s17   ;;  %p4272_p0 = scmp.ge.s32.totalorder %s5535_s17, 1  ;;  %s5535_s17 = sphi %s5599_s17, %s21_s17  }
   0x2   : > { %p339_p1 = scmp.lt.s32.totalorder %s5535_s17, 3 }
   0x4   : > { %p340_p2 = pnand %p4272_p0, %p339_p1 }
   0x6   : > { %343 = sbr.rel (%p340_p2) target bundleno = 1696 (0x6a0), region = 64 }
   0xd   : > { %v5118_v0 = vld [vmem:[%s7226_s1 + $0x4] ss:$16 sps:$4 sm:$0xff]   ;;  %s380_s21 = smul.u32 48, %s4268_s18  ;;  %v5120_v1 = vld [vmem:[%s7226_s1] ss:$16 sps:$4 sm:$0xff]   ;;  %vm870_vm0 = vcmask 97280  }
   0xe   : > { %4962 = vmatprep.subr.bf16.mxu1 %v5118_v0  ;;  %v5121_v2 = vld [vmem:[%s7226_s1 + $0x24] ss:$16 sps:$4 sm:$0xff]   ;;  %956 = vmatprep.subr.bf16.mxu0 %v5118_v0  ;;  %v5123_v3 = vld [vmem:[%s7226_s1 + $0x20] ss:$16 sps:$4 sm:$0xff]   ;;  %vm943_vm1 = vcmask 1045504   ;;  %vm5538_vm2 = vmmov 0  }
   0xf   : > { %p381_p3 = scmp.lt.s32.totalorder %s380_s21, 95  ;;  %4971 = vmatpush1.bf16.msra.mxu1 %v5120_v1  ;;  %957 = vmatpush1.bf16.msra.mxu0 %v5120_v1  ;;  %v5124_v4 = vld [vmem:[%s7226_s1 + $0x44] ss:$16 sps:$4 sm:$0xff]   ;;  %v5126_v5 = vld [vmem:[%s7226_s1 + $0x40] ss:$16 sps:$4 sm:$0xff]   ;;  %vm4076_vm3 = vcmask 1043456  }
  0x10   : > { %4963 = vmatprep.subr.bf16.mxu1 %v5121_v2  ;;  %958 = vmatprep.subr.bf16.mxu0 %v5121_v2  ;;  %v5127_v6 = vld [vmem:[%s7226_s1 + $0x64] ss:$16 sps:$4 sm:$0xff]   ;;  %v5129_v7 = vld [vmem:[%s7226_s1 + $0x60] ss:$16 sps:$4 sm:$0xff]   ;;  %v5150_v20 = vld [vmem:[%s7226_s1 + $0xc] ss:$16 sps:$4 sm:$0xff]  }
  0x11   : > { %s7336_s21 = smov (!%p381_p3, %s380_s21), 95  ;;  %v5130_v8 = vld [vmem:[%s7226_s1 + $0x84] ss:$16 sps:$4 sm:$0xff]   ;;  %v5132_v10 = vld [vmem:[%s7226_s1 + $0x80] ss:$16 sps:$4 sm:$0xff]   ;;  %vm4072_vm4 = vcmask 982016  }
  0x12   : > { %s4799_s13 = sshll.u32 %s7336_s21, 3  ;;  %v5133_v11 = vld [vmem:[%s7226_s1 + $0xa4] ss:$16 sps:$4 sm:$0xff]   ;;  %v5135_v12 = vld [vmem:[%s7226_s1 + $0xa0] ss:$16 sps:$4 sm:$0xff]   ;;  %vm4162_vm5 = vcmask 490496  }
  0x13   : > { %4972 = vmatpush1.bf16.msra.mxu1 %v5123_v3  ;;  %959 = vmatpush1.bf16.msra.mxu0 %v5123_v3  ;;  %s5633_s20 = scalar_lea.vmem %s7225_s0, %s4799_s13  ;;  %v5136_v13 = vld [vmem:[%s7226_s1 + $0xc4] ss:$16 sps:$4 sm:$0xff]   ;;  %v5138_v14 = vld [vmem:[%s7226_s1 + $0xc0] ss:$16 sps:$4 sm:$0xff]   ;;  %v5148_v22 = vld [vmem:[%s7226_s1 + $0x8] ss:$16 sps:$4 sm:$0xff]  }
  0x14   : > { %4964 = vmatprep.subr.bf16.mxu1 %v5124_v4  ;;  %960 = vmatprep.subr.bf16.mxu0 %v5124_v4  ;;  %v5147_v9 = vld [vmem:[%s5633_s20 + $0xe4] ss:$8 sps:$4 sm:$0xff]   ;;  %v5141_v16 = vld [vmem:[%s7226_s1 + $0xe0] ss:$16 sps:$4 sm:$0xff]   ;;  %v5683_v23 = vld [vmem:[%s5633_s20 + $0xf4] ss:$8 sps:$4 sm:$0xff]  }
  0x15   : > { %4376 = vmatprep.mubr.msk.bf16.mxu1 %vm870_vm0, %v5147_v9  ;;  %v5139_v15 = vld [vmem:[%s7226_s1 + $0xe4] ss:$16 sps:$4 sm:$0xff]   ;;  %v5144_v18 = vld [vmem:[%s7226_s1 + $0x100] ss:$16 sps:$4 sm:$0x3f]   ;;  %s4275_s25 = sshll.u32 %s4268_s18, 1 }
  0x16   : > { %v5142_v17 = vld [vmem:[%s7226_s1 + $0x104] ss:$16 sps:$4 sm:$0x3f]   ;;  %v945_v19 = vsel %vm943_vm1, %v5144_v18, 0  ;;  %v5677_v21 = vld [vmem:[%s5633_s20 + $0xe0] ss:$8 sps:$4 sm:$0xff]  }
  0x17   : > { %4973 = vmatpush1.bf16.msra.mxu1 %v5126_v5  ;;  %961 = vmatpush1.bf16.msra.mxu0 %v5126_v5  ;;  %v5156_v24 = vld [vmem:[%s7226_s1 + $0x2c] ss:$16 sps:$4 sm:$0xff]   ;;  %v5690_v25 = vld [vmem:[%s5633_s20] ss:$8 sps:$4 sm:$0xff]   ;;  %v5710_v30 = vld [vmem:[%s5633_s20 + $0xf0] ss:$8 sps:$4 sm:$0xff]  }
  0x18   : > { %4965 = vmatprep.subr.bf16.mxu1 %v5127_v6  ;;  %962 = vmatprep.subr.bf16.mxu0 %v5127_v6  ;;  %v5693_v26 = vld [vmem:[%s5633_s20 + $0x4] ss:$8 sps:$4 sm:$0xff]   ;;  %v5154_v27 = vld [vmem:[%s7226_s1 + $0x28] ss:$16 sps:$4 sm:$0xff]   ;;  %v5701_v28 = vld [vmem:[%s5633_s20 + $0x14] ss:$8 sps:$4 sm:$0xff]  }
  0x19   : > { %v5162_v29 = vld [vmem:[%s7226_s1 + $0x4c] ss:$16 sps:$4 sm:$0xff]   ;;  %4362 = vmatprep.mubr.msk.bf16.mxu0 %vm870_vm0, %v5693_v26  ;;  %v5160_v32 = vld [vmem:[%s7226_s1 + $0x48] ss:$16 sps:$4 sm:$0xff]   ;;  %p388_p4 = scmp.lt.s32.totalorder %s4275_s25, 3 }
  0x1a   : > { %v5715_v31 = vld [vmem:[%s5633_s20 + $0x104] ss:$8 sps:$4 sm:$0xff]   ;;  %v5724_v34 = vld [vmem:[%s5633_s20 + $0x10] ss:$8 sps:$4 sm:$0xff]   ;;  %v5736_v37 = vld [vmem:[%s5633_s20 + $0x100] ss:$8 sps:$4 sm:$0xff]  }
  0x1b   : > { %4974 = vmatpush1.bf16.msra.mxu1 %v5129_v7  ;;  %963 = vmatpush1.bf16.msra.mxu0 %v5129_v7  ;;  %v5168_v33 = vld [vmem:[%s7226_s1 + $0x6c] ss:$16 sps:$4 sm:$0xff]   ;;  %v5166_v36 = vld [vmem:[%s7226_s1 + $0x68] ss:$16 sps:$4 sm:$0xff]   ;;  %s7338_s25 = smov (!%p388_p4, %s4275_s25), 3 }
  0x1c   : > { %4966 = vmatprep.subr.bf16.mxu1 %v5130_v8  ;;  %964 = vmatprep.subr.bf16.mxu0 %v5130_v8  ;;  %v5728_v35 = vld [vmem:[%s5633_s20 + $0x24] ss:$8 sps:$4 sm:$0xff]   ;;  %v5742_v39 = vld [vmem:[%s5633_s20 + $0x114] ss:$8 sps:$4 sm:$0xff]   ;;  %v5172_v40 = vld [vmem:[%s7226_s1 + $0x88] ss:$16 sps:$4 sm:$0xff]  }
  0x1d   : > { %v5174_v38 = vld [vmem:[%s7226_s1 + $0x8c] ss:$16 sps:$4 sm:$0xff]   ;;  %v5754_v42 = vld [vmem:[%s5633_s20 + $0x20] ss:$8 sps:$4 sm:$0xff]   ;;  %v5769_v46 = vld [vmem:[%s5633_s20 + $0x110] ss:$8 sps:$4 sm:$0xff]  }
  0x1e   : > { %v5180_v41 = vld [vmem:[%s7226_s1 + $0xac] ss:$16 sps:$4 sm:$0xff]   ;;  %v5178_v43 = vld [vmem:[%s7226_s1 + $0xa8] ss:$16 sps:$4 sm:$0xff]   ;;  %s4276_s26 = sshll.u32 %s7338_s25, 3 }
  0x1f   : > { %4975 = vmatpush1.bf16.msra.mxu1 %v5132_v10  ;;  %965 = vmatpush1.bf16.msra.mxu0 %v5132_v10  ;;  %v5761_v44 = vld [vmem:[%s5633_s20 + $0x34] ss:$8 sps:$4 sm:$0xff]   ;;  %v5772_v47 = vld [vmem:[%s5633_s20 + $0x124] ss:$8 sps:$4 sm:$0xff]   ;;  %v5184_v48 = vld [vmem:[%s7226_s1 + $0xc8] ss:$16 sps:$4 sm:$0xff]   ;;  %s391_s12 = scalar_lea.vmem %s7236_s11, %s4276_s26 }
  0x20   : > { %4967 = vmatprep.subr.bf16.mxu1 %v5133_v11  ;;  %966 = vmatprep.subr.bf16.mxu0 %v5133_v11  ;;  %v5186_v45 = vld [vmem:[%s7226_s1 + $0xcc] ss:$16 sps:$4 sm:$0xff]   ;;  %v5784_v50 = vld [vmem:[%s5633_s20 + $0x30] ss:$8 sps:$4 sm:$0xff]   ;;  %v5802_v55 = vld [vmem:[%s5633_s20 + $0x120] ss:$8 sps:$4 sm:$0xff]  }
  0x21   : > { %v5194_v49 = vld [vmem:[%s7226_s1 + $0xec] ss:$16 sps:$4 sm:$0xff]   ;;  %v5192_v51 = vld [vmem:[%s7226_s1 + $0xe8] ss:$16 sps:$4 sm:$0xff]  }
  0x22   : > { %v5199_v52 = vld [vmem:[%s7226_s1 + $0x10c] ss:$16 sps:$4 sm:$0x3f]   ;;  %v5201_v54 = vld [vmem:[%s7226_s1 + $0x108] ss:$16 sps:$4 sm:$0x3f]  }
  0x23   : > { %4976 = vmatpush1.bf16.msra.mxu1 %v5135_v12  ;;  %967 = vmatpush1.bf16.msra.mxu0 %v5135_v12  ;;  %v5794_v53 = vld [vmem:[%s5633_s20 + $0x44] ss:$8 sps:$4 sm:$0xff]   ;;  %v5805_v56 = vld [vmem:[%s5633_s20 + $0x134] ss:$8 sps:$4 sm:$0xff]   ;;  %v5811_v57 = vld [vmem:[%s5633_s20 + $0x40] ss:$8 sps:$4 sm:$0xff]  }
  0x24   : > { %4968 = vmatprep.subr.bf16.mxu1 %v5136_v13  ;;  %968 = vmatprep.subr.bf16.mxu0 %v5136_v13  ;;  %v951_v58 = vsel %vm943_vm1, %v5201_v54, 0  ;;  %v5817_v59 = vld [vmem:[%s5633_s20 + $0x54] ss:$8 sps:$4 sm:$0xff]   ;;  %v5822_v60 = vld [vmem:[%s5633_s20 + $0x130] ss:$8 sps:$4 sm:$0xff]  }
  0x25   : > { %v5825_v61 = vld [vmem:[%s5633_s20 + $0x144] ss:$8 sps:$4 sm:$0xff]   ;;  %v5219_v62 = vld [vmem:[%s5633_s20 + $0x50] ss:$8 sps:$4 sm:$0xff]   ;;  %v5836_v0 = vld [vmem:[%s5633_s20 + $0x140] ss:$8 sps:$4 sm:$0xff]  }
  0x26   : > { %v5220_v63 = vld [vmem:[%s5633_s20 + $0x64] ss:$8 sps:$4 sm:$0xff]   ;;  %v5839_v1 = vld [vmem:[%s5633_s20 + $0x154] ss:$8 sps:$4 sm:$0xff]   ;;  %v5222_v2 = vld [vmem:[%s5633_s20 + $0x60] ss:$8 sps:$4 sm:$0xff]  }
  0x27   : > { %4977 = vmatpush1.bf16.msra.mxu1 %v5138_v14  ;;  %969 = vmatpush1.bf16.msra.mxu0 %v5138_v14  ;;  %v5223_v3 = vld [vmem:[%s5633_s20 + $0x74] ss:$8 sps:$4 sm:$0xff]   ;;  %v5848_v4 = vld [vmem:[%s5633_s20 + $0x150] ss:$8 sps:$4 sm:$0xff]   ;;  %v5851_v5 = vld [vmem:[%s5633_s20 + $0x164] ss:$8 sps:$4 sm:$0xff]  }
  0x28   : > { %4969 = vmatprep.subr.bf16.mxu1 %v5139_v15  ;;  %970 = vmatprep.subr.bf16.mxu0 %v5139_v15  ;;  %v5225_v6 = vld [vmem:[%s5633_s20 + $0x70] ss:$8 sps:$4 sm:$0xff]   ;;  %v5226_v7 = vld [vmem:[%s5633_s20 + $0x84] ss:$8 sps:$4 sm:$0xff]   ;;  %v5860_v8 = vld [vmem:[%s5633_s20 + $0x160] ss:$8 sps:$4 sm:$0xff]  }
  0x29   : > { %v5863_v9 = vld [vmem:[%s5633_s20 + $0x174] ss:$8 sps:$4 sm:$0xff]   ;;  %v5228_v10 = vld [vmem:[%s5633_s20 + $0x80] ss:$8 sps:$4 sm:$0xff]   ;;  %v5872_v12 = vld [vmem:[%s5633_s20 + $0x170] ss:$8 sps:$4 sm:$0xff]  }
  0x2a   : > { %v5229_v11 = vld [vmem:[%s5633_s20 + $0x94] ss:$8 sps:$4 sm:$0xff]   ;;  %v5231_v13 = vld [vmem:[%s5633_s20 + $0x90] ss:$8 sps:$4 sm:$0xff]   ;;  %v5232_v14 = vld [vmem:[%s5633_s20 + $0xa4] ss:$8 sps:$4 sm:$0xff]  }
  0x2b   : > { %4978 = vmatpush1.bf16.msra.mxu1 %v5141_v16  ;;  %971 = vmatpush1.bf16.msra.mxu0 %v5141_v16  ;;  %v5234_v15 = vld [vmem:[%s5633_s20 + $0xa0] ss:$8 sps:$4 sm:$0xff]   ;;  %v5235_v16 = vld [vmem:[%s5633_s20 + $0xb4] ss:$8 sps:$4 sm:$0xff]   ;;  %v5889_v18 = vld [vmem:[%s5633_s20 + $0xc4] ss:$8 sps:$4 sm:$0xff]  }
  0x2c   : > { %4970 = vmatprep.subr.msk.bf16.mxu1 %vm943_vm1, %v5142_v17  ;;  %4361 = vmatprep.subr.msk.bf16.mxu0 %vm943_vm1, %v5142_v17  ;;  %v5237_v17 = vld [vmem:[%s5633_s20 + $0xb0] ss:$8 sps:$4 sm:$0xff]   ;;  %v5282_v54 = vld [vmem:[%s7228_s3 + $0x1c4] ss:$8 sps:$4 sm:$0xff]  }
  0x2f   : > { %4979 = vmatpush1.bf16.msra.mxu1 %v945_v19  ;;  %973 = vmatpush1.bf16.msra.mxu0 %v945_v19  ;;  %v5897_v19 = vld [vmem:[%s5633_s20 + $0xc0] ss:$8 sps:$4 sm:$0xff]  }
  0x30   : > { %1229 = vmatprep.subr.bf16.mxu1 %v5150_v20  ;;  %v5900_v20 = vld [vmem:[%s5633_s20 + $0xd4] ss:$8 sps:$4 sm:$0xff]  }
  0x32   : > { %1129 = vmatmul.mubr.bf16.vlgmr.msra.gmra.mrb[0].mxu1 %v5677_v21  ;;  %989 = vmatmul.mubr.bf16.vlgmr.msra.gmra.mrb[0].mxu0 %v5690_v25 }
  0x33   : > { %1230 = vmatpush1.bf16.msra.mxu1 %v5148_v22  ;;  %4377 = vmatprep.mubr.msk.bf16.mxu1 %vm870_vm0, %v5683_v23  ;;  %v5909_v22 = vld [vmem:[%s5633_s20 + $0xd0] ss:$8 sps:$4 sm:$0xff]  }
  0x34   : > { %1231 = vmatprep.subr.bf16.mxu1 %v5156_v24  ;;  %4363 = vmatprep.mubr.msk.bf16.mxu0 %vm870_vm0, %v5701_v28  ;;  %v5244_v24 = vld [vmem:[%s7228_s3 + $0x100] ss:$8 sps:$4 sm:$0xff]  }
  0x37   : > { %1232 = vmatpush1.bf16.msra.mxu1 %v5154_v27  ;;  %v5247_v27 = vld [vmem:[%s7228_s3 + $0x110] ss:$8 sps:$4 sm:$0xff]  }
  0x38   : > { %1233 = vmatprep.subr.bf16.mxu1 %v5162_v29  ;;  %v5250_v29 = vld [vmem:[%s7228_s3 + $0x120] ss:$8 sps:$4 sm:$0xff]  }
  0x3a   : > { %1139 = vmatmul.mubr.bf16.gmra.mrb[4].mxu1 %v5710_v30  ;;  %999 = vmatmul.mubr.bf16.gmra.mrb[4].mxu0 %v5724_v34 }
  0x3b   : > { %4378 = vmatprep.mubr.msk.bf16.mxu1 %vm870_vm0, %v5715_v31  ;;  %1234 = vmatpush1.bf16.msra.mxu1 %v5160_v32  ;;  %v5255_v32 = vld [vmem:[%s7228_s3 + $0x134] ss:$8 sps:$4 sm:$0xff]  }
  0x3c   : > { %1235 = vmatprep.subr.bf16.mxu1 %v5168_v33  ;;  %4364 = vmatprep.mubr.msk.bf16.mxu0 %vm870_vm0, %v5728_v35  ;;  %v5253_v33 = vld [vmem:[%s7228_s3 + $0x130] ss:$8 sps:$4 sm:$0xff]  }
  0x3f   : > { %1236 = vmatpush1.bf16.msra.mxu1 %v5166_v36  ;;  %v5261_v36 = vld [vmem:[%s7228_s3 + $0x154] ss:$8 sps:$4 sm:$0xff]  }
  0x40   : > { %1237 = vmatprep.subr.bf16.mxu1 %v5174_v38  ;;  %v5259_v38 = vld [vmem:[%s7228_s3 + $0x150] ss:$8 sps:$4 sm:$0xff]  }
  0x42   : > { %1149 = vmatmul.mubr.bf16.gmra.mrb[8].mxu1 %v5736_v37  ;;  %1009 = vmatmul.mubr.bf16.gmra.mrb[8].mxu0 %v5754_v42 }
  0x43   : > { %4379 = vmatprep.mubr.msk.bf16.mxu1 %vm870_vm0, %v5742_v39  ;;  %1238 = vmatpush1.bf16.msra.mxu1 %v5172_v40  ;;  %v5264_v40 = vld [vmem:[%s7228_s3 + $0x164] ss:$8 sps:$4 sm:$0xff]  }
  0x44   : > { %1239 = vmatprep.subr.bf16.mxu1 %v5180_v41  ;;  %4365 = vmatprep.mubr.msk.bf16.mxu0 %vm870_vm0, %v5761_v44  ;;  %v5262_v41 = vld [vmem:[%s7228_s3 + $0x160] ss:$8 sps:$4 sm:$0xff]  }
  0x47   : > { %1240 = vmatpush1.bf16.msra.mxu1 %v5178_v43  ;;  %v5265_v43 = vld [vmem:[%s7228_s3 + $0x170] ss:$8 sps:$4 sm:$0xff]  }
  0x48   : > { %1241 = vmatprep.subr.bf16.mxu1 %v5186_v45  ;;  %v5268_v45 = vld [vmem:[%s7228_s3 + $0x180] ss:$8 sps:$4 sm:$0xff]  }
  0x4a   : > { %1159 = vmatmul.mubr.bf16.gmra.mrb[12].mxu1 %v5769_v46  ;;  %1019 = vmatmul.mubr.bf16.gmra.mrb[12].mxu0 %v5784_v50 }
  0x4b   : > { %4380 = vmatprep.mubr.msk.bf16.mxu1 %vm870_vm0, %v5772_v47  ;;  %1242 = vmatpush1.bf16.msra.mxu1 %v5184_v48  ;;  %v5273_v48 = vld [vmem:[%s7228_s3 + $0x194] ss:$8 sps:$4 sm:$0xff]  }
  0x4c   : > { %1243 = vmatprep.subr.bf16.mxu1 %v5194_v49  ;;  %4366 = vmatprep.mubr.msk.bf16.mxu0 %vm870_vm0, %v5794_v53  ;;  %v5271_v49 = vld [vmem:[%s7228_s3 + $0x190] ss:$8 sps:$4 sm:$0xff]  }
  0x4f   : > { %1244 = vmatpush1.bf16.msra.mxu1 %v5192_v51  ;;  %v5274_v51 = vld [vmem:[%s7228_s3 + $0x1a0] ss:$8 sps:$4 sm:$0xff]  }
  0x50   : > { %4386 = vmatprep.subr.msk.bf16.mxu1 %vm943_vm1, %v5199_v52  ;;  %v5279_v52 = vld [vmem:[%s7228_s3 + $0x1b4] ss:$8 sps:$4 sm:$0xff]  }
  0x52   : > { %1169 = vmatmul.mubr.bf16.gmra.mrb[16].mxu1 %v5802_v55  ;;  %1029 = vmatmul.mubr.bf16.gmra.mrb[16].mxu0 %v5811_v57 }
  0x53   : > { %4381 = vmatprep.mubr.msk.bf16.mxu1 %vm870_vm0, %v5805_v56  ;;  %1246 = vmatpush1.bf16.msra.mxu1 %v951_v58  ;;  %v5280_v58 = vld [vmem:[%s7228_s3 + $0x1c0] ss:$8 sps:$4 sm:$0xff]  }
  0x54   : > { %4367 = vmatprep.mubr.msk.bf16.mxu0 %vm870_vm0, %v5817_v59 }
  0x5a   : > { %1179 = vmatmul.mubr.bf16.gmra.mrb[20].mxu1 %v5822_v60  ;;  %1039 = vmatmul.mubr.bf16.gmra.mrb[20].mxu0 %v5219_v62 }
  0x5b   : > { %4382 = vmatprep.mubr.msk.bf16.mxu1 %vm870_vm0, %v5825_v61  ;;  %4368 = vmatprep.mubr.msk.bf16.mxu0 %vm870_vm0, %v5220_v63 }
  0x62   : > { %1189 = vmatmul.mubr.bf16.gmra.mrb[24].mxu1 %v5836_v0  ;;  %1049 = vmatmul.mubr.bf16.gmra.mrb[24].mxu0 %v5222_v2 }
  0x63   : > { %4383 = vmatprep.mubr.msk.bf16.mxu1 %vm870_vm0, %v5839_v1  ;;  %4369 = vmatprep.mubr.msk.bf16.mxu0 %vm870_vm0, %v5223_v3 }
  0x6a   : > { %1199 = vmatmul.mubr.bf16.gmra.mrb[28].mxu1 %v5848_v4  ;;  %1059 = vmatmul.mubr.bf16.gmra.mrb[28].mxu0 %v5225_v6 }
  0x6b   : > { %4384 = vmatprep.mubr.msk.bf16.mxu1 %vm870_vm0, %v5851_v5  ;;  %4370 = vmatprep.mubr.msk.bf16.mxu0 %vm870_vm0, %v5226_v7 }
  0x72   : > { %1209 = vmatmul.mubr.bf16.gmra.mrb[32].mxu1 %v5860_v8  ;;  %1069 = vmatmul.mubr.bf16.gmra.mrb[32].mxu0 %v5228_v10 }
  0x73   : > { %4385 = vmatprep.mubr.msk.bf16.mxu1 %vm870_vm0, %v5863_v9  ;;  %4371 = vmatprep.mubr.msk.bf16.mxu0 %vm870_vm0, %v5229_v11 }
  0x7a   : > { %1219 = vmatmul.mubr.bf16.gmra.mrb[36].mxu1 %v5872_v12  ;;  %1079 = vmatmul.mubr.bf16.gmra.mrb[36].mxu0 %v5231_v13 }
  0x7b   : > { %4387 = vmatprep.mubr.msk.bf16.mxu1 %vm870_vm0, %v5693_v26  ;;  %4372 = vmatprep.mubr.msk.bf16.mxu0 %vm870_vm0, %v5232_v14  ;;  %v5249_v26 = vld [vmem:[%s7228_s3 + $0x114] ss:$8 sps:$4 sm:$0xff]  }
  0x82   : > { %1262 = vmatmul.mubr.bf16.vlgmr.msra.gmra.mrb[40].mxu1 %v5690_v25  ;;  %1089 = vmatmul.mubr.bf16.gmra.mrb[40].mxu0 %v5234_v15  ;;  %v5246_v25 = vld [vmem:[%s7228_s3 + $0x104] ss:$8 sps:$4 sm:$0xff]  }
  0x83   : > { %4388 = vmatprep.mubr.msk.bf16.mxu1 %vm870_vm0, %v5701_v28  ;;  %4373 = vmatprep.mubr.msk.bf16.mxu0 %vm870_vm0, %v5235_v16  ;;  %v5252_v28 = vld [vmem:[%s7228_s3 + $0x124] ss:$8 sps:$4 sm:$0xff]  }
  0x84   : > { %2099 = vmatprep.subr.bf16.mxu0 %v5246_v25 }
  0x85   : > { %2100 = vmatpush1.bf16.msra.mxu0 %v5244_v24 }
  0x86   : > { %2101 = vmatprep.subr.bf16.mxu0 %v5249_v26 }
  0x89   : > { %2102 = vmatpush1.bf16.msra.mxu0 %v5247_v27 }
  0x8a   : > { %1272 = vmatmul.mubr.bf16.gmra.mrb[44].mxu1 %v5724_v34  ;;  %1099 = vmatmul.mubr.bf16.gmra.mrb[44].mxu0 %v5237_v17  ;;  %v5258_v34 = vld [vmem:[%s7228_s3 + $0x144] ss:$8 sps:$4 sm:$0xff]  }
  0x8b   : > { %4389 = vmatprep.mubr.msk.bf16.mxu1 %vm870_vm0, %v5728_v35  ;;  %4374 = vmatprep.mubr.msk.bf16.mxu0 %vm870_vm0, %v5889_v18  ;;  %v5256_v35 = vld [vmem:[%s7228_s3 + $0x140] ss:$8 sps:$4 sm:$0xff]  }
  0x8c   : > { %2103 = vmatprep.subr.bf16.mxu0 %v5252_v28 }
  0x8d   : > { %2104 = vmatpush1.bf16.msra.mxu0 %v5250_v29 }
  0x8e   : > { %2105 = vmatprep.subr.bf16.mxu0 %v5255_v32 }
  0x91   : > { %2106 = vmatpush1.bf16.msra.mxu0 %v5253_v33 }
  0x92   : > { %1282 = vmatmul.mubr.bf16.gmra.mrb[48].mxu1 %v5754_v42  ;;  %1109 = vmatmul.mubr.bf16.gmra.mrb[48].mxu0 %v5897_v19  ;;  %v5267_v42 = vld [vmem:[%s7228_s3 + $0x174] ss:$8 sps:$4 sm:$0xff]  }
  0x93   : > { %4390 = vmatprep.mubr.msk.bf16.mxu1 %vm870_vm0, %v5761_v44  ;;  %4375 = vmatprep.mubr.msk.bf16.mxu0 %vm870_vm0, %v5900_v20  ;;  %v5270_v44 = vld [vmem:[%s7228_s3 + $0x184] ss:$8 sps:$4 sm:$0xff]  }
  0x94   : > { %2107 = vmatprep.subr.bf16.mxu0 %v5258_v34 }
  0x95   : > { %2108 = vmatpush1.bf16.msra.mxu0 %v5256_v35 }
  0x96   : > { %2109 = vmatprep.subr.bf16.mxu0 %v5261_v36 }
  0x99   : > { %2110 = vmatpush1.bf16.msra.mxu0 %v5259_v38 }
  0x9a   : > { %1292 = vmatmul.mubr.bf16.gmra.mrb[52].mxu1 %v5784_v50  ;;  %1119 = vmatmul.mubr.bf16.gmra.mrb[52].mxu0 %v5909_v22  ;;  %v5276_v50 = vld [vmem:[%s7228_s3 + $0x1a4] ss:$8 sps:$4 sm:$0xff]  }
  0x9b   : > { %4391 = vmatprep.mubr.msk.bf16.mxu1 %vm870_vm0, %v5794_v53  ;;  %2111 = vmatprep.subr.bf16.mxu0 %v5264_v40  ;;  %v5277_v53 = vld [vmem:[%s7228_s3 + $0x1b0] ss:$8 sps:$4 sm:$0xff]  }
  0x9d   : > { %2112 = vmatpush1.bf16.msra.mxu0 %v5262_v41 }
  0x9e   : > { %2113 = vmatprep.subr.bf16.mxu0 %v5267_v42 }
  0xa1   : > { %2114 = vmatpush1.bf16.msra.mxu0 %v5265_v43 }
  0xa2   : > { %1302 = vmatmul.mubr.bf16.gmra.mrb[56].mxu1 %v5811_v57  ;;  %2115 = vmatprep.subr.bf16.mxu0 %v5270_v44  ;;  %v5528_v57 = vld [vmem:[%s5633_s20 + $0xe4] ss:$8 sps:$4 sm:$0xff]  }
  0xa3   : > { %4392 = vmatprep.mubr.msk.bf16.mxu1 %vm870_vm0, %v5817_v59  ;;  %v5285_v59 = vld [vmem:[%s7228_s3 + $0x1d4] ss:$8 sps:$4 sm:$0xff]  }
  0xa5   : > { %2116 = vmatpush1.bf16.msra.mxu0 %v5268_v45 }
  0xa6   : > { %2117 = vmatprep.subr.bf16.mxu0 %v5273_v48 }
  0xa9   : > { %2118 = vmatpush1.bf16.msra.mxu0 %v5271_v49 }
  0xaa   : > { %1312 = vmatmul.mubr.bf16.gmra.mrb[60].mxu1 %v5219_v62  ;;  %2119 = vmatprep.subr.bf16.mxu0 %v5276_v50  ;;  %v5283_v62 = vld [vmem:[%s7228_s3 + $0x1d0] ss:$8 sps:$4 sm:$0xff]  }
  0xab   : > { %4393 = vmatprep.mubr.msk.bf16.mxu1 %vm870_vm0, %v5220_v63  ;;  %v5288_v63 = vld [vmem:[%s7228_s3 + $0x1e4] ss:$8 sps:$4 sm:$0xff]  }
  0xad   : > { %2120 = vmatpush1.bf16.msra.mxu0 %v5274_v51 }
  0xae   : > { %2121 = vmatprep.subr.bf16.mxu0 %v5279_v52 }
  0xb1   : > { %2122 = vmatpush1.bf16.msra.mxu0 %v5277_v53 }
  0xb2   : > { %1322 = vmatmul.mubr.bf16.gmra.mrb[64].mxu1 %v5222_v2  ;;  %2123 = vmatprep.subr.bf16.mxu0 %v5282_v54  ;;  %v5286_v2 = vld [vmem:[%s7228_s3 + $0x1e0] ss:$8 sps:$4 sm:$0xff]  }
  0xb3   : > { %4394 = vmatprep.mubr.msk.bf16.mxu1 %vm870_vm0, %v5223_v3  ;;  %v5291_v3 = vld [vmem:[%s7228_s3 + $0x1f4] ss:$8 sps:$4 sm:$0xff]  }
  0xb5   : > { %2124 = vmatpush1.bf16.msra.mxu0 %v5280_v58 }
  0xb6   : > { %2125 = vmatprep.subr.bf16.mxu0 %v5285_v59 }
  0xb9   : > { %2126 = vmatpush1.bf16.msra.mxu0 %v5283_v62 }
  0xba   : > { %1332 = vmatmul.mubr.bf16.gmra.mrb[68].mxu1 %v5225_v6  ;;  %2127 = vmatprep.subr.bf16.mxu0 %v5288_v63 }
  0xbb   : > { %4395 = vmatprep.mubr.msk.bf16.mxu1 %vm870_vm0, %v5226_v7 }
  0xbd   : > { %2128 = vmatpush1.bf16.msra.mxu0 %v5286_v2 }
  0xbe   : > { %2129 = vmatprep.subr.bf16.mxu0 %v5291_v3 }
  0xc2   : > { %1342 = vmatmul.mubr.bf16.gmra.mrb[72].mxu1 %v5228_v10 }
  0xc3   : > { %4396 = vmatprep.mubr.msk.bf16.mxu1 %vm870_vm0, %v5229_v11 }
  0xca   : > { %1352 = vmatmul.mubr.bf16.gmra.mrb[76].mxu1 %v5231_v13 }
  0xcb   : > { %4397 = vmatprep.mubr.msk.bf16.mxu1 %vm870_vm0, %v5232_v14 }
  0xd2   : > { %1362 = vmatmul.mubr.bf16.gmra.mrb[80].mxu1 %v5234_v15 }
  0xd3   : > { %4398 = vmatprep.mubr.msk.bf16.mxu1 %vm870_vm0, %v5235_v16 }
  0xda   : > { %1372 = vmatmul.mubr.bf16.gmra.mrb[84].mxu1 %v5237_v17 }
  0xdb   : > { %4399 = vmatprep.mubr.msk.bf16.mxu1 %vm870_vm0, %v5889_v18 }
  0xe2   : > { %1382 = vmatmul.mubr.bf16.gmra.mrb[88].mxu1 %v5897_v19 }
  0xe3   : > { %4400 = vmatprep.mubr.msk.bf16.mxu1 %vm870_vm0, %v5900_v20 }
  0xea   : > { %1392 = vmatmul.mubr.bf16.gmra.mrb[92].mxu1 %v5909_v22 }
  0xeb   : > { %4401 = vmatprep.mubr.msk.bf16.mxu1 %vm870_vm0, %v5528_v57 }
  0xf2   : > { %1402 = vmatmul.mubr.bf16.gmra.mrb[96].mxu1 %v5677_v21  ;;  %v5289_v21 = vld [vmem:[%s7228_s3 + $0x1f0] ss:$8 sps:$4 sm:$0xff]  }
  0xf3   : > { %4402 = vmatprep.mubr.msk.bf16.mxu1 %vm870_vm0, %v5683_v23  ;;  %2130 = vmatpush1.bf16.msra.mxu0 %v5289_v21 }
  0xfa   : > { %1412 = vmatmul.mubr.bf16.gmra.mrb[100].mxu1 %v5710_v30 }
  0xfb   : > { %4403 = vmatprep.mubr.msk.bf16.mxu1 %vm870_vm0, %v5715_v31 }
 0x102   : > { %1422 = vmatmul.mubr.bf16.gmra.mrb[104].mxu1 %v5736_v37 }
 0x103   : > { %4404 = vmatprep.mubr.msk.bf16.mxu1 %vm870_vm0, %v5742_v39 }
 0x105   : > { %v6037_v23 = vpop.f32.mrb[0].mxu1  ;;  %v6045_v11 = vpop.f32.mrb[0].mxu0 }
 0x106   : > { %7241 = vst [vmem:[#allocation2_spill] sm:$0xff] %v6037_v23  ;;  %v6039_v6 = vpop.f32.mrb[1].mxu1  ;;  %v6047_v13 = vpop.f32.mrb[1].mxu0 }
 0x107   : > { %7242 = vst [vmem:[#allocation3_spill] sm:$0xff] %v6039_v6  ;;  %v6041_v7 = vpop.f32.mrb[2].mxu1  ;;  %v6050_v30 = vpop.f32.mrb[2].mxu0 }
 0x108   : > { %7243 = vst [vmem:[#allocation4_spill] sm:$0xff] %v6041_v7  ;;  %v6043_v10 = vpop.f32.mrb[3].mxu1  ;;  %v6054_v31 = vpop.f32.mrb[3].mxu0 }
 0x109   : > { %7244 = vst [vmem:[#allocation5_spill] sm:$0xff] %v6043_v10 }
 0x10a   : > { %1432 = vmatmul.mubr.bf16.gmra.mrb[108].mxu1 %v5769_v46 }
 0x10b   : > { %4405 = vmatprep.mubr.msk.bf16.mxu1 %vm870_vm0, %v5772_v47 }
 0x10d   : > { %v6056_v37 = vpop.f32.mrb[4].mxu1  ;;  %v6064_v16 = vpop.f32.mrb[4].mxu0 }
 0x10e   : > { %7245 = vst [vmem:[#allocation6_spill] sm:$0xff] %v6056_v37  ;;  %v6058_v39 = vpop.f32.mrb[5].mxu1  ;;  %v6066_v17 = vpop.f32.mrb[5].mxu0 }
 0x10f   : > { %7246 = vst [vmem:[#allocation7_spill] sm:$0xff] %v6058_v39  ;;  %v6060_v14 = vpop.f32.mrb[6].mxu1  ;;  %v6069_v46 = vpop.f32.mrb[6].mxu0 }
 0x110   : > { %7247 = vst [vmem:[#allocation8_spill] sm:$0xff] %v6060_v14  ;;  %v6062_v15 = vpop.f32.mrb[7].mxu1  ;;  %v6073_v47 = vpop.f32.mrb[7].mxu0 }
 0x111   : > { %7248 = vst [vmem:[#allocation9_spill] sm:$0xff] %v6062_v15 }
 0x112   : > { %1442 = vmatmul.mubr.bf16.gmra.mrb[112].mxu1 %v5802_v55 }
 0x113   : > { %4406 = vmatprep.mubr.msk.bf16.mxu1 %vm870_vm0, %v5805_v56 }
 0x115   : > { %v6075_v18 = vpop.f32.mrb[8].mxu1  ;;  %v6083_v24 = vpop.f32.mrb[8].mxu0 }
 0x116   : > { %7249 = vst [vmem:[#allocation10_spill] sm:$0xff] %v6075_v18  ;;  %v6077_v19 = vpop.f32.mrb[9].mxu1  ;;  %v6085_v25 = vpop.f32.mrb[9].mxu0 }
 0x117   : > { %7250 = vst [vmem:[#allocation11_spill] sm:$0xff] %v6077_v19  ;;  %v6079_v20 = vpop.f32.mrb[10].mxu1  ;;  %v6088_v55 = vpop.f32.mrb[10].mxu0 }
 0x118   : > { %7251 = vst [vmem:[#allocation12_spill] sm:$0xff] %v6079_v20  ;;  %v6081_v22 = vpop.f32.mrb[11].mxu1  ;;  %v6092_v56 = vpop.f32.mrb[11].mxu0 }
 0x119   : > { %7252 = vst [vmem:[#allocation13_spill] sm:$0xff] %v6081_v22 }
 0x11a   : > { %1452 = vmatmul.mubr.bf16.gmra.mrb[116].mxu1 %v5822_v60 }
 0x11b   : > { %4407 = vmatprep.mubr.msk.bf16.mxu1 %vm870_vm0, %v5825_v61 }
 0x11d   : > { %v6094_v26 = vpop.f32.mrb[12].mxu1  ;;  %v6102_v32 = vpop.f32.mrb[12].mxu0 }
 0x11e   : > { %7253 = vst [vmem:[#allocation14_spill] sm:$0xff] %v6094_v26  ;;  %v6096_v27 = vpop.f32.mrb[13].mxu1  ;;  %v6104_v33 = vpop.f32.mrb[13].mxu0 }
 0x11f   : > { %7254 = vst [vmem:[#allocation15_spill] sm:$0xff] %v6096_v27  ;;  %v6098_v28 = vpop.f32.mrb[14].mxu1  ;;  %v6107_v60 = vpop.f32.mrb[14].mxu0 }
 0x120   : > { %7255 = vst [vmem:[#allocation16_spill] sm:$0xff] %v6098_v28  ;;  %v6100_v29 = vpop.f32.mrb[15].mxu1  ;;  %v6111_v61 = vpop.f32.mrb[15].mxu0 }
 0x121   : > { %7256 = vst [vmem:[#allocation17_spill] sm:$0xff] %v6100_v29 }
 0x122   : > { %1462 = vmatmul.mubr.bf16.gmra.mrb[120].mxu1 %v5836_v0 }
 0x123   : > { %4408 = vmatprep.mubr.msk.bf16.mxu1 %vm870_vm0, %v5839_v1 }
 0x125   : > { %v6113_v34 = vpop.f32.mrb[16].mxu1  ;;  %v6121_v40 = vpop.f32.mrb[16].mxu0 }
 0x126   : > { %7257 = vst [vmem:[#allocation18_spill] sm:$0xff] %v6113_v34  ;;  %v6115_v35 = vpop.f32.mrb[17].mxu1  ;;  %v6123_v41 = vpop.f32.mrb[17].mxu0 }
 0x127   : > { %7258 = vst [vmem:[#allocation19_spill] sm:$0xff] %v6115_v35  ;;  %v6117_v36 = vpop.f32.mrb[18].mxu1  ;;  %v6126_v0 = vpop.f32.mrb[18].mxu0 }
 0x128   : > { %7259 = vst [vmem:[#allocation20_spill] sm:$0xff] %v6117_v36  ;;  %v6119_v38 = vpop.f32.mrb[19].mxu1  ;;  %v6130_v1 = vpop.f32.mrb[19].mxu0 }
 0x129   : > { %7260 = vst [vmem:[#allocation21_spill] sm:$0xff] %v6119_v38 }
 0x12a   : > { %1472 = vmatmul.mubr.bf16.gmra.mrb[124].mxu1 %v5848_v4 }
 0x12b   : > { %4409 = vmatprep.mubr.msk.bf16.mxu1 %vm870_vm0, %v5851_v5  ;;  %v5294_v5 = vld [vmem:[%s7228_s3 + $0x4] ss:$8 sps:$4 sm:$0xff]  }
 0x12c   : > { %2372 = vmatprep.subr.bf16.mxu0 %v5294_v5 }
 0x12d   : > { %v6132_v42 = vpop.f32.mrb[20].mxu1  ;;  %v6140_v48 = vpop.f32.mrb[20].mxu0 }
 0x12e   : > { %7261 = vst [vmem:[#allocation22_spill] sm:$0xff] %v6132_v42  ;;  %v6134_v43 = vpop.f32.mrb[21].mxu1  ;;  %v6142_v49 = vpop.f32.mrb[21].mxu0 }
 0x12f   : > { %7262 = vst [vmem:[#allocation23_spill] sm:$0xff] %v6134_v43  ;;  %v6136_v44 = vpop.f32.mrb[22].mxu1  ;;  %v6145_v4 = vpop.f32.mrb[22].mxu0  ;;  %v1600_v43 = vlaneseq }
 0x130   : > { %7263 = vst [vmem:[#allocation24_spill] sm:$0xff] %v6136_v44  ;;  %v6138_v45 = vpop.f32.mrb[23].mxu1  ;;  %v6152_v50 = vpop.f32.mrb[23].mxu0 }
 0x131   : > { %7264 = vst [vmem:[#allocation25_spill] sm:$0xff] %v6138_v45  ;;  %v1601_v42 = vshrl.u32 %v1600_v43, 7 }
 0x132   : > { %1482 = vmatmul.mubr.bf16.gmra.mrb[128].mxu1 %v5860_v8 }
 0x133   : > { %4410 = vmatprep.mubr.msk.bf16.mxu1 %vm870_vm0, %v5863_v9 }
 0x135   : > { %v6154_v51 = vpop.f32.mrb[24].mxu1  ;;  %v6162_v8 = vpop.f32.mrb[24].mxu0 }
 0x136   : > { %7265 = vst [vmem:[#allocation26_spill] sm:$0xff] %v6154_v51  ;;  %v6156_v52 = vpop.f32.mrb[25].mxu1  ;;  %v6164_v57 = vpop.f32.mrb[25].mxu0 }
 0x137   : > { %7266 = vst [vmem:[#allocation27_spill] sm:$0xff] %v6156_v52  ;;  %v6158_v53 = vpop.f32.mrb[26].mxu1  ;;  %v6167_v58 = vpop.f32.mrb[26].mxu0 }
 0x138   : > { %7267 = vst [vmem:[#allocation28_spill] sm:$0xff] %v6158_v53  ;;  %v6160_v54 = vpop.f32.mrb[27].mxu1  ;;  %v6169_v9 = vpop.f32.mrb[27].mxu0 }
 0x139   : > { %7268 = vst [vmem:[#allocation29_spill] sm:$0xff] %v6160_v54 }
 0x13a   : > { %1492 = vmatmul.mubr.bf16.gmra.mrb[132].mxu1 %v5872_v12 }
 0x13d   : > { %v6171_v59 = vpop.f32.mrb[28].mxu1  ;;  %v6179_v3 = vpop.f32.mrb[28].mxu0 }
 0x13e   : > { %7269 = vst [vmem:[#allocation30_spill] sm:$0xff] %v6171_v59  ;;  %v6173_v62 = vpop.f32.mrb[29].mxu1  ;;  %v6181_v21 = vpop.f32.mrb[29].mxu0 }
 0x13f   : > { %7270 = vst [vmem:[#allocation31_spill] sm:$0xff] %v6173_v62  ;;  %v6175_v63 = vpop.f32.mrb[30].mxu1  ;;  %v6183_v5 = vpop.f32.mrb[30].mxu0 }
 0x140   : > { %7271 = vst [vmem:[#allocation32_spill] sm:$0xff] %v6175_v63  ;;  %v6177_v2 = vpop.f32.mrb[31].mxu1  ;;  %v6185_v54 = vpop.f32.mrb[31].mxu0 }
 0x141   : > { %7272 = vst [vmem:[#allocation33_spill] sm:$0xff] %v6177_v2 }
 0x145   : > { %v6187_v12 = vpop.f32.mrb[32].mxu1  ;;  %v6195_v62 = vpop.f32.mrb[32].mxu0 }
 0x146   : > { %7273 = vst [vmem:[#allocation34_spill] sm:$0xff] %v6187_v12  ;;  %v6189_v53 = vpop.f32.mrb[33].mxu1  ;;  %v6197_v63 = vpop.f32.mrb[33].mxu0 }
 0x147   : > { %7274 = vst [vmem:[#allocation35_spill] sm:$0xff] %v6189_v53  ;;  %v6191_v52 = vpop.f32.mrb[34].mxu1  ;;  %v6199_v2 = vpop.f32.mrb[34].mxu0 }
 0x148   : > { %7275 = vst [vmem:[#allocation36_spill] sm:$0xff] %v6191_v52  ;;  %v6193_v59 = vpop.f32.mrb[35].mxu1  ;;  %v6201_v51 = vpop.f32.mrb[35].mxu0 }
 0x149   : > { %7276 = vst [vmem:[#allocation37_spill] sm:$0xff] %v6193_v59 }
 0x14d   : > { %v6203_v45 = vpop.f32.mrb[36].mxu1  ;;  %v6211_v52 = vpop.f32.mrb[36].mxu0 }
 0x14e   : > { %7277 = vst [vmem:[#allocation38_spill] sm:$0xff] %v6203_v45  ;;  %v6205_v44 = vpop.f32.mrb[37].mxu1  ;;  %v6213_v59 = vpop.f32.mrb[37].mxu0  ;;  %v1602_v45 = vsub.s32 0, %v1601_v42 }
 0x14f   : > { %7278 = vst [vmem:[#allocation39_spill] sm:$0xff] %v6205_v44  ;;  %v6207_v12 = vpop.f32.mrb[38].mxu1  ;;  %v6215_v38 = vpop.f32.mrb[38].mxu0  ;;  %v1606_v44 = vsub.s32 1, %v1601_v42 }
 0x150   : > { %7279 = vst [vmem:[#allocation40_spill] sm:$0xff] %v6207_v12  ;;  %v6209_v53 = vpop.f32.mrb[39].mxu1  ;;  %v6217_v36 = vpop.f32.mrb[39].mxu0  ;;  %v1598_v12 = vld [vmem:[%s7227_s2] sm:$0x3] }
 0x151   : > { %7280 = vst [vmem:[#allocation41_spill] sm:$0xff] %v6209_v53  ;;  %v6234_v19 = vrot.slane %v1598_v12, %v1606_v44 }
 0x155   : > { %v1263_v35 = vpop.f32.mrb[40].mxu1  ;;  %v6225_v26 = vpop.f32.mrb[40].mxu0 }
 0x156   : > { %v1502_v34 = vmax.f32 %v6045_v11, %v1263_v35  ;;  %v1265_v29 = vpop.f32.mrb[41].mxu1  ;;  %v6228_v20 = vpop.f32.mrb[41].mxu0  ;;  %v6230_v11 = vrot.slane %v1598_v12, %v1602_v45 }
 0x157   : > { %v1503_v53 = vmax.f32 %v6047_v13, %v1265_v29  ;;  %v1267_v28 = vpop.f32.mrb[42].mxu1  ;;  %v6232_v35 = vpop.f32.mrb[42].mxu0 }
 0x158   : > { %v1504_v27 = vmax.f32 %v6050_v30, %v1267_v28  ;;  %v1269_v43 = vpop.f32.mrb[43].mxu1  ;;  %v6236_v18 = vpop.f32.mrb[43].mxu0  ;;  %v1610_v29 = vadd.f32 %v6230_v11, %v1502_v34 }
 0x159   : > { %v1505_v22 = vmax.f32 %v6054_v31, %v1269_v43  ;;  %v1611_v42 = vadd.f32 %v6234_v19, %v1503_v53 }
 0x15a   : > { %v1612_v45 = vadd.f32 %v6230_v11, %v1504_v27  ;;  %v1706_v53 = vmax.f32 %v1610_v29, 0.0 }
 0x15b   : > { %v1613_v39 = vadd.f32 %v6234_v19, %v1505_v22 }
 0x15c   : > { %v1708_v10 = vmax.f32 %v1612_v45, 0.0 }
 0x15d   : > { %v1273_v13 = vpop.f32.mrb[44].mxu1  ;;  %v6245_v14 = vpop.f32.mrb[44].mxu0  ;;  %v1709_v7 = vmax.f32 %v1613_v39, 0.0 }
 0x15e   : > { %v1506_v30 = vmax.f32 %v6064_v16, %v1273_v13  ;;  %v1275_v28 = vpop.f32.mrb[45].mxu1  ;;  %v6250_v13 = vpop.f32.mrb[45].mxu0 }
 0x15f   : > { %v1507_v31 = vmax.f32 %v6066_v17, %v1275_v28  ;;  %v1277_v43 = vpop.f32.mrb[46].mxu1  ;;  %v6253_v27 = vpop.f32.mrb[46].mxu0 }
 0x160   : > { %v1614_v15 = vadd.f32 %v6230_v11, %v1506_v30  ;;  %v1508_v44 = vmax.f32 %v6069_v46, %v1277_v43  ;;  %v1279_v12 = vpop.f32.mrb[47].mxu1  ;;  %v1707_v30 = vmax.f32 %v1611_v42, 0.0  ;;  %v6256_v43 = vpop.f32.mrb[47].mxu0 }
 0x161   : > { %v1615_v34 = vadd.f32 %v6234_v19, %v1507_v31  ;;  %v1509_v16 = vmax.f32 %v6073_v47, %v1279_v12 }
 0x162   : > { %v1710_v17 = vmax.f32 %v1614_v15, 0.0  ;;  %v1616_v28 = vadd.f32 %v6230_v11, %v1508_v44 }
 0x163   : > { %v1711_v37 = vmax.f32 %v1615_v34, 0.0  ;;  %v1617_v46 = vadd.f32 %v6234_v19, %v1509_v16 }
 0x164   : > { %v6258_v22 = vmax.f32 %v1706_v53, %v1710_v17  ;;  %v1712_v31 = vmax.f32 %v1616_v28, 0.0 }
 0x165   : > { %v6260_v47 = vmax.f32 %v1707_v30, %v1711_v37  ;;  %v1713_v12 = vmax.f32 %v1617_v46, 0.0  ;;  %v1283_v29 = vpop.f32.mrb[48].mxu1  ;;  %v6271_v37 = vpop.f32.mrb[48].mxu0 }
 0x166   : > { %7281 = vst [vmem:[#allocation42_spill] sm:$0xff] %v6258_v22  ;;  %v6262_v15 = vmax.f32 %v1708_v10, %v1712_v31  ;;  %v1510_v44 = vmax.f32 %v6083_v24, %v1283_v29  ;;  %v1285_v6 = vpop.f32.mrb[49].mxu1  ;;  %v6274_v10 = vpop.f32.mrb[49].mxu0 }
 0x167   : > { %7282 = vst [vmem:[#allocation43_spill] sm:$0xff] %v6260_v47  ;;  %v6265_v42 = vmax.f32 %v1709_v7, %v1713_v12  ;;  %v1511_v34 = vmax.f32 %v6085_v25, %v1285_v6  ;;  %v1287_v16 = vpop.f32.mrb[50].mxu1  ;;  %v6278_v7 = vpop.f32.mrb[50].mxu0 }
 0x168   : > { %7283 = vst [vmem:[#allocation44_spill] sm:$0xff] %v6262_v15  ;;  %v1512_v53 = vmax.f32 %v6088_v55, %v1287_v16  ;;  %v1289_v39 = vpop.f32.mrb[51].mxu1  ;;  %v6280_v28 = vpop.f32.mrb[51].mxu0  ;;  %v1618_v25 = vadd.f32 %v6230_v11, %v1510_v44 }
 0x169   : > { %7284 = vst [vmem:[#allocation45_spill] sm:$0xff] %v6265_v42  ;;  %v1513_v17 = vmax.f32 %v6092_v56, %v1289_v39  ;;  %v1619_v46 = vadd.f32 %v6234_v19, %v1511_v34 }
 0x16a   : > { %v1620_v12 = vadd.f32 %v6230_v11, %v1512_v53  ;;  %v1714_v34 = vmax.f32 %v1618_v25, 0.0 }
 0x16b   : > { %v1621_v24 = vadd.f32 %v6234_v19, %v1513_v17 }
 0x16c   : > { %v1716_v15 = vmax.f32 %v1620_v12, 0.0 }
 0x16d   : > { %v1293_v6 = vpop.f32.mrb[52].mxu1  ;;  %v6289_v45 = vpop.f32.mrb[52].mxu0 }
 0x16e   : > { %v1514_v30 = vmax.f32 %v6102_v32, %v1293_v6  ;;  %v1295_v55 = vpop.f32.mrb[53].mxu1  ;;  %v6294_v6 = vpop.f32.mrb[53].mxu0 }
 0x16f   : > { %v1515_v31 = vmax.f32 %v6104_v33, %v1295_v55  ;;  %v1297_v56 = vpop.f32.mrb[54].mxu1  ;;  %v6297_v53 = vpop.f32.mrb[54].mxu0 }
 0x170   : > { %v1622_v29 = vadd.f32 %v6230_v11, %v1514_v30  ;;  %v1516_v16 = vmax.f32 %v6107_v60, %v1297_v56  ;;  %v1299_v39 = vpop.f32.mrb[55].mxu1  ;;  %7285 = vst [vmem:[#allocation46_spill] sm:$0xff] %v6297_v53  ;;  %v1715_v30 = vmax.f32 %v1619_v46, 0.0  ;;  %v6300_v56 = vpop.f32.mrb[55].mxu0 }
 0x171   : > { %v1623_v44 = vadd.f32 %v6234_v19, %v1515_v31  ;;  %v1517_v32 = vmax.f32 %v6111_v61, %v1299_v39  ;;  %7286 = vst [vmem:[#allocation47_spill] sm:$0xff] %v6300_v56  ;;  %v1717_v31 = vmax.f32 %v1621_v24, 0.0 }
 0x172   : > { %v1718_v33 = vmax.f32 %v1622_v29, 0.0  ;;  %v1624_v55 = vadd.f32 %v6230_v11, %v1516_v16 }
 0x173   : > { %v1719_v22 = vmax.f32 %v1623_v44, 0.0  ;;  %v1625_v60 = vadd.f32 %v6234_v19, %v1517_v32 }
 0x174   : > { %v1806_v17 = vmax.f32 %v1714_v34, %v1718_v33  ;;  %v1720_v47 = vmax.f32 %v1624_v55, 0.0 }
 0x175   : > { %v1807_v42 = vmax.f32 %v1715_v30, %v1719_v22  ;;  %v1721_v61 = vmax.f32 %v1625_v60, 0.0  ;;  %v1303_v39 = vpop.f32.mrb[56].mxu1  ;;  %v5292_v22 = vld [vmem:[%s7228_s3] ss:$8 sps:$4 sm:$0xff]  }
 0x176   : > { %v1808_v23 = vmax.f32 %v1716_v15, %v1720_v47  ;;  %v1518_v25 = vmax.f32 %v6121_v40, %v1303_v39  ;;  %v1305_v29 = vpop.f32.mrb[57].mxu1  ;;  %v5297_v40 = vld [vmem:[%s7228_s3 + $0x14] ss:$8 sps:$4 sm:$0xff]   ;;  %v5300_v15 = vld [vmem:[%s7228_s3 + $0x24] ss:$8 sps:$4 sm:$0xff]  }
 0x177   : > { %v1809_v16 = vmax.f32 %v1717_v31, %v1721_v61  ;;  %v1519_v53 = vmax.f32 %v6123_v41, %v1305_v29  ;;  %v1307_v46 = vpop.f32.mrb[58].mxu1  ;;  %v5295_v41 = vld [vmem:[%s7228_s3 + $0x10] ss:$8 sps:$4 sm:$0xff]  }
 0x178   : > { %v6304_v44 = vpack.c.bf16 %v1808_v23, %v1806_v17  ;;  %v1520_v32 = vmax.f32 %v6126_v0, %v1307_v46  ;;  %v1309_v56 = vpop.f32.mrb[59].mxu1  ;;  %v1626_v0 = vadd.f32 %v6230_v11, %v1518_v25 }
 0x179   : > { %v1521_v12 = vmax.f32 %v6130_v1, %v1309_v56  ;;  %v6308_v34 = vpack.c.bf16 %v1809_v16, %v1807_v42  ;;  %v1627_v42 = vadd.f32 %v6234_v19, %v1519_v53  ;;  %v5298_v53 = vld [vmem:[%s7228_s3 + $0x20] ss:$8 sps:$4 sm:$0xff]  }
 0x17a   : > { %v1628_v55 = vadd.f32 %v6230_v11, %v1520_v32 }
 0x17b   : > { %2131 = vmatprep.mubr.bf16.mxu0 %v6308_v34  ;;  %v1723_v25 = vmax.f32 %v1627_v42, 0.0 }
 0x17c   : > { %2132 = vmatmul.mubr.bf16.vlgmr.msra.gmra.mrb[56].mxu0 %v6304_v44  ;;  %v1724_v46 = vmax.f32 %v1628_v55, 0.0 }
 0x17d   : > { %v1313_v23 = vpop.f32.mrb[60].mxu1  ;;  %2373 = vmatpush1.bf16.msra.mxu0 %v5292_v22 }
 0x17e   : > { %v1522_v1 = vmax.f32 %v6140_v48, %v1313_v23  ;;  %v1315_v47 = vpop.f32.mrb[61].mxu1  ;;  %2374 = vmatprep.subr.bf16.mxu0 %v5297_v40  ;;  %v1629_v48 = vadd.f32 %v6234_v19, %v1521_v12 }
 0x17f   : > { %v1523_v24 = vmax.f32 %v6142_v49, %v1315_v47  ;;  %v1317_v33 = vpop.f32.mrb[62].mxu1  ;;  %v1722_v49 = vmax.f32 %v1626_v0, 0.0 }
 0x180   : > { %v1630_v30 = vadd.f32 %v6230_v11, %v1522_v1  ;;  %v1524_v60 = vmax.f32 %v6145_v4, %v1317_v33  ;;  %v1319_v56 = vpop.f32.mrb[63].mxu1  ;;  %v5303_v4 = vld [vmem:[%s7228_s3 + $0x34] ss:$8 sps:$4 sm:$0xff]   ;;  %v1725_v12 = vmax.f32 %v1629_v48, 0.0 }
 0x181   : > { %v1631_v17 = vadd.f32 %v6234_v19, %v1523_v24  ;;  %v1525_v31 = vmax.f32 %v6152_v50, %v1319_v56  ;;  %2375 = vmatpush1.bf16.msra.mxu0 %v5295_v41  ;;  %v5301_v41 = vld [vmem:[%s7228_s3 + $0x30] ss:$8 sps:$4 sm:$0xff]  }
 0x182   : > { %v1726_v61 = vmax.f32 %v1630_v30, 0.0  ;;  %v1632_v39 = vadd.f32 %v6230_v11, %v1524_v60  ;;  %2376 = vmatprep.subr.bf16.mxu0 %v5300_v15  ;;  %v5306_v15 = vld [vmem:[%s7228_s3 + $0x44] ss:$8 sps:$4 sm:$0xff]  }
 0x183   : > { %v1727_v29 = vmax.f32 %v1631_v17, 0.0  ;;  %v1633_v16 = vadd.f32 %v6234_v19, %v1525_v31 }
 0x184   : > { %v1810_v50 = vmax.f32 %v1722_v49, %v1726_v61  ;;  %v1728_v32 = vmax.f32 %v1632_v39, 0.0  ;;  %v5312_v49 = vld [vmem:[%s7228_s3 + $0x64] ss:$8 sps:$4 sm:$0xff]  }
 0x185   : > { %v1811_v22 = vmax.f32 %v1723_v25, %v1727_v29  ;;  %v1729_v40 = vmax.f32 %v1633_v16, 0.0  ;;  %v1323_v23 = vpop.f32.mrb[64].mxu1  ;;  %2377 = vmatpush1.bf16.msra.mxu0 %v5298_v53 }
 0x186   : > { %v1812_v0 = vmax.f32 %v1724_v46, %v1728_v32  ;;  %v1526_v1 = vmax.f32 %v6162_v8, %v1323_v23  ;;  %v1325_v47 = vpop.f32.mrb[65].mxu1  ;;  %2378 = vmatprep.subr.bf16.mxu0 %v5303_v4  ;;  %v5304_v8 = vld [vmem:[%s7228_s3 + $0x40] ss:$8 sps:$4 sm:$0xff]  }
 0x187   : > { %v1813_v42 = vmax.f32 %v1725_v12, %v1729_v40  ;;  %v1527_v24 = vmax.f32 %v6164_v57, %v1325_v47  ;;  %v1327_v33 = vpop.f32.mrb[66].mxu1  ;;  %v5309_v57 = vld [vmem:[%s7228_s3 + $0x54] ss:$8 sps:$4 sm:$0xff]   ;;  %v5310_v12 = vld [vmem:[%s7228_s3 + $0x60] ss:$8 sps:$4 sm:$0xff]  }
 0x188   : > { %v1528_v55 = vmax.f32 %v6167_v58, %v1327_v33  ;;  %v1329_v30 = vpop.f32.mrb[67].mxu1  ;;  %v6351_v60 = vpack.c.bf16 %v1812_v0, %v1810_v50  ;;  %v1634_v17 = vadd.f32 %v6230_v11, %v1526_v1 }
 0x189   : > { %v1529_v56 = vmax.f32 %v6169_v9, %v1329_v30  ;;  %v6354_v48 = vpack.c.bf16 %v1813_v42, %v1811_v22  ;;  %2379 = vmatpush1.bf16.msra.mxu0 %v5301_v41  ;;  %v5307_v9 = vld [vmem:[%s7228_s3 + $0x50] ss:$8 sps:$4 sm:$0xff]   ;;  %v1635_v61 = vadd.f32 %v6234_v19, %v1527_v24 }
 0x18a   : > { %2380 = vmatprep.subr.bf16.mxu0 %v5306_v15  ;;  %v1636_v25 = vadd.f32 %v6230_v11, %v1528_v55  ;;  %v5313_v55 = vld [vmem:[%s7228_s3 + $0x70] ss:$8 sps:$4 sm:$0xff]  }
 0x18b   : > { %2141 = vmatprep.mubr.bf16.mxu0 %v6354_v48  ;;  %v1731_v23 = vmax.f32 %v1635_v61, 0.0 }
 0x18c   : > { %2142 = vmatmul.mubr.bf16.gmra.mrb[60].mxu0 %v6351_v60  ;;  %v1732_v1 = vmax.f32 %v1636_v25, 0.0 }
 0x18d   : > { %v1333_v58 = vpop.f32.mrb[68].mxu1  ;;  %2381 = vmatpush1.bf16.msra.mxu0 %v5304_v8 }
 0x18e   : > { %v1530_v31 = vmax.f32 %v6179_v3, %v1333_v58  ;;  %v1335_v53 = vpop.f32.mrb[69].mxu1  ;;  %2382 = vmatprep.subr.bf16.mxu0 %v5309_v57  ;;  %v1637_v3 = vadd.f32 %v6234_v19, %v1529_v56  ;;  %v5318_v57 = vld [vmem:[%s7228_s3 + $0x84] ss:$8 sps:$4 sm:$0xff]  }
 0x18f   : > { %v1531_v39 = vmax.f32 %v6181_v21, %v1335_v53  ;;  %v1337_v4 = vpop.f32.mrb[70].mxu1  ;;  %v1730_v21 = vmax.f32 %v1634_v17, 0.0 }
 0x190   : > { %v1638_v29 = vadd.f32 %v6230_v11, %v1530_v31  ;;  %v1532_v16 = vmax.f32 %v6183_v5, %v1337_v4  ;;  %v1339_v46 = vpop.f32.mrb[71].mxu1  ;;  %v5315_v5 = vld [vmem:[%s7228_s3 + $0x74] ss:$8 sps:$4 sm:$0xff]   ;;  %v1733_v15 = vmax.f32 %v1637_v3, 0.0 }
 0x191   : > { %v1639_v50 = vadd.f32 %v6234_v19, %v1531_v39  ;;  %v1533_v32 = vmax.f32 %v6185_v54, %v1339_v46  ;;  %2383 = vmatpush1.bf16.msra.mxu0 %v5307_v9 }
 0x192   : > { %v1734_v22 = vmax.f32 %v1638_v29, 0.0  ;;  %v1640_v40 = vadd.f32 %v6230_v11, %v1532_v16  ;;  %2384 = vmatprep.subr.bf16.mxu0 %v5312_v49  ;;  %v5324_v16 = vld [vmem:[%s7228_s3 + $0xa4] ss:$8 sps:$4 sm:$0xff]  }
 0x193   : > { %v1735_v41 = vmax.f32 %v1639_v50, 0.0  ;;  %v1641_v0 = vadd.f32 %v6234_v19, %v1533_v32 }
 0x194   : > { %v1814_v54 = vmax.f32 %v1730_v21, %v1734_v22  ;;  %v1736_v47 = vmax.f32 %v1640_v40, 0.0 }
 0x195   : > { %v1815_v42 = vmax.f32 %v1731_v23, %v1735_v41  ;;  %v1737_v24 = vmax.f32 %v1641_v0, 0.0  ;;  %v1343_v33 = vpop.f32.mrb[72].mxu1  ;;  %2385 = vmatpush1.bf16.msra.mxu0 %v5310_v12  ;;  %v5322_v23 = vld [vmem:[%s7228_s3 + $0xa0] ss:$8 sps:$4 sm:$0xff]  }
 0x196   : > { %v1816_v30 = vmax.f32 %v1732_v1, %v1736_v47  ;;  %v1534_v56 = vmax.f32 %v6195_v62, %v1343_v33  ;;  %v1345_v8 = vpop.f32.mrb[73].mxu1  ;;  %2386 = vmatprep.subr.bf16.mxu0 %v5315_v5  ;;  %v5316_v62 = vld [vmem:[%s7228_s3 + $0x80] ss:$8 sps:$4 sm:$0xff]  }
 0x197   : > { %v1817_v58 = vmax.f32 %v1733_v15, %v1737_v24  ;;  %v1535_v9 = vmax.f32 %v6197_v63, %v1345_v8  ;;  %v1347_v17 = vpop.f32.mrb[74].mxu1  ;;  %v5321_v63 = vld [vmem:[%s7228_s3 + $0x94] ss:$8 sps:$4 sm:$0xff]  }
 0x198   : > { %v6396_v31 = vpack.c.bf16 %v1816_v30, %v1814_v54  ;;  %v1536_v53 = vmax.f32 %v6199_v2, %v1347_v17  ;;  %v1349_v49 = vpop.f32.mrb[75].mxu1  ;;  %v1642_v4 = vadd.f32 %v6230_v11, %v1534_v56  ;;  %v5325_v56 = vld [vmem:[%s7228_s3 + $0xb0] ss:$8 sps:$4 sm:$0xff]  }
 0x199   : > { %v6399_v61 = vpack.c.bf16 %v1817_v58, %v1815_v42  ;;  %v1537_v39 = vmax.f32 %v6201_v51, %v1349_v49  ;;  %2387 = vmatpush1.bf16.msra.mxu0 %v5313_v55  ;;  %v5319_v51 = vld [vmem:[%s7228_s3 + $0x90] ss:$8 sps:$4 sm:$0xff]   ;;  %v1643_v46 = vadd.f32 %v6234_v19, %v1535_v9  ;;  %v5330_v9 = vld [vmem:[%s7228_s3 + $0xc4] ss:$8 sps:$4 sm:$0xff]  }
 0x19a   : > { %2388 = vmatprep.subr.bf16.mxu0 %v5318_v57  ;;  %v1644_v32 = vadd.f32 %v6230_v11, %v1536_v53 }
 0x19b   : > { %2151 = vmatprep.mubr.bf16.mxu0 %v6399_v61  ;;  %v1739_v1 = vmax.f32 %v1643_v46, 0.0 }
 0x19c   : > { %2152 = vmatmul.mubr.bf16.gmra.mrb[64].mxu0 %v6396_v31  ;;  %v1740_v15 = vmax.f32 %v1644_v32, 0.0 }
 0x19d   : > { %v1353_v2 = vpop.f32.mrb[76].mxu1  ;;  %2389 = vmatpush1.bf16.msra.mxu0 %v5316_v62 }
 0x19e   : > { %v1538_v25 = vmax.f32 %v6211_v52, %v1353_v2  ;;  %v1355_v29 = vpop.f32.mrb[77].mxu1  ;;  %2390 = vmatprep.subr.bf16.mxu0 %v5321_v63  ;;  %v1645_v52 = vadd.f32 %v6234_v19, %v1537_v39 }
 0x19f   : > { %v1539_v3 = vmax.f32 %v6213_v59, %v1355_v29  ;;  %v1357_v50 = vpop.f32.mrb[78].mxu1  ;;  %v1738_v59 = vmax.f32 %v1642_v4, 0.0 }
 0x1a0   : > { %v1646_v12 = vadd.f32 %v6230_v11, %v1538_v25  ;;  %v1540_v21 = vmax.f32 %v6215_v38, %v1357_v50  ;;  %v1359_v22 = vpop.f32.mrb[79].mxu1  ;;  %v5327_v38 = vld [vmem:[%s7228_s3 + $0xb4] ss:$8 sps:$4 sm:$0xff]   ;;  %v1741_v24 = vmax.f32 %v1645_v52, 0.0 }
 0x1a1   : > { %v1647_v40 = vadd.f32 %v6234_v19, %v1539_v3  ;;  %v1541_v5 = vmax.f32 %v6217_v36, %v1359_v22  ;;  %2391 = vmatpush1.bf16.msra.mxu0 %v5319_v51 }
 0x1a2   : > { %v1742_v41 = vmax.f32 %v1646_v12, 0.0  ;;  %v1648_v0 = vadd.f32 %v6230_v11, %v1540_v21  ;;  %2392 = vmatprep.subr.bf16.mxu0 %v5324_v16  ;;  %v5336_v16 = vld [vmem:[%s7228_s3 + $0xe4] ss:$8 sps:$4 sm:$0xff]  }
 0x1a3   : > { %v1743_v54 = vmax.f32 %v1647_v40, 0.0  ;;  %v1649_v47 = vadd.f32 %v6234_v19, %v1541_v5  ;;  %v5334_v5 = vld [vmem:[%s7228_s3 + $0xe0] ss:$8 sps:$4 sm:$0xff]  }
 0x1a4   : > { %v1818_v36 = vmax.f32 %v1738_v59, %v1742_v41  ;;  %v1744_v42 = vmax.f32 %v1648_v0, 0.0 }
 0x1a5   : > { %v1819_v33 = vmax.f32 %v1739_v1, %v1743_v54  ;;  %v1745_v55 = vmax.f32 %v1649_v47, 0.0  ;;  %v1363_v30 = vpop.f32.mrb[80].mxu1  ;;  %2393 = vmatpush1.bf16.msra.mxu0 %v5322_v23 }
 0x1a6   : > { %v1820_v8 = vmax.f32 %v1740_v15, %v1744_v42  ;;  %v1542_v57 = vmax.f32 %v6225_v26, %v1363_v30  ;;  %v1365_v58 = vpop.f32.mrb[81].mxu1  ;;  %2394 = vmatprep.subr.bf16.mxu0 %v5327_v38  ;;  %v5328_v26 = vld [vmem:[%s7228_s3 + $0xc0] ss:$8 sps:$4 sm:$0xff]  }
 0x1a7   : > { %v1821_v17 = vmax.f32 %v1741_v24, %v1745_v55  ;;  %v1543_v53 = vmax.f32 %v6228_v20, %v1365_v58  ;;  %v1367_v49 = vpop.f32.mrb[82].mxu1  ;;  %v5333_v20 = vld [vmem:[%s7228_s3 + $0xd4] ss:$8 sps:$4 sm:$0xff]   ;;  %v5337_v24 = vld [vmem:[%s7228_s3 + $0xf0] ss:$8 sps:$4 sm:$0xff]  }
 0x1a8   : > { %v6442_v39 = vpack.c.bf16 %v1820_v8, %v1818_v36  ;;  %v1544_v62 = vmax.f32 %v6232_v35, %v1367_v49  ;;  %v1369_v63 = vpop.f32.mrb[83].mxu1  ;;  %v1650_v4 = vadd.f32 %v6230_v11, %v1542_v57 }
 0x1a9   : > { %v6445_v2 = vpack.c.bf16 %v1821_v17, %v1819_v33  ;;  %v1545_v51 = vmax.f32 %v6236_v18, %v1369_v63  ;;  %2395 = vmatpush1.bf16.msra.mxu0 %v5325_v56  ;;  %v5331_v18 = vld [vmem:[%s7228_s3 + $0xd0] ss:$8 sps:$4 sm:$0xff]   ;;  %v1651_v46 = vadd.f32 %v6234_v19, %v1543_v53  ;;  %v5342_v56 = vld [vmem:[%s7228_s3 + $0x204] ss:$8 sps:$4 sm:$0xff]  }
 0x1aa   : > { %2396 = vmatprep.subr.bf16.mxu0 %v5330_v9  ;;  %v1652_v32 = vadd.f32 %v6230_v11, %v1544_v62 }
 0x1ab   : > { %2161 = vmatprep.mubr.bf16.mxu0 %v6445_v2  ;;  %v1747_v41 = vmax.f32 %v1651_v46, 0.0  ;;  %v7288_v46 = vld [vmem:[#allocation47_spill] sm:$0xff] }
 0x1ac   : > { %2162 = vmatmul.mubr.bf16.gmra.mrb[68].mxu0 %v6442_v39  ;;  %v1748_v1 = vmax.f32 %v1652_v32, 0.0 }
 0x1ad   : > { %v1373_v35 = vpop.f32.mrb[84].mxu1  ;;  %2397 = vmatpush1.bf16.msra.mxu0 %v5328_v26 }
 0x1ae   : > { %v1546_v25 = vmax.f32 %v6245_v14, %v1373_v35  ;;  %v1375_v29 = vpop.f32.mrb[85].mxu1  ;;  %2398 = vmatprep.subr.bf16.mxu0 %v5333_v20  ;;  %v1653_v14 = vadd.f32 %v6234_v19, %v1545_v51 }
 0x1af   : > { %v1547_v3 = vmax.f32 %v6250_v13, %v1375_v29  ;;  %v1377_v50 = vpop.f32.mrb[86].mxu1  ;;  %v1746_v13 = vmax.f32 %v1650_v4, 0.0 }
 0x1b0   : > { %v1654_v12 = vadd.f32 %v6230_v11, %v1546_v25  ;;  %v1548_v21 = vmax.f32 %v6253_v27, %v1377_v50  ;;  %v1379_v22 = vpop.f32.mrb[87].mxu1  ;;  %v5339_v27 = vld [vmem:[%s7228_s3 + $0xf4] ss:$8 sps:$4 sm:$0xff]   ;;  %v1749_v47 = vmax.f32 %v1653_v14, 0.0 }
 0x1b1   : > { %v1655_v52 = vadd.f32 %v6234_v19, %v1547_v3  ;;  %v1549_v40 = vmax.f32 %v6256_v43, %v1379_v22  ;;  %2399 = vmatpush1.bf16.msra.mxu0 %v5331_v18  ;;  %v7287_v18 = vld [vmem:[#allocation46_spill] sm:$0xff] }
 0x1b2   : > { %v1750_v23 = vmax.f32 %v1654_v12, 0.0  ;;  %v1656_v59 = vadd.f32 %v6230_v11, %v1548_v21  ;;  %2400 = vmatprep.subr.bf16.mxu0 %v5336_v16 }
 0x1b3   : > { %v1751_v0 = vmax.f32 %v1655_v52, 0.0  ;;  %v1657_v38 = vadd.f32 %v6234_v19, %v1549_v40 }
 0x1b4   : > { %v1822_v43 = vmax.f32 %v1746_v13, %v1750_v23  ;;  %v1752_v54 = vmax.f32 %v1656_v59, 0.0 }
 0x1b5   : > { %v1823_v15 = vmax.f32 %v1747_v41, %v1751_v0  ;;  %v1753_v36 = vmax.f32 %v1657_v38, 0.0  ;;  %v1383_v42 = vpop.f32.mrb[88].mxu1  ;;  %2401 = vmatpush1.bf16.msra.mxu0 %v5334_v5 }
 0x1b6   : > { %v1824_v33 = vmax.f32 %v1748_v1, %v1752_v54  ;;  %v1550_v55 = vmax.f32 %v6271_v37, %v1383_v42  ;;  %v1385_v30 = vpop.f32.mrb[89].mxu1  ;;  %2402 = vmatprep.subr.bf16.mxu0 %v5339_v27  ;;  %v7289_v27 = vld [vmem:[#allocation2_spill] sm:$0xff]  ;;  %v7290_v1 = vld [vmem:[#allocation3_spill] sm:$0xff] }
 0x1b7   : > { %v1825_v8 = vmax.f32 %v1749_v47, %v1753_v36  ;;  %v1551_v57 = vmax.f32 %v6274_v10, %v1385_v30  ;;  %v1387_v58 = vpop.f32.mrb[90].mxu1 }
 0x1b8   : > { %v6488_v9 = vpack.c.bf16 %v1824_v33, %v1822_v43  ;;  %v1552_v17 = vmax.f32 %v6278_v7, %v1387_v58  ;;  %v1389_v53 = vpop.f32.mrb[91].mxu1  ;;  %v1658_v63 = vadd.f32 %v6230_v11, %v1550_v55  ;;  %v7292_v33 = vld [vmem:[#allocation5_spill] sm:$0xff] }
 0x1b9   : > { %v6491_v49 = vpack.c.bf16 %v1825_v8, %v1823_v15  ;;  %v1553_v62 = vmax.f32 %v6280_v28, %v1389_v53  ;;  %2403 = vmatpush1.bf16.msra.mxu0 %v5337_v24  ;;  %v1659_v26 = vadd.f32 %v6234_v19, %v1551_v57  ;;  %v7291_v15 = vld [vmem:[#allocation4_spill] sm:$0xff]  ;;  %v7293_v8 = vld [vmem:[#allocation6_spill] sm:$0xff]  ;;  %v7294_v53 = vld [vmem:[#allocation7_spill] sm:$0xff] }
 0x1ba   : > { %2678 = vmatprep.subr.bf16.mxu0 %v5342_v56  ;;  %v1660_v35 = vadd.f32 %v6230_v11, %v1552_v17 }
 0x1bb   : > { %2171 = vmatprep.mubr.bf16.mxu0 %v6491_v49  ;;  %v1661_v29 = vadd.f32 %v6234_v19, %v1553_v62  ;;  %v1755_v12 = vmax.f32 %v1659_v26, 0.0 }
 0x1bc   : > { %2172 = vmatmul.mubr.bf16.gmra.mrb[72].mxu0 %v6488_v9  ;;  %v1756_v22 = vmax.f32 %v1660_v35, 0.0 }
 0x1bd   : > { %v1393_v37 = vpop.f32.mrb[92].mxu1  ;;  %v1757_v40 = vmax.f32 %v1661_v29, 0.0 }
 0x1be   : > { %v1554_v10 = vmax.f32 %v6289_v45, %v1393_v37  ;;  %v1395_v51 = vpop.f32.mrb[93].mxu1  ;;  %v1754_v45 = vmax.f32 %v1658_v63, 0.0 }
 0x1bf   : > { %v1555_v7 = vmax.f32 %v6294_v6, %v1395_v51  ;;  %v1397_v20 = vpop.f32.mrb[94].mxu1  ;;  %v7295_v51 = vld [vmem:[#allocation8_spill] sm:$0xff] }
 0x1c0   : > { %v1662_v28 = vadd.f32 %v6230_v11, %v1554_v10  ;;  %v1556_v4 = vmax.f32 %v7287_v18, %v1397_v20  ;;  %v1399_v25 = vpop.f32.mrb[95].mxu1 }
 0x1c1   : > { %v1663_v16 = vadd.f32 %v6234_v19, %v1555_v7  ;;  %v1557_v3 = vmax.f32 %v7288_v46, %v1399_v25 }
 0x1c2   : > { %v1758_v50 = vmax.f32 %v1662_v28, 0.0  ;;  %v1664_v32 = vadd.f32 %v6230_v11, %v1556_v4  ;;  %v7296_v28 = vld [vmem:[#allocation9_spill] sm:$0xff] }
 0x1c3   : > { %v1759_v6 = vmax.f32 %v1663_v16, 0.0  ;;  %v1665_v21 = vadd.f32 %v6234_v19, %v1557_v3 }
 0x1c4   : > { %v1826_v14 = vmax.f32 %v1754_v45, %v1758_v50  ;;  %v1760_v52 = vmax.f32 %v1664_v32, 0.0 }
 0x1c5   : > { %v1827_v5 = vmax.f32 %v1755_v12, %v1759_v6  ;;  %v1761_v13 = vmax.f32 %v1665_v21, 0.0  ;;  %v1403_v23 = vpop.f32.mrb[96].mxu1 }
 0x1c6   : > { %v1828_v59 = vmax.f32 %v1756_v22, %v1760_v52  ;;  %v1558_v41 = vmax.f32 %v7289_v27, %v1403_v23  ;;  %v1405_v0 = vpop.f32.mrb[97].mxu1  ;;  %v7297_v52 = vld [vmem:[#allocation10_spill] sm:$0xff]  ;;  %v7298_v23 = vld [vmem:[#allocation11_spill] sm:$0xff] }
 0x1c7   : > { %v1829_v38 = vmax.f32 %v1757_v40, %v1761_v13  ;;  %v1559_v43 = vmax.f32 %v7290_v1, %v1405_v0  ;;  %v1407_v54 = vpop.f32.mrb[98].mxu1  ;;  %v7299_v0 = vld [vmem:[#allocation12_spill] sm:$0xff] }
 0x1c8   : > { %v6510_v47 = vpack.c.bf16 %v1828_v59, %v1826_v14  ;;  %v1560_v36 = vmax.f32 %v7291_v15, %v1407_v54  ;;  %v1409_v42 = vpop.f32.mrb[99].mxu1  ;;  %v1666_v56 = vadd.f32 %v6230_v11, %v1558_v41  ;;  %v7300_v54 = vld [vmem:[#allocation13_spill] sm:$0xff] }
 0x1c9   : > { %v6513_v24 = vpack.c.bf16 %v1829_v38, %v1827_v5  ;;  %v1561_v55 = vmax.f32 %v7292_v33, %v1409_v42  ;;  %v1667_v17 = vadd.f32 %v6234_v19, %v1559_v43  ;;  %v7301_v33 = vld [vmem:[#allocation14_spill] sm:$0xff] }
 0x1ca   : > { %v1668_v63 = vadd.f32 %v6230_v11, %v1560_v36  ;;  %v1762_v4 = vmax.f32 %v1666_v56, 0.0 }
 0x1cb   : > { %2181 = vmatprep.mubr.bf16.mxu0 %v6513_v24  ;;  %v1669_v20 = vadd.f32 %v6234_v19, %v1561_v55  ;;  %v1763_v16 = vmax.f32 %v1667_v17, 0.0 }
 0x1cc   : > { %2182 = vmatmul.mubr.bf16.gmra.mrb[76].mxu0 %v6510_v47  ;;  %v1764_v45 = vmax.f32 %v1668_v63, 0.0 }
 0x1cd   : > { %v1413_v30 = vpop.f32.mrb[100].mxu1  ;;  %v1765_v12 = vmax.f32 %v1669_v20, 0.0 }
 0x1ce   : > { %v1562_v57 = vmax.f32 %v7293_v8, %v1413_v30  ;;  %v1415_v58 = vpop.f32.mrb[101].mxu1  ;;  %v7302_v8 = vld [vmem:[#allocation15_spill] sm:$0xff] }
 0x1cf   : > { %v1563_v62 = vmax.f32 %v7294_v53, %v1415_v58  ;;  %v1417_v37 = vpop.f32.mrb[102].mxu1 }
 0x1d0   : > { %v1670_v10 = vadd.f32 %v6230_v11, %v1562_v57  ;;  %v1564_v26 = vmax.f32 %v7295_v51, %v1417_v37  ;;  %v1419_v7 = vpop.f32.mrb[103].mxu1 }
 0x1d1   : > { %v1671_v35 = vadd.f32 %v6234_v19, %v1563_v62  ;;  %v1565_v18 = vmax.f32 %v7296_v28, %v1419_v7  ;;  %v7303_v62 = vld [vmem:[#allocation16_spill] sm:$0xff] }
 0x1d2   : > { %v1766_v25 = vmax.f32 %v1670_v10, 0.0  ;;  %v1672_v29 = vadd.f32 %v6230_v11, %v1564_v26  ;;  %v7304_v26 = vld [vmem:[#allocation17_spill] sm:$0xff] }
 0x1d3   : > { %v1767_v46 = vmax.f32 %v1671_v35, 0.0  ;;  %v1673_v3 = vadd.f32 %v6234_v19, %v1565_v18 }
 0x1d4   : > { %v1830_v50 = vmax.f32 %v1762_v4, %v1766_v25  ;;  %v1768_v32 = vmax.f32 %v1672_v29, 0.0 }
 0x1d5   : > { %v1831_v6 = vmax.f32 %v1763_v16, %v1767_v46  ;;  %v1769_v21 = vmax.f32 %v1673_v3, 0.0  ;;  %v1423_v22 = vpop.f32.mrb[104].mxu1 }
 0x1d6   : > { %v1832_v14 = vmax.f32 %v1764_v45, %v1768_v32  ;;  %v1566_v40 = vmax.f32 %v7297_v52, %v1423_v22  ;;  %v1425_v5 = vpop.f32.mrb[105].mxu1  ;;  %v7306_v52 = vld [vmem:[#allocation19_spill] sm:$0xff] }
 0x1d7   : > { %v1833_v13 = vmax.f32 %v1765_v12, %v1769_v21  ;;  %v1567_v59 = vmax.f32 %v7298_v23, %v1425_v5  ;;  %v1427_v27 = vpop.f32.mrb[106].mxu1  ;;  %v7307_v23 = vld [vmem:[#allocation20_spill] sm:$0xff] }
 0x1d8   : > { %v6532_v41 = vpack.c.bf16 %v1832_v14, %v1830_v50  ;;  %v1568_v38 = vmax.f32 %v7299_v0, %v1427_v27  ;;  %v1429_v1 = vpop.f32.mrb[107].mxu1  ;;  %v1674_v42 = vadd.f32 %v6230_v11, %v1566_v40 }
 0x1d9   : > { %v6535_v43 = vpack.c.bf16 %v1833_v13, %v1831_v6  ;;  %v1569_v15 = vmax.f32 %v7300_v54, %v1429_v1  ;;  %v1675_v56 = vadd.f32 %v6234_v19, %v1567_v59  ;;  %v7305_v6 = vld [vmem:[#allocation18_spill] sm:$0xff] }
 0x1da   : > { %v1676_v17 = vadd.f32 %v6230_v11, %v1568_v38  ;;  %v1770_v20 = vmax.f32 %v1674_v42, 0.0  ;;  %v7308_v38 = vld [vmem:[#allocation21_spill] sm:$0xff] }
 0x1db   : > { %2191 = vmatprep.mubr.bf16.mxu0 %v6535_v43  ;;  %v1677_v10 = vadd.f32 %v6234_v19, %v1569_v15  ;;  %v1771_v18 = vmax.f32 %v1675_v56, 0.0  ;;  %v7309_v15 = vld [vmem:[#allocation45_spill] sm:$0xff] }
 0x1dc   : > { %2192 = vmatmul.mubr.bf16.gmra.mrb[80].mxu0 %v6532_v41  ;;  %v1772_v29 = vmax.f32 %v1676_v17, 0.0 }
 0x1dd   : > { %v1433_v36 = vpop.f32.mrb[108].mxu1  ;;  %v1773_v3 = vmax.f32 %v1677_v10, 0.0 }
 0x1de   : > { %v1570_v55 = vmax.f32 %v7301_v33, %v1433_v36  ;;  %v1435_v30 = vpop.f32.mrb[109].mxu1  ;;  %v7310_v36 = vld [vmem:[#allocation43_spill] sm:$0xff] }
 0x1df   : > { %v1571_v57 = vmax.f32 %v7302_v8, %v1435_v30  ;;  %v1437_v58 = vpop.f32.mrb[110].mxu1  ;;  %v7311_v42 = vpack.c.bf16 %v7309_v15, %v7310_v36 }
 0x1e0   : > { %v1678_v53 = vadd.f32 %v6230_v11, %v1570_v55  ;;  %v1572_v37 = vmax.f32 %v7303_v62, %v1437_v58  ;;  %v1439_v63 = vpop.f32.mrb[111].mxu1  ;;  %v7312_v55 = vld [vmem:[#allocation22_spill] sm:$0xff] }
 0x1e1   : > { %v1679_v51 = vadd.f32 %v6234_v19, %v1571_v57  ;;  %v1573_v7 = vmax.f32 %v7304_v26, %v1439_v63  ;;  %v7313_v57 = vld [vmem:[#allocation23_spill] sm:$0xff] }
 0x1e2   : > { %v1774_v35 = vmax.f32 %v1678_v53, 0.0  ;;  %v1680_v28 = vadd.f32 %v6230_v11, %v1572_v37  ;;  %v7314_v37 = vld [vmem:[#allocation24_spill] sm:$0xff] }
 0x1e3   : > { %v1775_v4 = vmax.f32 %v1679_v51, 0.0  ;;  %v1681_v25 = vadd.f32 %v6234_v19, %v1573_v7  ;;  %v7315_v7 = vld [vmem:[#allocation25_spill] sm:$0xff] }
 0x1e4   : > { %v1834_v16 = vmax.f32 %v1770_v20, %v1774_v35  ;;  %v1776_v46 = vmax.f32 %v1680_v28, 0.0  ;;  %v5340_v35 = vld [vmem:[%s7228_s3 + $0x200] ss:$8 sps:$4 sm:$0xff]  }
 0x1e5   : > { %v1835_v45 = vmax.f32 %v1771_v18, %v1775_v4  ;;  %v1777_v50 = vmax.f32 %v1681_v25, 0.0  ;;  %v1443_v32 = vpop.f32.mrb[112].mxu1  ;;  %v5345_v25 = vld [vmem:[%s7228_s3 + $0x214] ss:$8 sps:$4 sm:$0xff]  }
 0x1e6   : > { %v1836_v12 = vmax.f32 %v1772_v29, %v1776_v46  ;;  %v1574_v21 = vmax.f32 %v7305_v6, %v1443_v32  ;;  %v1445_v22 = vpop.f32.mrb[113].mxu1  ;;  %v7316_v32 = vld [vmem:[#allocation44_spill] sm:$0xff] }
 0x1e7   : > { %v1837_v14 = vmax.f32 %v1773_v3, %v1777_v50  ;;  %v1575_v40 = vmax.f32 %v7306_v52, %v1445_v22  ;;  %v1447_v5 = vpop.f32.mrb[114].mxu1 }
 0x1e8   : > { %v6554_v13 = vpack.c.bf16 %v1836_v12, %v1834_v16  ;;  %v1576_v59 = vmax.f32 %v7307_v23, %v1447_v5  ;;  %v1449_v27 = vpop.f32.mrb[115].mxu1  ;;  %v1682_v33 = vadd.f32 %v6230_v11, %v1574_v21  ;;  %v7317_v12 = vld [vmem:[#allocation42_spill] sm:$0xff] }
 0x1e9   : > { %v6557_v0 = vpack.c.bf16 %v1837_v14, %v1835_v45  ;;  %v1577_v1 = vmax.f32 %v7308_v38, %v1449_v27  ;;  %v1683_v8 = vadd.f32 %v6234_v19, %v1575_v40  ;;  %v7318_v6 = vpack.c.bf16 %v7316_v32, %v7317_v12  ;;  %v5343_v40 = vld [vmem:[%s7228_s3 + $0x210] ss:$8 sps:$4 sm:$0xff]   ;;  %v7319_v23 = vld [vmem:[#allocation26_spill] sm:$0xff] }
 0x1ea   : > { %v1684_v53 = vadd.f32 %v6230_v11, %v1576_v59  ;;  %v1778_v28 = vmax.f32 %v1682_v33, 0.0  ;;  %v5348_v38 = vld [vmem:[%s7228_s3 + $0x224] ss:$8 sps:$4 sm:$0xff]  }
 0x1eb   : > { %2201 = vmatprep.mubr.bf16.mxu0 %v6557_v0  ;;  %v1685_v51 = vadd.f32 %v6234_v19, %v1577_v1  ;;  %v1779_v29 = vmax.f32 %v1683_v8, 0.0  ;;  %v5346_v8 = vld [vmem:[%s7228_s3 + $0x220] ss:$8 sps:$4 sm:$0xff]  }
 0x1ec   : > { %2202 = vmatmul.mubr.bf16.gmra.mrb[84].mxu0 %v6554_v13  ;;  %v1780_v3 = vmax.f32 %v1684_v53, 0.0  ;;  %v5349_v53 = vld [vmem:[%s7228_s3 + $0x230] ss:$8 sps:$4 sm:$0xff]  }
 0x1ed   : > { %v1453_v54 = vpop.f32.mrb[116].mxu1  ;;  %2404 = vmatprep.mubr.bf16.mxu0 %v7311_v42  ;;  %v1781_v21 = vmax.f32 %v1685_v51, 0.0  ;;  %v7321_v42 = vld [vmem:[#allocation28_spill] sm:$0xff]  ;;  %v5354_v51 = vld [vmem:[%s7228_s3 + $0x244] ss:$8 sps:$4 sm:$0xff]  }
 0x1ee   : > { %v1578_v30 = vmax.f32 %v7312_v55, %v1453_v54  ;;  %v1455_v56 = vpop.f32.mrb[117].mxu1  ;;  %v7320_v54 = vld [vmem:[#allocation27_spill] sm:$0xff] }
 0x1ef   : > { %v1579_v58 = vmax.f32 %v7313_v57, %v1455_v56  ;;  %v1457_v17 = vpop.f32.mrb[118].mxu1 }
 0x1f0   : > { %v1686_v62 = vadd.f32 %v6230_v11, %v1578_v30  ;;  %v1580_v63 = vmax.f32 %v7314_v37, %v1457_v17  ;;  %v1459_v10 = vpop.f32.mrb[119].mxu1  ;;  %v7322_v30 = vld [vmem:[#allocation29_spill] sm:$0xff]  ;;  %v7323_v37 = vld [vmem:[#allocation30_spill] sm:$0xff] }
 0x1f1   : > { %v1687_v26 = vadd.f32 %v6234_v19, %v1579_v58  ;;  %v1581_v20 = vmax.f32 %v7315_v7, %v1459_v10  ;;  %v5351_v58 = vld [vmem:[%s7228_s3 + $0x234] ss:$8 sps:$4 sm:$0xff]  }
 0x1f2   : > { %v1782_v18 = vmax.f32 %v1686_v62, 0.0  ;;  %v1688_v4 = vadd.f32 %v6230_v11, %v1580_v63 }
 0x1f3   : > { %v1783_v16 = vmax.f32 %v1687_v26, 0.0  ;;  %v1689_v46 = vadd.f32 %v6234_v19, %v1581_v20  ;;  %v7324_v26 = vld [vmem:[#allocation31_spill] sm:$0xff] }
 0x1f4   : > { %v1838_v45 = vmax.f32 %v1778_v28, %v1782_v18  ;;  %v1784_v50 = vmax.f32 %v1688_v4, 0.0  ;;  %2405 = vmatmul.mubr.bf16.vlgmr.msra.gmra.mrb[56].mxu0 %v7318_v6  ;;  %v7325_v18 = vld [vmem:[#allocation32_spill] sm:$0xff] }
 0x1f5   : > { %v1839_v22 = vmax.f32 %v1779_v29, %v1783_v16  ;;  %v1785_v14 = vmax.f32 %v1689_v46, 0.0  ;;  %v1463_v52 = vpop.f32.mrb[120].mxu1  ;;  %2414 = vmatprep.mubr.bf16.mxu0 %v6308_v34  ;;  %2679 = vmatpush1.bf16.msra.mxu0 %v5340_v35  ;;  %v7326_v46 = vld [vmem:[#allocation33_spill] sm:$0xff] }
 0x1f6   : > { %v1840_v5 = vmax.f32 %v1780_v3, %v1784_v50  ;;  %v1582_v59 = vmax.f32 %v7319_v23, %v1463_v52  ;;  %v1465_v27 = vpop.f32.mrb[121].mxu1  ;;  %2680 = vmatprep.subr.bf16.mxu0 %v5345_v25  ;;  %v5357_v6 = vld [vmem:[%s7228_s3 + $0x254] ss:$8 sps:$4 sm:$0xff]  }
 0x1f7   : > { %v1841_v1 = vmax.f32 %v1781_v21, %v1785_v14  ;;  %v1583_v15 = vmax.f32 %v7320_v54, %v1465_v27  ;;  %v1467_v36 = vpop.f32.mrb[122].mxu1 }
 0x1f8   : > { %v1584_v34 = vmax.f32 %v7321_v42, %v1467_v36  ;;  %v1469_v33 = vpop.f32.mrb[123].mxu1  ;;  %v6596_v55 = vpack.c.bf16 %v1840_v5, %v1838_v45  ;;  %v1690_v62 = vadd.f32 %v6230_v11, %v1582_v59  ;;  %v5352_v45 = vld [vmem:[%s7228_s3 + $0x240] ss:$8 sps:$4 sm:$0xff]  }
 0x1f9   : > { %v1585_v56 = vmax.f32 %v7322_v30, %v1469_v33  ;;  %2681 = vmatpush1.bf16.msra.mxu0 %v5343_v40  ;;  %v6602_v57 = vpack.c.bf16 %v1841_v1, %v1839_v22  ;;  %v5355_v1 = vld [vmem:[%s7228_s3 + $0x250] ss:$8 sps:$4 sm:$0xff]   ;;  %v7328_v30 = vld [vmem:[#allocation35_spill] sm:$0xff] }
 0x1fa   : > { %2682 = vmatprep.subr.bf16.mxu0 %v5348_v38  ;;  %v1692_v35 = vadd.f32 %v6230_v11, %v1584_v34  ;;  %v1786_v50 = vmax.f32 %v1690_v62, 0.0  ;;  %v5360_v34 = vld [vmem:[%s7228_s3 + $0x264] ss:$8 sps:$4 sm:$0xff]  }
 0x1fb   : > { %v1693_v29 = vadd.f32 %v6234_v19, %v1585_v56 }
 0x1fc   : > { %2415 = vmatmul.mubr.bf16.gmra.mrb[60].mxu0 %v6304_v44  ;;  %v1691_v44 = vadd.f32 %v6234_v19, %v1583_v15  ;;  %v1788_v52 = vmax.f32 %v1692_v35, 0.0  ;;  %v7327_v15 = vld [vmem:[#allocation34_spill] sm:$0xff] }
 0x1fd   : > { %v1473_v17 = vpop.f32.mrb[124].mxu1  ;;  %2424 = vmatprep.mubr.bf16.mxu0 %v6354_v48  ;;  %2683 = vmatpush1.bf16.msra.mxu0 %v5346_v8  ;;  %v1789_v23 = vmax.f32 %v1693_v29, 0.0  ;;  %v7331_v35 = vld [vmem:[#allocation38_spill] sm:$0xff]  ;;  %v7332_v29 = vld [vmem:[#allocation39_spill] sm:$0xff] }
 0x1fe   : > { %v1586_v63 = vmax.f32 %v7323_v37, %v1473_v17  ;;  %v1475_v10 = vpop.f32.mrb[125].mxu1  ;;  %2684 = vmatprep.subr.bf16.mxu0 %v5351_v58  ;;  %v1787_v21 = vmax.f32 %v1691_v44, 0.0  ;;  %v7329_v58 = vld [vmem:[#allocation36_spill] sm:$0xff]  ;;  %v7330_v37 = vld [vmem:[#allocation37_spill] sm:$0xff] }
 0x1ff   : > { %v1587_v7 = vmax.f32 %v7324_v26, %v1475_v10  ;;  %v1477_v20 = vpop.f32.mrb[126].mxu1  ;;  %v5358_v10 = vld [vmem:[%s7228_s3 + $0x260] ss:$8 sps:$4 sm:$0xff]   ;;  %v5363_v44 = vld [vmem:[%s7228_s3 + $0x274] ss:$8 sps:$4 sm:$0xff]  }
 0x200   : > { %v1694_v28 = vadd.f32 %v6230_v11, %v1586_v63  ;;  %v1588_v4 = vmax.f32 %v7325_v18, %v1477_v20  ;;  %v1479_v25 = vpop.f32.mrb[127].mxu1 }
 0x201   : > { %v1695_v16 = vadd.f32 %v6234_v19, %v1587_v7  ;;  %v1589_v3 = vmax.f32 %v7326_v46, %v1479_v25  ;;  %2685 = vmatpush1.bf16.msra.mxu0 %v5349_v53  ;;  %v5361_v7 = vld [vmem:[%s7228_s3 + $0x270] ss:$8 sps:$4 sm:$0xff]  }
 0x202   : > { %v1790_v32 = vmax.f32 %v1694_v28, 0.0  ;;  %v1696_v12 = vadd.f32 %v6230_v11, %v1588_v4  ;;  %2686 = vmatprep.subr.bf16.mxu0 %v5354_v51  ;;  %v5366_v4 = vld [vmem:[%s7228_s3 + $0x284] ss:$8 sps:$4 sm:$0xff]  }
 0x203   : > { %v1791_v22 = vmax.f32 %v1695_v16, 0.0  ;;  %v1697_v14 = vadd.f32 %v6234_v19, %v1589_v3 }
 0x204   : > { %v1842_v40 = vmax.f32 %v1786_v50, %v1790_v32  ;;  %v1792_v5 = vmax.f32 %v1696_v12, 0.0  ;;  %2425 = vmatmul.mubr.bf16.gmra.mrb[64].mxu0 %v6351_v60  ;;  %v7333_v50 = vld [vmem:[#allocation40_spill] sm:$0xff] }
 0x205   : > { %v1843_v59 = vmax.f32 %v1787_v21, %v1791_v22  ;;  %v1793_v27 = vmax.f32 %v1697_v14, 0.0  ;;  %v1483_v38 = vpop.f32.mrb[128].mxu1  ;;  %2434 = vmatprep.mubr.bf16.mxu0 %v6399_v61  ;;  %2687 = vmatpush1.bf16.msra.mxu0 %v5352_v45  ;;  %v7334_v22 = vld [vmem:[#allocation41_spill] sm:$0xff] }
 0x206   : > { %v1844_v54 = vmax.f32 %v1788_v52, %v1792_v5  ;;  %v1590_v36 = vmax.f32 %v7327_v15, %v1483_v38  ;;  %v1485_v42 = vpop.f32.mrb[129].mxu1  ;;  %2688 = vmatprep.subr.bf16.mxu0 %v5357_v6  ;;  %v5364_v52 = vld [vmem:[%s7228_s3 + $0x280] ss:$8 sps:$4 sm:$0xff]  }
 0x207   : > { %v1845_v33 = vmax.f32 %v1789_v23, %v1793_v27  ;;  %v1591_v56 = vmax.f32 %v7328_v30, %v1485_v42  ;;  %v1487_v8 = vpop.f32.mrb[130].mxu1 }
 0x208   : > { %v1592_v17 = vmax.f32 %v7329_v58, %v1487_v8  ;;  %v1489_v53 = vpop.f32.mrb[131].mxu1  ;;  %v6644_v62 = vpack.c.bf16 %v1844_v54, %v1842_v40  ;;  %v1698_v20 = vadd.f32 %v6230_v11, %v1590_v36  ;;  %v5370_v58 = vld [vmem:[%s7228_s3 + $0x2a0] ss:$8 sps:$4 sm:$0xff]  }
 0x209   : > { %v1593_v63 = vmax.f32 %v7330_v37, %v1489_v53  ;;  %2689 = vmatpush1.bf16.msra.mxu0 %v5355_v1  ;;  %v6650_v51 = vpack.c.bf16 %v1845_v33, %v1843_v59  ;;  %v1699_v25 = vadd.f32 %v6234_v19, %v1591_v56  ;;  %v5369_v59 = vld [vmem:[%s7228_s3 + $0x294] ss:$8 sps:$4 sm:$0xff]   ;;  %v5373_v37 = vld [vmem:[%s7228_s3 + $0x2b0] ss:$8 sps:$4 sm:$0xff]  }
 0x20a   : > { %2690 = vmatprep.subr.bf16.mxu0 %v5360_v34  ;;  %v1700_v3 = vadd.f32 %v6230_v11, %v1592_v17  ;;  %v1794_v40 = vmax.f32 %v1698_v20, 0.0  ;;  %v5375_v53 = vld [vmem:[%s7228_s3 + $0x2b4] ss:$8 sps:$4 sm:$0xff]   ;;  %v5382_v20 = vld [vmem:[%s7228_s3 + $0x2e0] ss:$8 sps:$4 sm:$0xff]  }
 0x20b   : > { %v1701_v6 = vadd.f32 %v6234_v19, %v1593_v63  ;;  %v1795_v27 = vmax.f32 %v1699_v25, 0.0  ;;  %v5378_v63 = vld [vmem:[%s7228_s3 + $0x2c4] ss:$8 sps:$4 sm:$0xff]   ;;  %v5393_v25 = vld [vmem:[%s7228_s3 + $0x314] ss:$8 sps:$4 sm:$0xff]  }
 0x20c   : > { %2435 = vmatmul.mubr.bf16.gmra.mrb[68].mxu0 %v6396_v31  ;;  %v1796_v54 = vmax.f32 %v1700_v3, 0.0  ;;  %v5402_v3 = vld [vmem:[%s7228_s3 + $0x344] ss:$8 sps:$4 sm:$0xff]  }
 0x20d   : > { %v1493_v26 = vpop.f32.mrb[132].mxu1  ;;  %2444 = vmatprep.mubr.bf16.mxu0 %v6445_v2  ;;  %2691 = vmatpush1.bf16.msra.mxu0 %v5358_v10  ;;  %v1797_v42 = vmax.f32 %v1701_v6, 0.0  ;;  %v5376_v10 = vld [vmem:[%s7228_s3 + $0x2c0] ss:$8 sps:$4 sm:$0xff]  }
 0x20e   : > { %v1594_v28 = vmax.f32 %v7331_v35, %v1493_v26  ;;  %v1495_v18 = vpop.f32.mrb[133].mxu1  ;;  %2692 = vmatprep.subr.bf16.mxu0 %v5363_v44  ;;  %v5381_v44 = vld [vmem:[%s7228_s3 + $0x2d4] ss:$8 sps:$4 sm:$0xff]   ;;  %v5379_v26 = vld [vmem:[%s7228_s3 + $0x2d0] ss:$8 sps:$4 sm:$0xff]  }
 0x20f   : > { %v1595_v16 = vmax.f32 %v7332_v29, %v1495_v18  ;;  %v1497_v46 = vpop.f32.mrb[134].mxu1  ;;  %v5387_v35 = vld [vmem:[%s7228_s3 + $0x2f4] ss:$8 sps:$4 sm:$0xff]   ;;  %v5390_v18 = vld [vmem:[%s7228_s3 + $0x304] ss:$8 sps:$4 sm:$0xff]  }
 0x210   : > { %v1702_v45 = vadd.f32 %v6230_v11, %v1594_v28  ;;  %v1596_v32 = vmax.f32 %v7333_v50, %v1497_v46  ;;  %v1499_v12 = vpop.f32.mrb[135].mxu1  ;;  %v5385_v28 = vld [vmem:[%s7228_s3 + $0x2f0] ss:$8 sps:$4 sm:$0xff]   ;;  %v5396_v29 = vld [vmem:[%s7228_s3 + $0x324] ss:$8 sps:$4 sm:$0xff]  }
 0x211   : > { %v1703_v21 = vadd.f32 %v6234_v19, %v1595_v16  ;;  %v1597_v14 = vmax.f32 %v7334_v22, %v1499_v12  ;;  %2693 = vmatpush1.bf16.msra.mxu0 %v5361_v7  ;;  %v5384_v7 = vld [vmem:[%s7228_s3 + $0x2e4] ss:$8 sps:$4 sm:$0xff]   ;;  %v5394_v16 = vld [vmem:[%s7228_s3 + $0x320] ss:$8 sps:$4 sm:$0xff]   ;;  %v5397_v46 = vld [vmem:[%s7228_s3 + $0x330] ss:$8 sps:$4 sm:$0xff]  }
 0x212   : > { %v1798_v5 = vmax.f32 %v1702_v45, 0.0  ;;  %v1704_v23 = vadd.f32 %v6230_v11, %v1596_v32  ;;  %2694 = vmatprep.subr.bf16.mxu0 %v5366_v4  ;;  %v5367_v11 = vld [vmem:[%s7228_s3 + $0x290] ss:$8 sps:$4 sm:$0xff]   ;;  %v5388_v4 = vld [vmem:[%s7228_s3 + $0x300] ss:$8 sps:$4 sm:$0xff]  }
 0x213   : > { %v1799_v38 = vmax.f32 %v1703_v21, 0.0  ;;  %v1705_v1 = vadd.f32 %v6234_v19, %v1597_v14  ;;  %v5372_v19 = vld [vmem:[%s7228_s3 + $0x2a4] ss:$8 sps:$4 sm:$0xff]   ;;  %v5400_v45 = vld [vmem:[%s7228_s3 + $0x340] ss:$8 sps:$4 sm:$0xff]  }
 0x214   : > { %v6681_v15 = vmax.f32 %v1794_v40, %v1798_v5  ;;  %v1800_v36 = vmax.f32 %v1704_v23, 0.0  ;;  %2445 = vmatmul.mubr.bf16.gmra.mrb[72].mxu0 %v6442_v39  ;;  %v5405_v50 = vld [vmem:[%s7228_s3 + $0x354] ss:$8 sps:$4 sm:$0xff]   ;;  %v5403_v32 = vld [vmem:[%s7228_s3 + $0x350] ss:$8 sps:$4 sm:$0xff]  }
 0x215   : > { %v6684_v34 = vmax.f32 %v1795_v27, %v1799_v38  ;;  %v1801_v33 = vmax.f32 %v1705_v1, 0.0  ;;  %2454 = vmatprep.mubr.bf16.mxu0 %v6491_v49  ;;  %2695 = vmatpush1.bf16.msra.mxu0 %v5364_v52  ;;  %v5408_v12 = vld [vmem:[%s7228_s3 + $0x364] ss:$8 sps:$4 sm:$0xff]   ;;  %v5406_v6 = vld [vmem:[%s7228_s3 + $0x360] ss:$8 sps:$4 sm:$0xff]  }
 0x216   : > { %v6690_v30 = vmax.f32 %v1796_v54, %v1800_v36  ;;  %2696 = vmatprep.subr.bf16.mxu0 %v5369_v59  ;;  %v5411_v21 = vld [vmem:[%s7228_s3 + $0x374] ss:$8 sps:$4 sm:$0xff]   ;;  %v5409_v22 = vld [vmem:[%s7228_s3 + $0x370] ss:$8 sps:$4 sm:$0xff]   ;;  %v5414_v14 = vld [vmem:[%s7228_s3 + $0x384] ss:$8 sps:$4 sm:$0xff]  }
 0x217   : > { %v6695_v56 = vmax.f32 %v1797_v42, %v1801_v33  ;;  %v5412_v52 = vld [vmem:[%s7228_s3 + $0x380] ss:$8 sps:$4 sm:$0xff]   ;;  %v5417_v40 = vld [vmem:[%s7228_s3 + $0x394] ss:$8 sps:$4 sm:$0xff]   ;;  %v5415_v5 = vld [vmem:[%s7228_s3 + $0x390] ss:$8 sps:$4 sm:$0xff]  }
 0x218   : > { %v1872_v8 = vpack.c.bf16 %v6690_v30, %v6681_v15  ;;  %v5420_v23 = vld [vmem:[%s7228_s3 + $0x3a4] ss:$8 sps:$4 sm:$0xff]   ;;  %v5418_v59 = vld [vmem:[%s7228_s3 + $0x3a0] ss:$8 sps:$4 sm:$0xff]   ;;  %v5423_v27 = vld [vmem:[%s7228_s3 + $0x3b4] ss:$8 sps:$4 sm:$0xff]  }
 0x219   : > { %2697 = vmatpush1.bf16.msra.mxu0 %v5367_v11  ;;  %v1873_v17 = vpack.c.bf16 %v6695_v56, %v6684_v34  ;;  %v5421_v38 = vld [vmem:[%s7228_s3 + $0x3b0] ss:$8 sps:$4 sm:$0xff]   ;;  %v5426_v1 = vld [vmem:[%s7228_s3 + $0x3c4] ss:$8 sps:$4 sm:$0xff]   ;;  %v5424_v54 = vld [vmem:[%s7228_s3 + $0x3c0] ss:$8 sps:$4 sm:$0xff]  }
 0x21a   : > { %2698 = vmatprep.subr.bf16.mxu0 %v5372_v19  ;;  %v5429_v36 = vld [vmem:[%s7228_s3 + $0x3d4] ss:$8 sps:$4 sm:$0xff]   ;;  %v5427_v42 = vld [vmem:[%s7228_s3 + $0x3d0] ss:$8 sps:$4 sm:$0xff]   ;;  %v5432_v33 = vld [vmem:[%s7228_s3 + $0x3e4] ss:$8 sps:$4 sm:$0xff]  }
 0x21b   : > { %v5430_v11 = vld [vmem:[%s7228_s3 + $0x3e0] ss:$8 sps:$4 sm:$0xff]   ;;  %v5435_v19 = vld [vmem:[%s7228_s3 + $0x3f4] ss:$8 sps:$4 sm:$0xff]  }
 0x21c   : > { %2455 = vmatmul.mubr.bf16.gmra.mrb[76].mxu0 %v6488_v9 }
 0x21d   : > { %2464 = vmatprep.mubr.bf16.mxu0 %v6513_v24  ;;  %2699 = vmatpush1.bf16.msra.mxu0 %v5370_v58  ;;  %v5484_v58 = vld [vmem:[%s7230_s5 + $0x40] sm:$0xff]  }
 0x21e   : > { %2700 = vmatprep.subr.bf16.mxu0 %v5375_v53  ;;  %v5433_v53 = vld [vmem:[%s7228_s3 + $0x3f0] ss:$8 sps:$4 sm:$0xff]  }
 0x221   : > { %2701 = vmatpush1.bf16.msra.mxu0 %v5373_v37  ;;  %v5438_v37 = vld [vmem:[%s7228_s3 + $0x404] ss:$8 sps:$4 sm:$0xff]  }
 0x222   : > { %2702 = vmatprep.subr.bf16.mxu0 %v5378_v63  ;;  %v5537_v63 = vmov 0.0  }
 0x223   : > { %4850 = vmatprep.subr.bf16.mxu1 %v5537_v63  ;;  %4866 = vmatprep.mubr.msk.bf16.mxu1 %vm5538_vm2, %v5537_v63 }
 0x224   : > { %2465 = vmatmul.mubr.bf16.gmra.mrb[80].mxu0 %v6510_v47  ;;  %4851 = vmatpush3.bf16.msra.mxu1 %v5484_v58 }
 0x225   : > { %2474 = vmatprep.mubr.bf16.mxu0 %v6535_v43  ;;  %2703 = vmatpush1.bf16.msra.mxu0 %v5376_v10  ;;  %v5485_v10 = vld [vmem:[%s7230_s5 + $0x48] sm:$0xff]  }
 0x226   : > { %2704 = vmatprep.subr.bf16.mxu0 %v5381_v44  ;;  %4852 = vmatprep.subr.bf16.mxu1 %v5537_v63  ;;  %v5441_v44 = vld [vmem:[%s7228_s3 + $0x414] ss:$8 sps:$4 sm:$0xff]  }
 0x228   : > { %4853 = vmatpush3.bf16.msra.mxu1 %v5485_v10 }
 0x229   : > { %2705 = vmatpush1.bf16.msra.mxu0 %v5379_v26  ;;  %v5486_v26 = vld [vmem:[%s7230_s5 + $0x50] sm:$0xff]   ;;  %4854 = vmatprep.subr.bf16.mxu1 %v5537_v63 }
 0x22a   : > { %2706 = vmatprep.subr.bf16.mxu0 %v5384_v7  ;;  %v5439_v7 = vld [vmem:[%s7228_s3 + $0x410] ss:$8 sps:$4 sm:$0xff]  }
 0x22c   : > { %2475 = vmatmul.mubr.bf16.gmra.mrb[84].mxu0 %v6532_v41  ;;  %4855 = vmatpush3.bf16.msra.mxu1 %v5486_v26 }
 0x22d   : > { %2707 = vmatpush1.bf16.msra.mxu0 %v5382_v20  ;;  %2710 = vmatprep.mubr.bf16.mxu0 %v6354_v48  ;;  %v5391_v48 = vld [vmem:[%s7228_s3 + $0x310] ss:$8 sps:$4 sm:$0xff]   ;;  %v5444_v20 = vld [vmem:[%s7228_s3 + $0x424] ss:$8 sps:$4 sm:$0xff]  }
 0x22e   : > { %2708 = vmatprep.subr.bf16.mxu0 %v5387_v35  ;;  %v5487_v35 = vld [vmem:[%s7230_s5 + $0x58] sm:$0xff]   ;;  %4856 = vmatprep.subr.bf16.mxu1 %v5537_v63 }
 0x230   : > { %4857 = vmatpush3.bf16.msra.mxu1 %v5487_v35 }
 0x231   : > { %2709 = vmatpush1.bf16.msra.mxu0 %v5385_v28  ;;  %v5447_v28 = vld [vmem:[%s7228_s3 + $0x434] ss:$8 sps:$4 sm:$0xff]   ;;  %4858 = vmatprep.subr.bf16.mxu1 %v5537_v63 }
 0x232   : > { %3016 = vmatprep.subr.bf16.mxu0 %v5390_v18  ;;  %v5488_v18 = vld [vmem:[%s7230_s5 + $0x60] sm:$0xff]  }
 0x234   : > { %2711 = vmatmul.mubr.bf16.vlgmr.msra.gmra.mrb[56].mxu0 %v6351_v60  ;;  %v5399_v60 = vld [vmem:[%s7228_s3 + $0x334] ss:$8 sps:$4 sm:$0xff]   ;;  %4859 = vmatpush3.bf16.msra.mxu1 %v5488_v18 }
 0x235   : > { %2720 = vmatprep.mubr.bf16.mxu0 %v6399_v61  ;;  %3017 = vmatpush1.bf16.msra.mxu0 %v5388_v4  ;;  %v5445_v4 = vld [vmem:[%s7228_s3 + $0x430] ss:$8 sps:$4 sm:$0xff]  }
 0x236   : > { %3018 = vmatprep.subr.bf16.mxu0 %v5393_v25  ;;  %v5450_v25 = vld [vmem:[%s7228_s3 + $0x444] ss:$8 sps:$4 sm:$0xff]   ;;  %4860 = vmatprep.subr.bf16.mxu1 %v5537_v63 }
 0x239   : > { %3019 = vmatpush1.bf16.msra.mxu0 %v5391_v48  ;;  %v5489_v48 = vld [vmem:[%s7230_s5 + $0x68] sm:$0xff]  }
 0x23a   : > { %3020 = vmatprep.subr.bf16.mxu0 %v5396_v29  ;;  %v5448_v29 = vld [vmem:[%s7228_s3 + $0x440] ss:$8 sps:$4 sm:$0xff]   ;;  %4861 = vmatpush3.bf16.msra.mxu1 %v5489_v48 }
 0x23b   : > { %4862 = vmatprep.subr.bf16.mxu1 %v5537_v63 }
 0x23c   : > { %2721 = vmatmul.mubr.bf16.gmra.mrb[60].mxu0 %v6396_v31 }
 0x23d   : > { %2730 = vmatprep.mubr.bf16.mxu0 %v6445_v2  ;;  %3021 = vmatpush1.bf16.msra.mxu0 %v5394_v16  ;;  %v5453_v16 = vld [vmem:[%s7228_s3 + $0x454] ss:$8 sps:$4 sm:$0xff]  }
 0x23e   : > { %3022 = vmatprep.subr.bf16.mxu0 %v5399_v60  ;;  %v5490_v60 = vld [vmem:[%s7230_s5 + $0x70] sm:$0xff]  }
 0x23f   : > { %4863 = vmatpush3.bf16.msra.mxu1 %v5490_v60 }
 0x240   : > { %4864 = vmatprep.subr.bf16.mxu1 %v5537_v63 }
 0x241   : > { %3023 = vmatpush1.bf16.msra.mxu0 %v5397_v46  ;;  %v5451_v46 = vld [vmem:[%s7228_s3 + $0x450] ss:$8 sps:$4 sm:$0xff]  }
 0x242   : > { %3024 = vmatprep.subr.bf16.mxu0 %v5402_v3  ;;  %v5456_v3 = vld [vmem:[%s7228_s3 + $0x464] ss:$8 sps:$4 sm:$0xff]  }
 0x244   : > { %2731 = vmatmul.mubr.bf16.gmra.mrb[64].mxu0 %v6442_v39 }
 0x245   : > { %2740 = vmatprep.mubr.bf16.mxu0 %v6491_v49  ;;  %3025 = vmatpush1.bf16.msra.mxu0 %v5400_v45  ;;  %v5454_v45 = vld [vmem:[%s7228_s3 + $0x460] ss:$8 sps:$4 sm:$0xff]  }
 0x246   : > { %3026 = vmatprep.subr.bf16.mxu0 %v5405_v50  ;;  %v5459_v50 = vld [vmem:[%s7228_s3 + $0x474] ss:$8 sps:$4 sm:$0xff]  }
 0x249   : > { %3027 = vmatpush1.bf16.msra.mxu0 %v5403_v32  ;;  %v5457_v32 = vld [vmem:[%s7228_s3 + $0x470] ss:$8 sps:$4 sm:$0xff]  }
 0x24a   : > { %3028 = vmatprep.subr.bf16.mxu0 %v5408_v12  ;;  %v5462_v12 = vld [vmem:[%s7228_s3 + $0x484] ss:$8 sps:$4 sm:$0xff]  }
 0x24c   : > { %2741 = vmatmul.mubr.bf16.gmra.mrb[68].mxu0 %v6488_v9 }
 0x24d   : > { %2750 = vmatprep.mubr.bf16.mxu0 %v6513_v24  ;;  %3029 = vmatpush1.bf16.msra.mxu0 %v5406_v6  ;;  %v5460_v6 = vld [vmem:[%s7228_s3 + $0x480] ss:$8 sps:$4 sm:$0xff]  }
 0x24e   : > { %3030 = vmatprep.subr.bf16.mxu0 %v5411_v21  ;;  %v5465_v21 = vld [vmem:[%s7228_s3 + $0x494] ss:$8 sps:$4 sm:$0xff]  }
 0x251   : > { %3031 = vmatpush1.bf16.msra.mxu0 %v5409_v22  ;;  %v5463_v22 = vld [vmem:[%s7228_s3 + $0x490] ss:$8 sps:$4 sm:$0xff]  }
 0x252   : > { %3032 = vmatprep.subr.bf16.mxu0 %v5414_v14  ;;  %v5468_v14 = vld [vmem:[%s7228_s3 + $0x4a4] ss:$8 sps:$4 sm:$0xff]  }
 0x254   : > { %2751 = vmatmul.mubr.bf16.gmra.mrb[72].mxu0 %v6510_v47 }
 0x255   : > { %2760 = vmatprep.mubr.bf16.mxu0 %v6535_v43  ;;  %3033 = vmatpush1.bf16.msra.mxu0 %v5412_v52  ;;  %v5466_v52 = vld [vmem:[%s7228_s3 + $0x4a0] ss:$8 sps:$4 sm:$0xff]  }
 0x256   : > { %3034 = vmatprep.subr.bf16.mxu0 %v5417_v40  ;;  %v5471_v40 = vld [vmem:[%s7228_s3 + $0x4b4] ss:$8 sps:$4 sm:$0xff]  }
 0x259   : > { %3035 = vmatpush1.bf16.msra.mxu0 %v5415_v5  ;;  %v5469_v5 = vld [vmem:[%s7228_s3 + $0x4b0] ss:$8 sps:$4 sm:$0xff]  }
 0x25a   : > { %3036 = vmatprep.subr.bf16.mxu0 %v5420_v23  ;;  %v5474_v23 = vld [vmem:[%s7228_s3 + $0x4c4] ss:$8 sps:$4 sm:$0xff]  }
 0x25c   : > { %2761 = vmatmul.mubr.bf16.gmra.mrb[76].mxu0 %v6532_v41 }
 0x25d   : > { %2770 = vmatprep.mubr.bf16.mxu0 %v6557_v0  ;;  %3037 = vmatpush1.bf16.msra.mxu0 %v5418_v59  ;;  %v5472_v59 = vld [vmem:[%s7228_s3 + $0x4c0] ss:$8 sps:$4 sm:$0xff]  }
 0x25e   : > { %3038 = vmatprep.subr.bf16.mxu0 %v5423_v27  ;;  %v5477_v27 = vld [vmem:[%s7228_s3 + $0x4d4] ss:$8 sps:$4 sm:$0xff]  }
 0x261   : > { %3039 = vmatpush1.bf16.msra.mxu0 %v5421_v38  ;;  %v5475_v38 = vld [vmem:[%s7228_s3 + $0x4d0] ss:$8 sps:$4 sm:$0xff]  }
 0x262   : > { %3040 = vmatprep.subr.bf16.mxu0 %v5426_v1  ;;  %v5480_v1 = vld [vmem:[%s7228_s3 + $0x4e4] ss:$8 sps:$4 sm:$0xff]  }
 0x264   : > { %2771 = vmatmul.mubr.bf16.gmra.mrb[80].mxu0 %v6554_v13 }
 0x265   : > { %2780 = vmatprep.mubr.bf16.mxu0 %v6602_v57  ;;  %3041 = vmatpush1.bf16.msra.mxu0 %v5424_v54  ;;  %v5478_v54 = vld [vmem:[%s7228_s3 + $0x4e0] ss:$8 sps:$4 sm:$0xff]  }
 0x266   : > { %3042 = vmatprep.subr.bf16.mxu0 %v5429_v36  ;;  %v5483_v36 = vld [vmem:[%s7228_s3 + $0x4f4] ss:$8 sps:$4 sm:$0xff]  }
 0x269   : > { %3043 = vmatpush1.bf16.msra.mxu0 %v5427_v42  ;;  %v5481_v42 = vld [vmem:[%s7228_s3 + $0x4f0] ss:$8 sps:$4 sm:$0xff]  }
 0x26a   : > { %3044 = vmatprep.subr.bf16.mxu0 %v5432_v33 }
 0x26c   : > { %2781 = vmatmul.mubr.bf16.gmra.mrb[84].mxu0 %v6596_v55 }
 0x26d   : > { %3045 = vmatpush1.bf16.msra.mxu0 %v5430_v11  ;;  %3048 = vmatprep.mubr.bf16.mxu0 %v6399_v61  ;;  %v5436_v61 = vld [vmem:[%s7228_s3 + $0x400] ss:$8 sps:$4 sm:$0xff]  }
 0x26e   : > { %3046 = vmatprep.subr.bf16.mxu0 %v5435_v19 }
 0x271   : > { %3047 = vmatpush1.bf16.msra.mxu0 %v5433_v53 }
 0x272   : > { %3354 = vmatprep.subr.bf16.mxu0 %v5438_v37 }
 0x274   : > { %3049 = vmatmul.mubr.bf16.vlgmr.msra.gmra.mrb[56].mxu0 %v6396_v31  ;;  %v5442_v31 = vld [vmem:[%s7228_s3 + $0x420] ss:$8 sps:$4 sm:$0xff]  }
 0x275   : > { %3058 = vmatprep.mubr.bf16.mxu0 %v6445_v2  ;;  %3355 = vmatpush1.bf16.msra.mxu0 %v5436_v61 }
 0x276   : > { %3356 = vmatprep.subr.bf16.mxu0 %v5441_v44 }
 0x279   : > { %3357 = vmatpush1.bf16.msra.mxu0 %v5439_v7 }
 0x27a   : > { %3358 = vmatprep.subr.bf16.mxu0 %v5444_v20 }
 0x27c   : > { %3059 = vmatmul.mubr.bf16.gmra.mrb[60].mxu0 %v6442_v39 }
 0x27d   : > { %3068 = vmatprep.mubr.bf16.mxu0 %v6491_v49  ;;  %3359 = vmatpush1.bf16.msra.mxu0 %v5442_v31 }
 0x27e   : > { %3360 = vmatprep.subr.bf16.mxu0 %v5447_v28 }
 0x281   : > { %3361 = vmatpush1.bf16.msra.mxu0 %v5445_v4 }
 0x282   : > { %3362 = vmatprep.subr.bf16.mxu0 %v5450_v25 }
 0x284   : > { %3069 = vmatmul.mubr.bf16.gmra.mrb[64].mxu0 %v6488_v9 }
 0x285   : > { %3078 = vmatprep.mubr.bf16.mxu0 %v6513_v24  ;;  %3363 = vmatpush1.bf16.msra.mxu0 %v5448_v29 }
 0x286   : > { %3364 = vmatprep.subr.bf16.mxu0 %v5453_v16 }
 0x289   : > { %3365 = vmatpush1.bf16.msra.mxu0 %v5451_v46 }
 0x28a   : > { %3366 = vmatprep.subr.bf16.mxu0 %v5456_v3 }
 0x28c   : > { %3079 = vmatmul.mubr.bf16.gmra.mrb[68].mxu0 %v6510_v47 }
 0x28d   : > { %3088 = vmatprep.mubr.bf16.mxu0 %v6535_v43  ;;  %3367 = vmatpush1.bf16.msra.mxu0 %v5454_v45 }
 0x28e   : > { %3368 = vmatprep.subr.bf16.mxu0 %v5459_v50 }
 0x291   : > { %3369 = vmatpush1.bf16.msra.mxu0 %v5457_v32 }
 0x292   : > { %3370 = vmatprep.subr.bf16.mxu0 %v5462_v12 }
 0x294   : > { %3089 = vmatmul.mubr.bf16.gmra.mrb[72].mxu0 %v6532_v41 }
 0x295   : > { %3098 = vmatprep.mubr.bf16.mxu0 %v6557_v0  ;;  %3371 = vmatpush1.bf16.msra.mxu0 %v5460_v6 }
 0x296   : > { %3372 = vmatprep.subr.bf16.mxu0 %v5465_v21 }
 0x299   : > { %3373 = vmatpush1.bf16.msra.mxu0 %v5463_v22 }
 0x29a   : > { %3374 = vmatprep.subr.bf16.mxu0 %v5468_v14 }
 0x29c   : > { %3099 = vmatmul.mubr.bf16.gmra.mrb[76].mxu0 %v6554_v13 }
 0x29d   : > { %3108 = vmatprep.mubr.bf16.mxu0 %v6602_v57  ;;  %3375 = vmatpush1.bf16.msra.mxu0 %v5466_v52  ;;  %v5492_v52 = vld [vmem:[%s7230_s5] sm:$0xff]  }
 0x29e   : > { %3376 = vmatprep.subr.bf16.mxu0 %v5471_v40 }
 0x2a1   : > { %3377 = vmatpush1.bf16.msra.mxu0 %v5469_v5 }
 0x2a2   : > { %3378 = vmatprep.subr.bf16.mxu0 %v5474_v23 }
 0x2a4   : > { %3109 = vmatmul.mubr.bf16.gmra.mrb[80].mxu0 %v6596_v55 }
 0x2a5   : > { %3118 = vmatprep.mubr.bf16.mxu0 %v6650_v51  ;;  %3379 = vmatpush1.bf16.msra.mxu0 %v5472_v59 }
 0x2a6   : > { %3380 = vmatprep.subr.bf16.mxu0 %v5477_v27  ;;  %v5493_v27 = vld [vmem:[%s7230_s5 + $0x8] sm:$0xff]  }
 0x2a9   : > { %3381 = vmatpush1.bf16.msra.mxu0 %v5475_v38 }
 0x2aa   : > { %3382 = vmatprep.subr.bf16.mxu0 %v5480_v1 }
 0x2ac   : > { %3119 = vmatmul.mubr.bf16.gmra.mrb[84].mxu0 %v6644_v62 }
 0x2ad   : > { %3383 = vmatpush1.bf16.msra.mxu0 %v5478_v54  ;;  %3386 = vmatprep.mubr.bf16.mxu0 %v6445_v2 }
 0x2ae   : > { %3384 = vmatprep.subr.bf16.mxu0 %v5483_v36 }
 0x2b1   : > { %3385 = vmatpush1.bf16.msra.mxu0 %v5481_v42 }
 0x2b4   : > { %3387 = vmatmul.mubr.bf16.vlgmr.msra.gmra.mrb[56].mxu0 %v6442_v39  ;;  %v5491_v39 = vld [vmem:[%s7230_s5 + $0x78] sm:$0xff]  }
 0x2b5   : > { %3396 = vmatprep.mubr.bf16.mxu0 %v6491_v49  ;;  %4865 = vmatpush3.bf16.msra.mxu1 %v5491_v39  ;;  %v5494_v39 = vld [vmem:[%s7230_s5 + $0x10] sm:$0xff]  }
 0x2b6   : > { %4870 = vmatprep.subr.bf16.mxu1 %v5537_v63 }
 0x2bc   : > { %3397 = vmatmul.mubr.bf16.gmra.mrb[60].mxu0 %v6488_v9 }
 0x2bd   : > { %3406 = vmatprep.mubr.bf16.mxu0 %v6513_v24 }
 0x2c4   : > { %3407 = vmatmul.mubr.bf16.gmra.mrb[64].mxu0 %v6510_v47 }
 0x2c5   : > { %3416 = vmatprep.mubr.bf16.mxu0 %v6535_v43  ;;  %v7021_v43 = vld [vmem:[%s7229_s4] ss:$0 sm:$0xff] }
 0x2cc   : > { %3417 = vmatmul.mubr.bf16.gmra.mrb[68].mxu0 %v6532_v41 }
 0x2cd   : > { %3426 = vmatprep.mubr.bf16.mxu0 %v6557_v0 }
 0x2d4   : > { %3427 = vmatmul.mubr.bf16.gmra.mrb[72].mxu0 %v6554_v13 }
 0x2d5   : > { %3436 = vmatprep.mubr.bf16.mxu0 %v6602_v57 }
 0x2dc   : > { %3437 = vmatmul.mubr.bf16.gmra.mrb[76].mxu0 %v6596_v55 }
 0x2dd   : > { %3446 = vmatprep.mubr.bf16.mxu0 %v6650_v51 }
 0x2e4   : > { %3447 = vmatmul.mubr.bf16.gmra.mrb[80].mxu0 %v6644_v62 }
 0x2e5   : > { %3456 = vmatprep.mubr.bf16.mxu0 %v1873_v17 }
 0x2ec   : > { %3457 = vmatmul.mubr.bf16.gmra.mrb[84].mxu0 %v1872_v8 }
 0x387   : > { %v3388_v2 = vpop.f32.mrb[56].mxu0 }
 0x388   : > { %v3390_v9 = vpop.f32.mrb[57].mxu0 }
 0x389   : > { %v3499_v49 = vmax.f32 %v3388_v2, %v3390_v9  ;;  %v3392_v47 = vpop.f32.mrb[58].mxu0 }
 0x38a   : > { %v3394_v24 = vpop.f32.mrb[59].mxu0 }
 0x38b   : > { %v3500_v41 = vmax.f32 %v3392_v47, %v3394_v24  ;;  %v3522_v55 = vadd.f32 %v7021_v43, %v3499_v49 }
 0x38d   : > { %v3523_v15 = vadd.f32 %v7021_v43, %v3500_v41  ;;  %v3538_v56 = vmax.f32 %v3522_v55, 0.0  ;;  %v5495_v41 = vld [vmem:[%s7230_s5 + $0x18] sm:$0xff]  }
 0x38f   : > { %v3398_v13 = vpop.f32.mrb[60].mxu0  ;;  %v3539_v33 = vmax.f32 %v3523_v15, 0.0 }
 0x390   : > { %v3400_v0 = vpop.f32.mrb[61].mxu0 }
 0x391   : > { %v3501_v57 = vmax.f32 %v3398_v13, %v3400_v0  ;;  %v3402_v62 = vpop.f32.mrb[62].mxu0 }
 0x392   : > { %v3404_v51 = vpop.f32.mrb[63].mxu0 }
 0x393   : > { %v3524_v34 = vadd.f32 %v7021_v43, %v3501_v57  ;;  %v3502_v30 = vmax.f32 %v3402_v62, %v3404_v51 }
 0x395   : > { %v3540_v8 = vmax.f32 %v3524_v34, 0.0  ;;  %v3525_v17 = vadd.f32 %v7021_v43, %v3502_v30 }
 0x397   : > { %v7027_v11 = vmax.f32 %v3538_v56, %v3540_v8  ;;  %v3541_v19 = vmax.f32 %v3525_v17, 0.0  ;;  %v3408_v58 = vpop.f32.mrb[64].mxu0  ;;  %v5496_v56 = vld [vmem:[%s7230_s5 + $0x20] sm:$0xff]  }
 0x398   : > { %v3410_v53 = vpop.f32.mrb[65].mxu0 }
 0x399   : > { %v7029_v37 = vmax.f32 %v3539_v33, %v3541_v19  ;;  %v3503_v10 = vmax.f32 %v3408_v58, %v3410_v53  ;;  %v3412_v61 = vpop.f32.mrb[66].mxu0  ;;  %v5497_v58 = vld [vmem:[%s7230_s5 + $0x28] sm:$0xff]  }
 0x39a   : > { %v3414_v44 = vpop.f32.mrb[67].mxu0 }
 0x39b   : > { %v3556_v26 = vpack.c.bf16 %v7029_v37, %v7027_v11  ;;  %v3504_v7 = vmax.f32 %v3412_v61, %v3414_v44  ;;  %v3526_v31 = vadd.f32 %v7021_v43, %v3503_v10  ;;  %v5503_v11 = vld [vmem:[%s7230_s5 + $0x98] sm:$0xff]   ;;  %v5504_v37 = vld [vmem:[%s7230_s5 + $0xa0] sm:$0xff]  }
 0x39d   : > { %v3527_v25 = vadd.f32 %v7021_v43, %v3504_v7  ;;  %v3542_v16 = vmax.f32 %v3526_v31, 0.0 }
 0x39f   : > { %v3418_v20 = vpop.f32.mrb[68].mxu0  ;;  %v3543_v3 = vmax.f32 %v3527_v25, 0.0  ;;  %v5499_v25 = vld [vmem:[%s7230_s5 + $0x38] sm:$0xff]  }
 0x3a0   : > { %v3420_v35 = vpop.f32.mrb[69].mxu0 }
 0x3a1   : > { %v3505_v28 = vmax.f32 %v3418_v20, %v3420_v35  ;;  %v3422_v18 = vpop.f32.mrb[70].mxu0  ;;  %v5498_v20 = vld [vmem:[%s7230_s5 + $0x30] sm:$0xff]  }
 0x3a2   : > { %v3424_v4 = vpop.f32.mrb[71].mxu0 }
 0x3a3   : > { %v3528_v48 = vadd.f32 %v7021_v43, %v3505_v28  ;;  %v3506_v29 = vmax.f32 %v3422_v18, %v3424_v4 }
 0x3a5   : > { %v3544_v60 = vmax.f32 %v3528_v48, 0.0  ;;  %v3529_v46 = vadd.f32 %v7021_v43, %v3506_v29 }
 0x3a7   : > { %v3573_v45 = vmax.f32 %v3542_v16, %v3544_v60  ;;  %v3545_v50 = vmax.f32 %v3529_v46, 0.0  ;;  %v3428_v32 = vpop.f32.mrb[72].mxu0  ;;  %v5500_v46 = vld [vmem:[%s7230_s5 + $0x80] sm:$0xff]  }
 0x3a8   : > { %v3430_v12 = vpop.f32.mrb[73].mxu0 }
 0x3a9   : > { %v3574_v6 = vmax.f32 %v3543_v3, %v3545_v50  ;;  %v3507_v21 = vmax.f32 %v3428_v32, %v3430_v12  ;;  %v3432_v22 = vpop.f32.mrb[74].mxu0  ;;  %v5506_v50 = vld [vmem:[%s7230_s5 + $0xb0] sm:$0xff]   ;;  %v5507_v32 = vld [vmem:[%s7230_s5 + $0xb8] sm:$0xff]   ;;  %v5508_v12 = vld [vmem:[%s7230_s5 + $0xc0] sm:$0xff]  }
 0x3aa   : > { %v3434_v14 = vpop.f32.mrb[75].mxu0 }
 0x3ab   : > { %v3575_v40 = vpack.c.bf16 %v3574_v6, %v3573_v45  ;;  %v3530_v5 = vadd.f32 %v7021_v43, %v3507_v21  ;;  %v3508_v23 = vmax.f32 %v3432_v22, %v3434_v14  ;;  %v5502_v45 = vld [vmem:[%s7230_s5 + $0x90] sm:$0xff]   ;;  %v5509_v6 = vld [vmem:[%s7230_s5 + $0xc8] sm:$0xff]   ;;  %v5511_v22 = vld [vmem:[%s7230_s5 + $0xd8] sm:$0xff]  }
 0x3ac   : > { %v5510_v21 = vld [vmem:[%s7230_s5 + $0xd0] sm:$0xff]   ;;  %v5512_v14 = vld [vmem:[%s7230_s5 + $0xe0] sm:$0xff]  }
 0x3ad   : > { %v3531_v59 = vadd.f32 %v7021_v43, %v3508_v23  ;;  %4867 = vmatmul.mubr.bf16.vlgmr.msra.gmra.mrb[136].mxu1 %v3575_v40  ;;  %v3546_v49 = vmax.f32 %v3530_v5, 0.0  ;;  %v5514_v40 = vld [vmem:[%s7230_s5 + $0xf0] sm:$0xff]   ;;  %v5515_v5 = vld [vmem:[%s7230_s5 + $0xf8] sm:$0xff]   ;;  %v5516_v23 = vld [vmem:[%s7232_s7] sm:$0xff]  }
 0x3ae   : > { %4871 = vmatpush3.bf16.msra.mxu1 %v5492_v52  ;;  %4886 = vmatprep.mubr.msk.bf16.mxu1 %vm5538_vm2, %v5537_v63  ;;  %v5513_v52 = vld [vmem:[%s7230_s5 + $0xe8] sm:$0xff]  }
 0x3af   : > { %v3438_v38 = vpop.f32.mrb[76].mxu0  ;;  %4872 = vmatprep.subr.bf16.mxu1 %v5537_v63  ;;  %v3547_v13 = vmax.f32 %v3531_v59, 0.0  ;;  %v5517_v59 = vld [vmem:[%s7232_s7 + $0x8] sm:$0xff]  }
 0x3b0   : > { %v3440_v1 = vpop.f32.mrb[77].mxu0 }
 0x3b1   : > { %v3509_v54 = vmax.f32 %v3438_v38, %v3440_v1  ;;  %v3442_v36 = vpop.f32.mrb[78].mxu0  ;;  %v5519_v38 = vld [vmem:[%s7232_s7 + $0x18] sm:$0xff]   ;;  %v5520_v1 = vld [vmem:[%s7232_s7 + $0x20] sm:$0xff]  }
 0x3b2   : > { %4873 = vmatpush3.bf16.msra.mxu1 %v5493_v27  ;;  %v3444_v42 = vpop.f32.mrb[79].mxu0  ;;  %v5518_v27 = vld [vmem:[%s7232_s7 + $0x10] sm:$0xff]  }
 0x3b3   : > { %v3532_v2 = vadd.f32 %v7021_v43, %v3509_v54  ;;  %v3510_v9 = vmax.f32 %v3442_v36, %v3444_v42  ;;  %4874 = vmatprep.subr.bf16.mxu1 %v5537_v63  ;;  %v5521_v54 = vld [vmem:[%s7232_s7 + $0x28] sm:$0xff]   ;;  %v5522_v36 = vld [vmem:[%s7232_s7 + $0x30] sm:$0xff]   ;;  %v5523_v42 = vld [vmem:[%s7232_s7 + $0x38] ss:$0 sps:$4 sm:$0xff]  }
 0x3b5   : > { %v3548_v47 = vmax.f32 %v3532_v2, 0.0  ;;  %v3533_v24 = vadd.f32 %v7021_v43, %v3510_v9 }
 0x3b6   : > { %4875 = vmatpush3.bf16.msra.mxu1 %v5494_v39  ;;  %v4078_v39 = vsel %vm4076_vm3, %v5523_v42, 0 }
 0x3b7   : > { %v7057_v0 = vmax.f32 %v3546_v49, %v3548_v47  ;;  %v3549_v55 = vmax.f32 %v3533_v24, 0.0  ;;  %v3448_v57 = vpop.f32.mrb[80].mxu0  ;;  %4876 = vmatprep.subr.bf16.mxu1 %v5537_v63 }
 0x3b8   : > { %v3450_v62 = vpop.f32.mrb[81].mxu0 }
 0x3b9   : > { %v7060_v51 = vmax.f32 %v3547_v13, %v3549_v55  ;;  %v3511_v15 = vmax.f32 %v3448_v57, %v3450_v62  ;;  %v3452_v34 = vpop.f32.mrb[82].mxu0 }
 0x3ba   : > { %4877 = vmatpush3.bf16.msra.mxu1 %v5495_v41  ;;  %v3454_v30 = vpop.f32.mrb[83].mxu0 }
 0x3bb   : > { %v3773_v8 = vpack.c.bf16 %v7060_v51, %v7057_v0  ;;  %v3534_v17 = vadd.f32 %v7021_v43, %v3511_v15  ;;  %v3512_v33 = vmax.f32 %v3452_v34, %v3454_v30  ;;  %4878 = vmatprep.subr.bf16.mxu1 %v5537_v63 }
 0x3bd   : > { %v3535_v19 = vadd.f32 %v7021_v43, %v3512_v33  ;;  %v3550_v28 = vmax.f32 %v3534_v17, 0.0  ;;  %v4780_v17 = vld [vmem:[%s7231_s6] ss:$0 sm:$0xff] }
 0x3be   : > { %4879 = vmatpush3.bf16.msra.mxu1 %v5496_v56 }
 0x3bf   : > { %v3458_v53 = vpop.f32.mrb[84].mxu0  ;;  %4880 = vmatprep.subr.bf16.mxu1 %v5537_v63  ;;  %v3551_v48 = vmax.f32 %v3535_v19, 0.0 }
 0x3c0   : > { %v3460_v10 = vpop.f32.mrb[85].mxu0 }
 0x3c1   : > { %v3513_v61 = vmax.f32 %v3458_v53, %v3460_v10  ;;  %v3462_v44 = vpop.f32.mrb[86].mxu0 }
 0x3c2   : > { %4881 = vmatpush3.bf16.msra.mxu1 %v5497_v58  ;;  %v3464_v7 = vpop.f32.mrb[87].mxu0 }
 0x3c3   : > { %v3536_v35 = vadd.f32 %v7021_v43, %v3513_v61  ;;  %v3514_v31 = vmax.f32 %v3462_v44, %v3464_v7  ;;  %4882 = vmatprep.subr.bf16.mxu1 %v5537_v63 }
 0x3c5   : > { %v3552_v18 = vmax.f32 %v3536_v35, 0.0  ;;  %v3537_v4 = vadd.f32 %v7021_v43, %v3514_v31  ;;  %v5501_v43 = vld [vmem:[%s7230_s5 + $0x88] sm:$0xff]   ;;  %v5524_v35 = vld [vmem:[%s7234_s9] sm:$0xff]  }
 0x3c6   : > { %4883 = vmatpush3.bf16.msra.mxu1 %v5498_v20 }
 0x3c7   : > { %v3882_v29 = vmax.f32 %v3550_v28, %v3552_v18  ;;  %v3553_v16 = vmax.f32 %v3537_v4, 0.0  ;;  %4884 = vmatprep.subr.bf16.mxu1 %v5537_v63  ;;  %v5525_v28 = vld [vmem:[%s7234_s9 + $0x8] sm:$0xff]   ;;  %v5526_v18 = vld [vmem:[%s7234_s9 + $0x10] sm:$0xff]   ;;  %v5527_v4 = vld [vmem:[%s7234_s9 + $0x18] sm:$0x3f]  }
 0x3c9   : > { %v3883_v60 = vmax.f32 %v3551_v48, %v3553_v16  ;;  %v4781_v48 = vld [vmem:[%s7233_s8] ss:$0 sm:$0xff] }
 0x3ca   : > { %4885 = vmatpush3.bf16.msra.mxu1 %v5499_v25  ;;  %v4167_v25 = vsel %vm943_vm1, %v5527_v4, 0 }
 0x3cb   : > { %v3884_v3 = vpack.c.bf16 %v3883_v60, %v3882_v29  ;;  %4890 = vmatprep.subr.bf16.mxu1 %v5537_v63 }
 0x3cd   : > { %4887 = vmatmul.mubr.bf16.vlgmr.msra.gmra.mrb[140].mxu1 %v3556_v26  ;;  %v5505_v26 = vld [vmem:[%s7230_s5 + $0xa8] sm:$0xff]  }
 0x3ce   : > { %4891 = vmatpush3.bf16.msra.mxu1 %v5500_v46  ;;  %4906 = vmatprep.mubr.msk.bf16.mxu1 %vm5538_vm2, %v5537_v63 }
 0x3cf   : > { %4892 = vmatprep.subr.bf16.mxu1 %v5537_v63 }
 0x3d2   : > { %4893 = vmatpush3.bf16.msra.mxu1 %v5501_v43 }
 0x3d3   : > { %4894 = vmatprep.subr.bf16.mxu1 %v5537_v63 }
 0x3d6   : > { %4895 = vmatpush3.bf16.msra.mxu1 %v5502_v45 }
 0x3d7   : > { %4896 = vmatprep.subr.bf16.mxu1 %v5537_v63 }
 0x3da   : > { %4897 = vmatpush3.bf16.msra.mxu1 %v5503_v11 }
 0x3db   : > { %4898 = vmatprep.subr.bf16.mxu1 %v5537_v63 }
 0x3de   : > { %4899 = vmatpush3.bf16.msra.mxu1 %v5504_v37  ;;  %v4791_v37 = vld [vmem:[%s7235_s10] ss:$0 sm:$0xff] }
 0x3df   : > { %4900 = vmatprep.subr.bf16.mxu1 %v5537_v63 }
 0x3e2   : > { %4901 = vmatpush3.bf16.msra.mxu1 %v5505_v26 }
 0x3e3   : > { %4902 = vmatprep.subr.bf16.mxu1 %v5537_v63 }
 0x3e6   : > { %4903 = vmatpush3.bf16.msra.mxu1 %v5506_v50 }
 0x3e7   : > { %4904 = vmatprep.subr.bf16.mxu1 %v5537_v63 }
 0x3ea   : > { %4905 = vmatpush3.bf16.msra.mxu1 %v5507_v32 }
 0x3eb   : > { %4910 = vmatprep.subr.bf16.mxu1 %v5537_v63 }
 0x3ed   : > { %4907 = vmatmul.mubr.bf16.vlgmr.msra.gmra.mrb[144].mxu1 %v3773_v8 }
 0x3ee   : > { %4911 = vmatpush3.bf16.msra.mxu1 %v5508_v12  ;;  %4926 = vmatprep.mubr.msk.bf16.mxu1 %vm5538_vm2, %v5537_v63 }
 0x3ef   : > { %4912 = vmatprep.subr.bf16.mxu1 %v5537_v63 }
 0x3f2   : > { %4913 = vmatpush3.bf16.msra.mxu1 %v5509_v6 }
 0x3f3   : > { %4914 = vmatprep.subr.bf16.mxu1 %v5537_v63 }
 0x3f6   : > { %4915 = vmatpush3.bf16.msra.mxu1 %v5510_v21 }
 0x3f7   : > { %4916 = vmatprep.subr.bf16.mxu1 %v5537_v63 }
 0x3fa   : > { %4917 = vmatpush3.bf16.msra.mxu1 %v5511_v22 }
 0x3fb   : > { %4918 = vmatprep.subr.bf16.mxu1 %v5537_v63 }
 0x3fe   : > { %4919 = vmatpush3.bf16.msra.mxu1 %v5512_v14 }
 0x3ff   : > { %4920 = vmatprep.subr.bf16.mxu1 %v5537_v63 }
 0x402   : > { %4921 = vmatpush3.bf16.msra.mxu1 %v5513_v52 }
 0x403   : > { %4922 = vmatprep.subr.bf16.mxu1 %v5537_v63 }
 0x406   : > { %4923 = vmatpush3.bf16.msra.mxu1 %v5514_v40 }
 0x407   : > { %4924 = vmatprep.subr.bf16.mxu1 %v5537_v63 }
 0x40a   : > { %4925 = vmatpush3.bf16.msra.mxu1 %v5515_v5 }
 0x40b   : > { %4930 = vmatprep.subr.bf16.mxu1 %v5537_v63 }
 0x40d   : > { %4927 = vmatmul.mubr.bf16.vlgmr.msra.gmra.mrb[148].mxu1 %v3884_v3 }
 0x40e   : > { %4946 = vmatprep.mubr.msk.bf16.mxu1 %vm5538_vm2, %v5537_v63  ;;  %4931 = vmatpush3.bf16.msra.mxu1 %v5516_v23 }
 0x40f   : > { %4932 = vmatprep.subr.bf16.mxu1 %v5537_v63 }
 0x412   : > { %4933 = vmatpush3.bf16.msra.mxu1 %v5517_v59 }
 0x413   : > { %4934 = vmatprep.subr.bf16.mxu1 %v5537_v63 }
 0x416   : > { %4935 = vmatpush3.bf16.msra.mxu1 %v5518_v27 }
 0x417   : > { %4936 = vmatprep.subr.bf16.mxu1 %v5537_v63 }
 0x41a   : > { %4937 = vmatpush3.bf16.msra.mxu1 %v5519_v38 }
 0x41b   : > { %4938 = vmatprep.subr.bf16.mxu1 %v5537_v63 }
 0x41e   : > { %4939 = vmatpush3.bf16.msra.mxu1 %v5520_v1 }
 0x41f   : > { %4940 = vmatprep.subr.bf16.mxu1 %v5537_v63 }
 0x422   : > { %4941 = vmatpush3.bf16.msra.mxu1 %v5521_v54 }
 0x423   : > { %4942 = vmatprep.subr.bf16.mxu1 %v5537_v63 }
 0x426   : > { %4943 = vmatpush3.bf16.msra.mxu1 %v5522_v36 }
 0x427   : > { %4944 = vmatprep.subr.bf16.mxu1 %v5537_v63 }
 0x42a   : > { %4945 = vmatpush3.bf16.msra.mxu1 %v4078_v39 }
 0x42b   : > { %4950 = vmatprep.subr.bf16.mxu1 %v5537_v63 }
 0x480   : > { %v3675_v2 = vpop.f32.mrb[136].mxu1 }
 0x481   : > { %v4868_v9 = vpop.f32.mrb[137].mxu1 }
 0x482   : > { %v3678_v49 = vpop.f32.mrb[138].mxu1 }
 0x483   : > { %v4869_v47 = vpop.f32.mrb[139].mxu1 }
 0x4a0   : > { %v3764_v24 = vpop.f32.mrb[140].mxu1 }
 0x4a1   : > { %v3765_v41 = vadd.f32 %v3764_v24, %v3675_v2  ;;  %v4888_v13 = vpop.f32.mrb[141].mxu1 }
 0x4a2   : > { %v3767_v0 = vpop.f32.mrb[142].mxu1 }
 0x4a3   : > { %v3768_v55 = vadd.f32 %v3767_v0, %v3678_v49  ;;  %v4889_v57 = vpop.f32.mrb[143].mxu1 }
 0x4c0   : > { %v3873_v62 = vpop.f32.mrb[144].mxu1 }
 0x4c1   : > { %v3880_v51 = vadd.f32 %v3873_v62, %v3765_v41  ;;  %v4908_v15 = vpop.f32.mrb[145].mxu1 }
 0x4c2   : > { %v3876_v34 = vpop.f32.mrb[146].mxu1 }
 0x4c3   : > { %v3881_v30 = vadd.f32 %v3876_v34, %v3768_v55  ;;  %v4909_v56 = vpop.f32.mrb[147].mxu1 }
 0x4e0   : > { %v3984_v8 = vpop.f32.mrb[148].mxu1 }
 0x4e1   : > { %v3991_v33 = vadd.f32 %v3984_v8, %v3880_v51  ;;  %v4928_v19 = vpop.f32.mrb[149].mxu1 }
 0x4e2   : > { %v3987_v58 = vpop.f32.mrb[150].mxu1 }
 0x4e3   : > { %v4000_v53 = vadd.f32 %v4780_v17, %v3991_v33  ;;  %v3992_v10 = vadd.f32 %v3987_v58, %v3881_v30  ;;  %v4929_v61 = vpop.f32.mrb[151].mxu1 }
 0x4e5   : > { %v4001_v44 = vadd.f32 %v4780_v17, %v3992_v10  ;;  %v4002_v7 = vmax.f32 %v4000_v53, 0.0 }
 0x4e7   : > { %v4003_v20 = vmax.f32 %v4001_v44, 0.0 }
 0x4e9   : > { %v4004_v31 = vpack.c.bf16 %v4003_v20, %v4002_v7 }
 0x4eb   : > { %4947 = vmatmul.mubr.msk.bf16.vlgmr.msra.gmra.mrb[152].mxu1 %vm4072_vm4, %v4004_v31 }
 0x4ec   : > { %4951 = vmatpush3.bf16.msra.mxu1 %v5524_v35  ;;  %4958 = vmatprep.mubr.msk.bf16.mxu1 %vm5538_vm2, %v5537_v63 }
 0x4ed   : > { %4952 = vmatprep.subr.bf16.mxu1 %v5537_v63 }
 0x4f0   : > { %4953 = vmatpush3.bf16.msra.mxu1 %v5525_v28 }
 0x4f1   : > { %4954 = vmatprep.subr.bf16.mxu1 %v5537_v63 }
 0x4f4   : > { %4955 = vmatpush3.bf16.msra.mxu1 %v5526_v18 }
 0x4f5   : > { %4956 = vmatprep.subr.bf16.mxu1 %v5537_v63 }
 0x4f8   : > { %4957 = vmatpush3.bf16.msra.mxu1 %v4167_v25 }
 0x5be   : > { %v4114_v29 = vpop.f32.mrb[152].mxu1 }
 0x5bf   : > { %v4115_v16 = vadd.f32 %v4781_v48, %v4114_v29  ;;  %v4948_v60 = vpop.f32.mrb[153].mxu1 }
 0x5c0   : > { %v4117_v46 = vpop.f32.mrb[154].mxu1 }
 0x5c1   : > { %v4118_v3 = vadd.f32 %v4781_v48, %v4117_v46  ;;  %v4949_v43 = vpop.f32.mrb[155].mxu1  ;;  %v4121_v45 = vmax.f32 %v4115_v16, 0.0 }
 0x5c3   : > { %v4122_v63 = vmax.f32 %v4118_v3, 0.0 }
 0x5c5   : > { %v4123_v11 = vpack.c.bf16 %v4122_v63, %v4121_v45 }
 0x5c7   : > { %4959 = vmatmul.mubr.msk.bf16.vlgmr.msra.gmra.mrb[156].mxu1 %vm4162_vm5, %v4123_v11 }
 0x69a   : > { %v4203_v26 = vpop.f32.mrb[156].mxu1 }
 0x69b   : > { %v4204_v50 = vadd.f32 %v4791_v37, %v4203_v26  ;;  %v4960_v32 = vpop.f32.mrb[157].mxu1 }
 0x69c   : > { %v4206_v12 = vpop.f32.mrb[158].mxu1 }
 0x69d   : > { %4210 = vst [vmem:[%s391_s12] sm:$0xff] %v4204_v50  ;;  %v4207_v6 = vadd.f32 %v4791_v37, %v4206_v12  ;;  %v4961_v21 = vpop.f32.mrb[159].mxu1 }
 0x69f   : > { %4211 = vst [vmem:[%s391_s12 + $0x8] sm:$0xff] %v4207_v6 }
 0x6a0 PF: > { %s21_s17 = sadd.s32 1, %s5535_s17  }
 0x6a1   : > { %p18_p5 = scmp.ge.s32.totalorder %s21_s17, 4  }
 0x6a3   :  { %20 = sbr.rel (!%p18_p5) target bundleno = 1 (0x1), region = 101 }

</bundles_post_ra>
